<compile_context>
chip_gen: v7x
topology: tpu7x:2x2x1
jax: 0.10.0
libtpu: 0.0.40
codegen_flags: <defaults>
</compile_context>

<pallas_src>
import functools
import numpy as np
import jax
import jax.numpy as jnp
from jax.experimental import pallas as pl
from jax.experimental.pallas import tpu as pltpu


def _round_up(v, m):
    return ((v + m - 1) // m) * m


def _randpos_kernel(x_ref, emb_ref, mask_ref, o_ref, *,
                    d_in, layers, fc, d_out, use_mxu):
    # x_ref:    (tm, d_in)
    # emb_ref:  (layers, d_in, fc)        fc = freq * channels
    # mask_ref: (1, fc)                   per-freq mask broadcast over channels
    # o_ref:    (tm, layers * d_out)      d_out = d_in + 2*fc  (lane-flattened output)
    x = x_ref[...]
    m = mask_ref[...]

    # NOTE: fully-masked freq columns could be skipped via scalar prefetch of the
    # active-freq count, but this kernel is HBM-write-bound so EUP work is not
    # the binding slot; left as-is.
    for l in range(layers):                      # layers is small & static
        w = emb_ref[l]                           # (d_in, fc)
        if use_mxu:
            y = jnp.dot(x, w, preferred_element_type=jnp.float32)
        else:
            # Tiny-K contraction on the VPU: d_in broadcast-FMAs instead of a
            # nearly empty MXU pass.
            y = x[:, 0:1] * w[0:1, :]
            for d in range(1, d_in):
                y = y + x[:, d:d + 1] * w[d:d + 1, :]

        cos_v = jnp.cos(y) * m
        sin_v = jnp.sin(y) * m

        base = l * d_out
        # Direct slice stores (no jnp.concatenate / reshape temps).
        o_ref[:, base:base + d_in] = x.astype(o_ref.dtype)
        o_ref[:, base + d_in:base + d_in + fc] = cos_v.astype(o_ref.dtype)
        o_ref[:, base + d_in + fc:base + d_out] = sin_v.astype(o_ref.dtype)


def rand_pos_embed(x, emb, mask, *, tm=512, out_dtype=None):
    """x: (N, d_in); emb: (d_in, L, F, C); mask: (F,).  Returns (N, L, d_in + 2*F*C)."""
    N, d_in = x.shape
    d_in2, L, F, C = emb.shape
    assert d_in == d_in2
    fc = F * C
    d_out = d_in + 2 * fc
    out_w = L * d_out
    out_dtype = x.dtype if out_dtype is None else out_dtype

    # Row tile: multiple of 8, no larger than the (padded) row count.
    tm = _round_up(min(tm, _round_up(N, 8)), 8)
    n_pad = pl.cdiv(N, tm) * tm
    x_p = jnp.pad(x, ((0, n_pad - N), (0, 0))) if n_pad != N else x
    grid = (n_pad // tm,)

    # Layer-major weights so the kernel slices a clean (d_in, fc) block per layer.
    emb_l = jnp.transpose(emb.reshape(d_in, L, fc), (1, 0, 2))       # (L, d_in, fc)
    # mask depends only on freq; broadcast over channels and flatten to (1, fc).
    mask_fc = jnp.broadcast_to(mask[:, None], (F, C)).reshape(1, fc)

    use_mxu = d_in > 8
    kernel = functools.partial(_randpos_kernel, d_in=d_in, layers=L,
                               fc=fc, d_out=d_out, use_mxu=use_mxu)

    # Rough VMEM budget: double-buffered x/out tiles + resident weights/mask,
    # with 2x headroom; clamped to v7x's 64 MiB physical VMEM.
    bytes_f32 = 4
    vmem_est = bytes_f32 * (
        2 * tm * _round_up(d_in, 128)
        + 2 * tm * _round_up(out_w, 128)
        + L * _round_up(d_in, 8) * _round_up(fc, 128)
        + 8 * _round_up(fc, 128))
    vmem_limit = int(min(max(2 * vmem_est, 32 * 1024 * 1024), 64 * 1024 * 1024))

    out_flat = pl.pallas_call(
        kernel,
        out_shape=jax.ShapeDtypeStruct((n_pad, out_w), out_dtype),
        grid_spec=pltpu.PrefetchScalarGridSpec(
            num_scalar_prefetch=0,
            grid=grid,
            in_specs=[
                pl.BlockSpec((tm, d_in), lambda i: (i, 0)),         # tile over rows
                pl.BlockSpec((L, d_in, fc), lambda i: (0, 0, 0)),   # weights resident
                pl.BlockSpec((1, fc), lambda i: (0, 0)),            # mask resident
            ],
            out_specs=pl.BlockSpec((tm, out_w), lambda i: (i, 0)),
        ),
        compiler_params=pltpu.CompilerParams(
            dimension_semantics=("parallel",),   # row tiles shard across TCs (v7x megacore)
            vmem_limit_bytes=vmem_limit,
        ),
    )(x_p, emb_l, mask_fc)

    # Contiguous reshape (free) back to the module's (N, L, d_out) layout.
    out = out_flat.reshape(n_pad, L, d_out)
    return out[:N] if n_pad != N else out


def _make_params(key, d_in, layers, freq, channels, iter_step, window_begin, window_end):
    # emb init (torch.randn -> normalize along d_in -> scale by 2**arange(freq))
    emb = jax.random.normal(key, (d_in, layers, freq, channels), jnp.float32)
    emb = emb / jnp.linalg.norm(emb, ord=2, axis=0, keepdims=True)
    emb = emb * (2.0 ** jnp.arange(freq, dtype=jnp.float32))[None, None, :, None]

    # mask via update_progress(iter_step) semantics (host-side, like the module)
    progress = float(np.clip((iter_step - window_begin) / (window_end - window_begin), 0, 1))
    begin_idx = int(progress * freq)
    mid_ratio = progress * freq - begin_idx
    if begin_idx == freq:
        begin_idx = freq - 1
        mid_ratio = 1.0
    mask = jnp.concatenate([
        jnp.ones((begin_idx,), jnp.float32),
        jnp.ones((1,), jnp.float32) * mid_ratio,
        jnp.zeros((freq - begin_idx - 1,), jnp.float32),
    ])
    return emb, mask


if __name__ == "__main__":
    d_in, layers, freq, channels = 4, 3, 4, 8
    N = 200   # deliberately not a multiple of the row tile -> exercises the tail path

    key = jax.random.PRNGKey(0)
    k_emb, k_x = jax.random.split(key)

    emb, mask = _make_params(k_emb, d_in, layers, freq, channels,
                             iter_step=25000, window_begin=0, window_end=50000)
    x = jax.random.normal(k_x, (N, d_in), jnp.float32)

    # tm=64 here so the small demo still runs a multi-step pipelined grid with a
    # padded remainder; production default is tm=512 (sweep 512-2048).
    out = rand_pos_embed(x, emb, mask, tm=64)
    out = jax.block_until_ready(out)

    # Pure-JAX reference (mirrors the PyTorch forward exactly).
    y_ref = (x[:, :, None, None, None] * emb[None]).sum(axis=1)          # (N, L, F, C)
    cos_ref = (jnp.cos(y_ref) * mask[None, None, :, None]).reshape(N, layers, freq * channels)
    sin_ref = (jnp.sin(y_ref) * mask[None, None, :, None]).reshape(N, layers, freq * channels)
    ref = jnp.concatenate(
        [jnp.broadcast_to(x[:, None, :], (N, layers, d_in)), cos_ref, sin_ref], axis=-1)

    np.testing.assert_allclose(np.asarray(out), np.asarray(ref), rtol=1e-5, atol=1e-5)
    print("KERNEL_OK")
</pallas_src>

<mosaic_0001>
module attributes {stable_mosaic.version = 11 : i64} {
  func.func @_randpos_kernel(%arg0: i32, %arg1: memref<64x4xf32, #tpu.memory_space<vmem>>, %arg2: memref<3x4x32xf32, #tpu.memory_space<vmem>>, %arg3: memref<1x32xf32, #tpu.memory_space<vmem>>, %arg4: memref<64x204xf32, #tpu.memory_space<vmem>>) attributes {dimension_semantics = [#tpu.dimension_semantics<parallel>], iteration_bounds = array<i64: 4>, scalar_prefetch = 0 : i64, scratch_operands = 0 : i64, tpu.core_type = #tpu.core_type<tc>, window_params = [{transform_indices = @transform_0, window_bounds = array<i64: 64, 4>}, {pipeline_mode = #tpu.pipeline_mode<synchronous>, transform_indices = @transform_1, window_bounds = array<i64: 3, 4, 32>}, {pipeline_mode = #tpu.pipeline_mode<synchronous>, transform_indices = @transform_2, window_bounds = array<i64: 1, 32>}, {transform_indices = @transform_3, window_bounds = array<i64: 64, 204>}]} {
    %c0 = arith.constant 0 : index
    %c0_0 = arith.constant 0 : index
    %0 = vector.load %arg1[%c0, %c0_0] : memref<64x4xf32, #tpu.memory_space<vmem>>, vector<64x4xf32>
    %c0_1 = arith.constant 0 : index
    %c0_2 = arith.constant 0 : index
    %1 = vector.load %arg3[%c0_1, %c0_2] : memref<1x32xf32, #tpu.memory_space<vmem>>, vector<1x32xf32>
    %c0_3 = arith.constant 0 : index
    %c0_4 = arith.constant 0 : index
    %c0_5 = arith.constant 0 : index
    %2 = vector.load %arg2[%c0_3, %c0_4, %c0_5] : memref<3x4x32xf32, #tpu.memory_space<vmem>>, vector<1x4x32xf32>
    %3 = vector.shape_cast %2 : vector<1x4x32xf32> to vector<4x32xf32>
    %4 = vector.extract_strided_slice %0 {offsets = [0, 0], sizes = [64, 1], strides = [1, 1]} : vector<64x4xf32> to vector<64x1xf32>
    %5 = vector.extract_strided_slice %3 {offsets = [0, 0], sizes = [1, 32], strides = [1, 1]} : vector<4x32xf32> to vector<1x32xf32>
    %6 = vector.broadcast %4 : vector<64x1xf32> to vector<64x32xf32>
    %7 = vector.broadcast %5 : vector<1x32xf32> to vector<64x32xf32>
    %8 = arith.mulf %6, %7 : vector<64x32xf32>
    %9 = vector.extract_strided_slice %0 {offsets = [0, 1], sizes = [64, 1], strides = [1, 1]} : vector<64x4xf32> to vector<64x1xf32>
    %10 = vector.extract_strided_slice %3 {offsets = [1, 0], sizes = [1, 32], strides = [1, 1]} : vector<4x32xf32> to vector<1x32xf32>
    %11 = vector.broadcast %9 : vector<64x1xf32> to vector<64x32xf32>
    %12 = vector.broadcast %10 : vector<1x32xf32> to vector<64x32xf32>
    %13 = arith.mulf %11, %12 : vector<64x32xf32>
    %14 = arith.addf %8, %13 : vector<64x32xf32>
    %15 = vector.extract_strided_slice %0 {offsets = [0, 2], sizes = [64, 1], strides = [1, 1]} : vector<64x4xf32> to vector<64x1xf32>
    %16 = vector.extract_strided_slice %3 {offsets = [2, 0], sizes = [1, 32], strides = [1, 1]} : vector<4x32xf32> to vector<1x32xf32>
    %17 = vector.broadcast %15 : vector<64x1xf32> to vector<64x32xf32>
    %18 = vector.broadcast %16 : vector<1x32xf32> to vector<64x32xf32>
    %19 = arith.mulf %17, %18 : vector<64x32xf32>
    %20 = arith.addf %14, %19 : vector<64x32xf32>
    %21 = vector.extract_strided_slice %0 {offsets = [0, 3], sizes = [64, 1], strides = [1, 1]} : vector<64x4xf32> to vector<64x1xf32>
    %22 = vector.extract_strided_slice %3 {offsets = [3, 0], sizes = [1, 32], strides = [1, 1]} : vector<4x32xf32> to vector<1x32xf32>
    %23 = vector.broadcast %21 : vector<64x1xf32> to vector<64x32xf32>
    %24 = vector.broadcast %22 : vector<1x32xf32> to vector<64x32xf32>
    %25 = arith.mulf %23, %24 : vector<64x32xf32>
    %26 = arith.addf %20, %25 : vector<64x32xf32>
    %27 = math.cos %26 : vector<64x32xf32>
    %28 = vector.broadcast %1 : vector<1x32xf32> to vector<64x32xf32>
    %29 = arith.mulf %27, %28 : vector<64x32xf32>
    %30 = math.sin %26 : vector<64x32xf32>
    %31 = vector.broadcast %1 : vector<1x32xf32> to vector<64x32xf32>
    %32 = arith.mulf %30, %31 : vector<64x32xf32>
    %c0_6 = arith.constant 0 : index
    %c0_7 = arith.constant 0 : index
    %33 = vector.load %arg4[%c0_6, %c0_7] : memref<64x204xf32, #tpu.memory_space<vmem>>, vector<64x4xf32>
    tpu.vector_store %arg4[%c0_6, %c0_7], %0 {strides = array<i32>} : memref<64x204xf32, #tpu.memory_space<vmem>>, vector<64x4xf32>,
    %c0_8 = arith.constant 0 : index
    %c4 = arith.constant 4 : index
    %34 = vector.load %arg4[%c0_8, %c4] : memref<64x204xf32, #tpu.memory_space<vmem>>, vector<64x32xf32>
    tpu.vector_store %arg4[%c0_8, %c4], %29 {strides = array<i32>} : memref<64x204xf32, #tpu.memory_space<vmem>>, vector<64x32xf32>,
    %c0_9 = arith.constant 0 : index
    %c36 = arith.constant 36 : index
    %35 = vector.load %arg4[%c0_9, %c36] : memref<64x204xf32, #tpu.memory_space<vmem>>, vector<64x32xf32>
    tpu.vector_store %arg4[%c0_9, %c36], %32 {strides = array<i32>} : memref<64x204xf32, #tpu.memory_space<vmem>>, vector<64x32xf32>,
    %c1 = arith.constant 1 : index
    %c0_10 = arith.constant 0 : index
    %c0_11 = arith.constant 0 : index
    %36 = vector.load %arg2[%c1, %c0_10, %c0_11] : memref<3x4x32xf32, #tpu.memory_space<vmem>>, vector<1x4x32xf32>
    %37 = vector.shape_cast %36 : vector<1x4x32xf32> to vector<4x32xf32>
    %38 = vector.extract_strided_slice %0 {offsets = [0, 0], sizes = [64, 1], strides = [1, 1]} : vector<64x4xf32> to vector<64x1xf32>
    %39 = vector.extract_strided_slice %37 {offsets = [0, 0], sizes = [1, 32], strides = [1, 1]} : vector<4x32xf32> to vector<1x32xf32>
    %40 = vector.broadcast %38 : vector<64x1xf32> to vector<64x32xf32>
    %41 = vector.broadcast %39 : vector<1x32xf32> to vector<64x32xf32>
    %42 = arith.mulf %40, %41 : vector<64x32xf32>
    %43 = vector.extract_strided_slice %0 {offsets = [0, 1], sizes = [64, 1], strides = [1, 1]} : vector<64x4xf32> to vector<64x1xf32>
    %44 = vector.extract_strided_slice %37 {offsets = [1, 0], sizes = [1, 32], strides = [1, 1]} : vector<4x32xf32> to vector<1x32xf32>
    %45 = vector.broadcast %43 : vector<64x1xf32> to vector<64x32xf32>
    %46 = vector.broadcast %44 : vector<1x32xf32> to vector<64x32xf32>
    %47 = arith.mulf %45, %46 : vector<64x32xf32>
    %48 = arith.addf %42, %47 : vector<64x32xf32>
    %49 = vector.extract_strided_slice %0 {offsets = [0, 2], sizes = [64, 1], strides = [1, 1]} : vector<64x4xf32> to vector<64x1xf32>
    %50 = vector.extract_strided_slice %37 {offsets = [2, 0], sizes = [1, 32], strides = [1, 1]} : vector<4x32xf32> to vector<1x32xf32>
    %51 = vector.broadcast %49 : vector<64x1xf32> to vector<64x32xf32>
    %52 = vector.broadcast %50 : vector<1x32xf32> to vector<64x32xf32>
    %53 = arith.mulf %51, %52 : vector<64x32xf32>
    %54 = arith.addf %48, %53 : vector<64x32xf32>
    %55 = vector.extract_strided_slice %0 {offsets = [0, 3], sizes = [64, 1], strides = [1, 1]} : vector<64x4xf32> to vector<64x1xf32>
    %56 = vector.extract_strided_slice %37 {offsets = [3, 0], sizes = [1, 32], strides = [1, 1]} : vector<4x32xf32> to vector<1x32xf32>
    %57 = vector.broadcast %55 : vector<64x1xf32> to vector<64x32xf32>
    %58 = vector.broadcast %56 : vector<1x32xf32> to vector<64x32xf32>
    %59 = arith.mulf %57, %58 : vector<64x32xf32>
    %60 = arith.addf %54, %59 : vector<64x32xf32>
    %61 = math.cos %60 : vector<64x32xf32>
    %62 = vector.broadcast %1 : vector<1x32xf32> to vector<64x32xf32>
    %63 = arith.mulf %61, %62 : vector<64x32xf32>
    %64 = math.sin %60 : vector<64x32xf32>
    %65 = vector.broadcast %1 : vector<1x32xf32> to vector<64x32xf32>
    %66 = arith.mulf %64, %65 : vector<64x32xf32>
    %c0_12 = arith.constant 0 : index
    %c68 = arith.constant 68 : index
    %67 = vector.load %arg4[%c0_12, %c68] : memref<64x204xf32, #tpu.memory_space<vmem>>, vector<64x4xf32>
    tpu.vector_store %arg4[%c0_12, %c68], %0 {strides = array<i32>} : memref<64x204xf32, #tpu.memory_space<vmem>>, vector<64x4xf32>,
    %c0_13 = arith.constant 0 : index
    %c72 = arith.constant 72 : index
    %68 = vector.load %arg4[%c0_13, %c72] : memref<64x204xf32, #tpu.memory_space<vmem>>, vector<64x32xf32>
    tpu.vector_store %arg4[%c0_13, %c72], %63 {strides = array<i32>} : memref<64x204xf32, #tpu.memory_space<vmem>>, vector<64x32xf32>,
    %c0_14 = arith.constant 0 : index
    %c104 = arith.constant 104 : index
    %69 = vector.load %arg4[%c0_14, %c104] : memref<64x204xf32, #tpu.memory_space<vmem>>, vector<64x32xf32>
    tpu.vector_store %arg4[%c0_14, %c104], %66 {strides = array<i32>} : memref<64x204xf32, #tpu.memory_space<vmem>>, vector<64x32xf32>,
    %c2 = arith.constant 2 : index
    %c0_15 = arith.constant 0 : index
    %c0_16 = arith.constant 0 : index
    %70 = vector.load %arg2[%c2, %c0_15, %c0_16] : memref<3x4x32xf32, #tpu.memory_space<vmem>>, vector<1x4x32xf32>
    %71 = vector.shape_cast %70 : vector<1x4x32xf32> to vector<4x32xf32>
    %72 = vector.extract_strided_slice %0 {offsets = [0, 0], sizes = [64, 1], strides = [1, 1]} : vector<64x4xf32> to vector<64x1xf32>
    %73 = vector.extract_strided_slice %71 {offsets = [0, 0], sizes = [1, 32], strides = [1, 1]} : vector<4x32xf32> to vector<1x32xf32>
    %74 = vector.broadcast %72 : vector<64x1xf32> to vector<64x32xf32>
    %75 = vector.broadcast %73 : vector<1x32xf32> to vector<64x32xf32>
    %76 = arith.mulf %74, %75 : vector<64x32xf32>
    %77 = vector.extract_strided_slice %0 {offsets = [0, 1], sizes = [64, 1], strides = [1, 1]} : vector<64x4xf32> to vector<64x1xf32>
    %78 = vector.extract_strided_slice %71 {offsets = [1, 0], sizes = [1, 32], strides = [1, 1]} : vector<4x32xf32> to vector<1x32xf32>
    %79 = vector.broadcast %77 : vector<64x1xf32> to vector<64x32xf32>
    %80 = vector.broadcast %78 : vector<1x32xf32> to vector<64x32xf32>
    %81 = arith.mulf %79, %80 : vector<64x32xf32>
    %82 = arith.addf %76, %81 : vector<64x32xf32>
    %83 = vector.extract_strided_slice %0 {offsets = [0, 2], sizes = [64, 1], strides = [1, 1]} : vector<64x4xf32> to vector<64x1xf32>
    %84 = vector.extract_strided_slice %71 {offsets = [2, 0], sizes = [1, 32], strides = [1, 1]} : vector<4x32xf32> to vector<1x32xf32>
    %85 = vector.broadcast %83 : vector<64x1xf32> to vector<64x32xf32>
    %86 = vector.broadcast %84 : vector<1x32xf32> to vector<64x32xf32>
    %87 = arith.mulf %85, %86 : vector<64x32xf32>
    %88 = arith.addf %82, %87 : vector<64x32xf32>
    %89 = vector.extract_strided_slice %0 {offsets = [0, 3], sizes = [64, 1], strides = [1, 1]} : vector<64x4xf32> to vector<64x1xf32>
    %90 = vector.extract_strided_slice %71 {offsets = [3, 0], sizes = [1, 32], strides = [1, 1]} : vector<4x32xf32> to vector<1x32xf32>
    %91 = vector.broadcast %89 : vector<64x1xf32> to vector<64x32xf32>
    %92 = vector.broadcast %90 : vector<1x32xf32> to vector<64x32xf32>
    %93 = arith.mulf %91, %92 : vector<64x32xf32>
    %94 = arith.addf %88, %93 : vector<64x32xf32>
    %95 = math.cos %94 : vector<64x32xf32>
    %96 = vector.broadcast %1 : vector<1x32xf32> to vector<64x32xf32>
    %97 = arith.mulf %95, %96 : vector<64x32xf32>
    %98 = math.sin %94 : vector<64x32xf32>
    %99 = vector.broadcast %1 : vector<1x32xf32> to vector<64x32xf32>
    %100 = arith.mulf %98, %99 : vector<64x32xf32>
    %c0_17 = arith.constant 0 : index
    %c136 = arith.constant 136 : index
    %101 = vector.load %arg4[%c0_17, %c136] : memref<64x204xf32, #tpu.memory_space<vmem>>, vector<64x4xf32>
    tpu.vector_store %arg4[%c0_17, %c136], %0 {strides = array<i32>} : memref<64x204xf32, #tpu.memory_space<vmem>>, vector<64x4xf32>,
    %c0_18 = arith.constant 0 : index
    %c140 = arith.constant 140 : index
    %102 = vector.load %arg4[%c0_18, %c140] : memref<64x204xf32, #tpu.memory_space<vmem>>, vector<64x32xf32>
    tpu.vector_store %arg4[%c0_18, %c140], %97 {strides = array<i32>} : memref<64x204xf32, #tpu.memory_space<vmem>>, vector<64x32xf32>,
    %c0_19 = arith.constant 0 : index
    %c172 = arith.constant 172 : index
    %103 = vector.load %arg4[%c0_19, %c172] : memref<64x204xf32, #tpu.memory_space<vmem>>, vector<64x32xf32>
    tpu.vector_store %arg4[%c0_19, %c172], %100 {strides = array<i32>} : memref<64x204xf32, #tpu.memory_space<vmem>>, vector<64x32xf32>,
    return
  }
  func.func @transform_0(%arg0: i32) -> (i32, i32) {
    %c0_i32 = arith.constant 0 : i32
    %c0_i32_0 = arith.constant 0 : i32
    return %arg0, %c0_i32 : i32, i32
  }
  func.func @transform_1(%arg0: i32) -> (i32, i32, i32) {
    %c0_i32 = arith.constant 0 : i32
    %c0_i32_0 = arith.constant 0 : i32
    %c0_i32_1 = arith.constant 0 : i32
    %c0_i32_2 = arith.constant 0 : i32
    return %c0_i32, %c0_i32_0, %c0_i32_1 : i32, i32, i32
  }
  func.func @transform_2(%arg0: i32) -> (i32, i32) {
    %c0_i32 = arith.constant 0 : i32
    %c0_i32_0 = arith.constant 0 : i32
    %c0_i32_1 = arith.constant 0 : i32
    return %c0_i32, %c0_i32_0 : i32, i32
  }
  func.func @transform_3(%arg0: i32) -> (i32, i32) {
    %c0_i32 = arith.constant 0 : i32
    %c0_i32_0 = arith.constant 0 : i32
    return %arg0, %c0_i32 : i32, i32
  }
}

</mosaic_0001>

<bundles_post_ra>
// kernel: tpu_custom_call.1
= control target key start
LH: loop header
LB: loop body
LE: loop exit
PB: predicated region body
PF: predicated region fallthrough
CT: control target
= control target key end

     0   :  { %s6436_s12 = smov 0   ;;  %s10761_s0 = inlined_call_operand.vmem [shape: f32[256,4], index: 0, kind: input, shape index: {}]   ;;  %s10762_s1 = inlined_call_operand.vmem [shape: f32[3,4,32], index: 1, kind: input, shape index: {}]   ;;  %s10763_s2 = inlined_call_operand.vmem [shape: f32[1,32], index: 2, kind: input, shape index: {}]   ;;  %s10764_s3 = inlined_call_operand.vmem [shape: f32[256,204], index: 3, kind: output, shape index: {}]  }
   0x1 LB: > { %s5952_s13 = sadd.s32 4294967295, %s6396_s12   ;;  %p5956_p0 = scmp.ge.s32.totalorder %s6396_s12, 1  ;;  %s6396_s12 = sphi %s6436_s12, %s13_s12  }
   0x2   : > { %p138_p1 = scmp.lt.s32.totalorder %s6396_s12, 5 }
   0x4   : > { %p139_p2 = pnand %p5956_p0, %p138_p1 }
   0x6   : > { %142 = sbr.rel (%p139_p2) target bundleno = 1040 (0x410), region = 32 }
   0xd   : > { %s5957_s14 = sshll.u32 %s5952_s13, 3  ;;  %v6398_v0 = vmov 0   ;;  %v6399_v9 = vmov 1   ;;  %v6400_v10 = vmov 2   ;;  %v6401_v11 = vmov 3   ;;  %s6402_s25 = smov 68  }
   0xe   : > { %6283 = vset.pattern.permute.xlu1 %v6398_v0  ;;  %6282 = vset.pattern.permute.xlu0 %v6398_v0  ;;  %p164_p3 = scmp.lt.s32.totalorder %s5957_s14, 31  ;;  %v226_v12 = vlaneseq  ;;  %v6504_v15 = vld [vmem:[%s10762_s1 + $0x4] sm:$0xf]  ;;  %v6509_v16 = vld [vmem:[%s10762_s1 + $0x8] sm:$0xf]  ;;  %s6403_s26 = smov 8  }
   0xf   : > { %v6524_v25 = vld [vmem:[%s10762_s1] sm:$0xf]  ;;  %s6410_s29 = smov 4   ;;  %s6411_s30 = smov 36  }
  0x10   : > { %s11393_s14 = smov (!%p164_p3, %s5957_s14), 31  ;;  %v6498_v13 = vshrl.u32 %v226_v12, 7  ;;  %s6412_s6 = smov 72  }
  0x11   : > { %s5958_s15 = sshll.u32 %s11393_s14, 3  ;;  %s6413_s9 = smov 104  }
  0x12   : > { %s167_s18 = scalar_lea.vmem %s10761_s0, %s5958_s15  ;;  %v228_v14 = vsub.s32 0, %v6498_v13  ;;  %v272_v41 = vsub.s32 1, %v6498_v13  ;;  %s6414_s10 = smov 12  }
  0x13   : > { %v6450_v1 = vld [vmem:[%s167_s18 + $0x10] sm:$0xff]  ;;  %v6452_v2 = vld [vmem:[%s167_s18] sm:$0xff]  ;;  %v6456_v3 = vld [vmem:[%s167_s18 + $0x18] sm:$0xff]  ;;  %s6159_s15 = sshll.u32 %s11393_s14, 4  ;;  %s6415_s20 = smov 44  }
  0x14   : > { %10996 = vst [vmem:[#allocation2_spill] sm:$0xff] %v6450_v1  ;;  %10997 = vst [vmem:[#allocation3_spill] sm:$0xff] %v6452_v2  ;;  %198 = vperm.xlu1 %6283, %v6450_v1   ;;  %188 = vperm.xlu0 %6282, %v6452_v2   ;;  %v6458_v4 = vld [vmem:[%s167_s18 + $0x8] sm:$0xff]  ;;  %v6464_v6 = vld [vmem:[%s167_s18 + $0x20] sm:$0xff]  ;;  %v2168_v17 = vrot.slane %v6504_v15, %v228_v14  ;;  %v4038_v18 = vrot.slane %v6509_v16, %v228_v14  ;;  %s10406_s17 = scalar_lea.vmem %s10764_s3, %s6159_s15 }
  0x15   : > { %10998 = vst [vmem:[#allocation4_spill] sm:$0xff] %v6456_v3  ;;  %10999 = vst [vmem:[#allocation5_spill] sm:$0xff] %v6458_v4  ;;  %v6462_v5 = vld [vmem:[%s167_s18 + $0x28] sm:$0xff]  ;;  %v6468_v7 = vld [vmem:[%s167_s18 + $0x38] sm:$0xff]  ;;  %v6531_v32 = vrot.slane %v6524_v25, %v228_v14  ;;  %v2180_v50 = vrot.slane %v6504_v15, %v272_v41  ;;  %v4050_v51 = vrot.slane %v6509_v16, %v272_v41 }
  0x16   : > { %11000 = vst [vmem:[#allocation6_spill] sm:$0xff] %v6462_v5  ;;  %11001 = vst [vmem:[#allocation7_spill] sm:$0xff] %v6464_v6  ;;  %v6470_v8 = vld [vmem:[%s167_s18 + $0x30] sm:$0xff]  ;;  %v6549_v58 = vrot.slane %v6524_v25, %v272_v41 }
  0x17   : > { %11002 = vst [vmem:[#allocation8_spill] sm:$0xff] %v6468_v7  ;;  %11003 = vst [vmem:[#allocation9_spill] sm:$0xff] %v6470_v8 }
  0x18   : > { %203 = vperm.xlu1 %6283, %v6456_v3   ;;  %193 = vperm.xlu0 %6282, %v6458_v4  }
  0x1c   : > { %213 = vperm.xlu1 %6283, %v6462_v5   ;;  %208 = vperm.xlu0 %6282, %v6464_v6  }
  0x20   : > { %223 = vperm.xlu1 %6283, %v6468_v7   ;;  %218 = vperm.xlu0 %6282, %v6470_v8  }
  0x24   : > { %6285 = vset.pattern.permute.xlu1 %v6399_v9  ;;  %6284 = vset.pattern.permute.xlu0 %v6399_v9 }
  0x25   : > { %243 = vperm.xlu1 %6285, %v6458_v4   ;;  %239 = vperm.xlu0 %6284, %v6452_v2  }
  0x29   : > { %247 = vperm.xlu1 %6285, %v6450_v1   ;;  %251 = vperm.xlu0 %6284, %v6456_v3  }
  0x2d   : > { %255 = vperm.xlu1 %6285, %v6464_v6   ;;  %259 = vperm.xlu0 %6284, %v6462_v5  }
  0x31   : > { %263 = vperm.xlu1 %6285, %v6470_v8   ;;  %267 = vperm.xlu0 %6284, %v6468_v7  }
  0x35   : > { %6286 = vset.pattern.permute.xlu1 %v6400_v10  ;;  %6287 = vset.pattern.permute.xlu0 %v6400_v10 }
  0x36   : > { %291 = vperm.xlu1 %6286, %v6452_v2   ;;  %295 = vperm.xlu0 %6287, %v6458_v4  }
  0x3a   : > { %299 = vperm.xlu1 %6286, %v6450_v1   ;;  %307 = vperm.xlu0 %6287, %v6464_v6  }
  0x3e   : > { %303 = vperm.xlu1 %6286, %v6456_v3   ;;  %315 = vperm.xlu0 %6287, %v6470_v8  }
  0x42   : > { %311 = vperm.xlu1 %6286, %v6462_v5   ;;  %6288 = vset.pattern.permute.xlu0 %v6401_v11 }
  0x43   : > { %343 = vperm.xlu0 %6288, %v6452_v2  }
  0x46   : > { %319 = vperm.xlu1 %6286, %v6468_v7  }
  0x47   : > { %355 = vperm.xlu0 %6288, %v6456_v3  }
  0x4a   : > { %6289 = vset.pattern.permute.xlu1 %v6401_v11 }
  0x4b   : > { %347 = vperm.xlu1 %6289, %v6458_v4   ;;  %363 = vperm.xlu0 %6288, %v6462_v5  }
  0x4f   : > { %351 = vperm.xlu1 %6289, %v6450_v1   ;;  %371 = vperm.xlu0 %6288, %v6468_v7  }
  0x53   : > { %359 = vperm.xlu1 %6289, %v6464_v6   ;;  %3911 = vrot.lane.b32.xlu0 %v6458_v4, %s6402_s25 }
  0x57   : > { %367 = vperm.xlu1 %6289, %v6470_v8   ;;  %3915 = vrot.lane.b32.xlu0 %v6456_v3, %s6402_s25 }
  0x5b   : > { %3909 = vrot.lane.b32.xlu1 %v6452_v2, %s6402_s25  ;;  %3919 = vrot.lane.b32.xlu0 %v6462_v5, %s6402_s25 }
  0x5f   : > { %3913 = vrot.lane.b32.xlu1 %v6450_v1, %s6402_s25  ;;  %3923 = vrot.lane.b32.xlu0 %v6468_v7, %s6402_s25 }
  0x63   : > { %3917 = vrot.lane.b32.xlu1 %v6464_v6, %s6402_s25  ;;  %5781 = vrot.lane.b32.xlu0 %v6458_v4, %s6403_s26 }
  0x67   : > { %3921 = vrot.lane.b32.xlu1 %v6470_v8, %s6402_s25  ;;  %5785 = vrot.lane.b32.xlu0 %v6456_v3, %s6403_s26 }
  0x6b   : > { %5779 = vrot.lane.b32.xlu1 %v6452_v2, %s6403_s26  ;;  %5789 = vrot.lane.b32.xlu0 %v6462_v5, %s6403_s26 }
  0x6f   : > { %5783 = vrot.lane.b32.xlu1 %v6450_v1, %s6403_s26  ;;  %5793 = vrot.lane.b32.xlu0 %v6468_v7, %s6403_s26 }
  0x73   : > { %5787 = vrot.lane.b32.xlu1 %v6464_v6, %s6403_s26 }
  0x77   : > { %5791 = vrot.lane.b32.xlu1 %v6470_v8, %s6403_s26 }
  0x93   : > { %v6513_v19 = vpop.permute.xlu1 %198  ;;  %v6515_v20 = vpop.permute.xlu0 %188 }
  0x94   : > { %v2171_v21 = vmul.f32 %v2168_v17, %v6513_v19  ;;  %v4041_v22 = vmul.f32 %v4038_v18, %v6513_v19  ;;  %v2169_v23 = vmul.f32 %v2168_v17, %v6515_v20  ;;  %v4039_v24 = vmul.f32 %v4038_v18, %v6515_v20 }
  0x97   : > { %v204_v26 = vpop.permute.xlu1 %203  ;;  %v6526_v27 = vpop.permute.xlu0 %193 }
  0x98   : > { %v2172_v28 = vmul.f32 %v2168_v17, %v204_v26  ;;  %v4042_v29 = vmul.f32 %v4038_v18, %v204_v26  ;;  %v2170_v30 = vmul.f32 %v2168_v17, %v6526_v27  ;;  %v4040_v31 = vmul.f32 %v4038_v18, %v6526_v27 }
  0x99   : > { %v233_v9 = vmul.f32 %v6531_v32, %v204_v26 }
  0x9b   : > { %v214_v33 = vpop.permute.xlu1 %213  ;;  %v209_v34 = vpop.permute.xlu0 %208 }
  0x9c   : > { %v235_v35 = vmul.f32 %v6531_v32, %v214_v33  ;;  %v2174_v36 = vmul.f32 %v2168_v17, %v214_v33  ;;  %v4044_v37 = vmul.f32 %v4038_v18, %v214_v33  ;;  %v234_v38 = vmul.f32 %v6531_v32, %v209_v34 }
  0x9d   : > { %v2173_v39 = vmul.f32 %v2168_v17, %v209_v34  ;;  %v4043_v40 = vmul.f32 %v4038_v18, %v209_v34 }
  0x9f   : > { %v224_v42 = vpop.permute.xlu1 %223  ;;  %v219_v43 = vpop.permute.xlu0 %218 }
  0xa0   : > { %v237_v44 = vmul.f32 %v6531_v32, %v224_v42  ;;  %v2176_v45 = vmul.f32 %v2168_v17, %v224_v42  ;;  %v4046_v46 = vmul.f32 %v4038_v18, %v224_v42  ;;  %v236_v47 = vmul.f32 %v6531_v32, %v219_v43 }
  0xa1   : > { %v2175_v48 = vmul.f32 %v2168_v17, %v219_v43  ;;  %v4045_v49 = vmul.f32 %v4038_v18, %v219_v43 }
  0xa4   : > { %v6540_v52 = vpop.permute.xlu1 %243  ;;  %v6542_v53 = vpop.permute.xlu0 %239 }
  0xa5   : > { %v2182_v54 = vmul.f32 %v2180_v50, %v6540_v52  ;;  %v4052_v55 = vmul.f32 %v4050_v51, %v6540_v52  ;;  %v2181_v56 = vmul.f32 %v2180_v50, %v6542_v53  ;;  %v4051_v57 = vmul.f32 %v4050_v51, %v6542_v53 }
  0xa7   : > { %v2190_v59 = vadd.f32 %v2182_v54, %v2170_v30  ;;  %v4060_v60 = vadd.f32 %v4052_v55, %v4040_v31  ;;  %v2189_v61 = vadd.f32 %v2181_v56, %v2169_v23  ;;  %v4059_v62 = vadd.f32 %v4051_v57, %v4039_v24 }
  0xa8   : > { %v6551_v63 = vpop.permute.xlu1 %247  ;;  %v252_v0 = vpop.permute.xlu0 %251  ;;  %v324_v56 = vsub.s32 2, %v6498_v13 }
  0xa9   : > { %v2183_v10 = vmul.f32 %v2180_v50, %v6551_v63  ;;  %v4053_v11 = vmul.f32 %v4050_v51, %v6551_v63  ;;  %v277_v12 = vmul.f32 %v6549_v58, %v252_v0  ;;  %v2184_v14 = vmul.f32 %v2180_v50, %v252_v0 }
  0xaa   : > { %v4054_v17 = vmul.f32 %v4050_v51, %v252_v0 }
  0xab   : > { %v2191_v18 = vadd.f32 %v2183_v10, %v2171_v21  ;;  %v4061_v33 = vadd.f32 %v4053_v11, %v4041_v22  ;;  %v6557_v34 = vadd.f32 %v277_v12, %v233_v9  ;;  %v6559_v30 = vadd.f32 %v2184_v14, %v2172_v28 }
  0xac   : > { %v6561_v23 = vadd.f32 %v4054_v17, %v4042_v29  ;;  %v256_v24 = vpop.permute.xlu1 %255  ;;  %v260_v31 = vpop.permute.xlu0 %259 }
  0xad   : > { %v278_v26 = vmul.f32 %v6549_v58, %v256_v24  ;;  %v2185_v41 = vmul.f32 %v2180_v50, %v256_v24  ;;  %v4055_v42 = vmul.f32 %v4050_v51, %v256_v24  ;;  %v279_v43 = vmul.f32 %v6549_v58, %v260_v31 }
  0xae   : > { %v2186_v54 = vmul.f32 %v2180_v50, %v260_v31  ;;  %v4056_v55 = vmul.f32 %v4050_v51, %v260_v31 }
  0xaf   : > { %v286_v21 = vadd.f32 %v278_v26, %v234_v38  ;;  %v2193_v22 = vadd.f32 %v2185_v41, %v2173_v39  ;;  %v4063_v57 = vadd.f32 %v4055_v42, %v4043_v40  ;;  %v6566_v0 = vadd.f32 %v279_v43, %v235_v35 }
  0xb0   : > { %v6568_v28 = vadd.f32 %v2186_v54, %v2174_v36  ;;  %v6570_v29 = vadd.f32 %v4056_v55, %v4044_v37  ;;  %v264_v9 = vpop.permute.xlu1 %263  ;;  %v268_v10 = vpop.permute.xlu0 %267  ;;  %v6575_v38 = vrot.slane %v6504_v15, %v324_v56  ;;  %v6578_v35 = vrot.slane %v6509_v16, %v324_v56 }
  0xb1   : > { %v280_v11 = vmul.f32 %v6549_v58, %v264_v9  ;;  %v2187_v12 = vmul.f32 %v2180_v50, %v264_v9  ;;  %v4057_v14 = vmul.f32 %v4050_v51, %v264_v9  ;;  %v281_v17 = vmul.f32 %v6549_v58, %v268_v10 }
  0xb2   : > { %v2188_v24 = vmul.f32 %v2180_v50, %v268_v10  ;;  %v4058_v31 = vmul.f32 %v4050_v51, %v268_v10 }
  0xb3   : > { %v288_v36 = vadd.f32 %v280_v11, %v236_v47  ;;  %v2195_v39 = vadd.f32 %v2187_v12, %v2175_v48  ;;  %v4065_v37 = vadd.f32 %v4057_v14, %v4045_v49  ;;  %v6580_v40 = vadd.f32 %v281_v17, %v237_v44 }
  0xb4   : > { %v6582_v26 = vadd.f32 %v2188_v24, %v2176_v45  ;;  %v6584_v41 = vadd.f32 %v4058_v31, %v4046_v46  ;;  %v6595_v44 = vrot.slane %v6524_v25, %v324_v56 }
  0xb5   : > { %v292_v42 = vpop.permute.xlu1 %291  ;;  %v6586_v43 = vpop.permute.xlu0 %295 }
  0xb6   : > { %v2201_v50 = vmul.f32 %v6575_v38, %v292_v42  ;;  %v4071_v51 = vmul.f32 %v6578_v35, %v292_v42  ;;  %v2202_v54 = vmul.f32 %v6575_v38, %v6586_v43  ;;  %v4072_v47 = vmul.f32 %v6578_v35, %v6586_v43 }
  0xb8   : > { %v2209_v45 = vadd.f32 %v2201_v50, %v2189_v61  ;;  %v4079_v48 = vadd.f32 %v4071_v51, %v4059_v62  ;;  %v6597_v46 = vadd.f32 %v2202_v54, %v2190_v59  ;;  %v6599_v49 = vadd.f32 %v4072_v47, %v4060_v60 }
  0xb9   : > { %v6601_v55 = vpop.permute.xlu1 %299  ;;  %v308_v9 = vpop.permute.xlu0 %307  ;;  %v376_v59 = vsub.s32 3, %v6498_v13 }
  0xba   : > { %v2203_v10 = vmul.f32 %v6575_v38, %v6601_v55  ;;  %v4073_v11 = vmul.f32 %v6578_v35, %v6601_v55  ;;  %v330_v12 = vmul.f32 %v6595_v44, %v308_v9  ;;  %v2205_v56 = vmul.f32 %v6575_v38, %v308_v9 }
  0xbb   : > { %v4075_v61 = vmul.f32 %v6578_v35, %v308_v9 }
  0xbc   : > { %v6611_v62 = vadd.f32 %v2203_v10, %v2191_v18  ;;  %v6613_v60 = vadd.f32 %v4073_v11, %v4061_v33  ;;  %v6615_v14 = vadd.f32 %v330_v12, %v286_v21  ;;  %v6617_v17 = vadd.f32 %v2205_v56, %v2193_v22 }
  0xbd   : > { %v6619_v24 = vadd.f32 %v4075_v61, %v4063_v57  ;;  %v304_v31 = vpop.permute.xlu1 %303  ;;  %v316_v50 = vpop.permute.xlu0 %315  ;;  %v6627_v33 = vrot.slane %v6504_v15, %v376_v59  ;;  %v6630_v21 = vrot.slane %v6509_v16, %v376_v59  ;;  %v274_v16 = vmul.f32 %v6549_v58, %v6542_v53 }
  0xbe   : > { %v2204_v51 = vmul.f32 %v6575_v38, %v304_v31  ;;  %v4074_v54 = vmul.f32 %v6578_v35, %v304_v31  ;;  %v332_v47 = vmul.f32 %v6595_v44, %v316_v50  ;;  %v2207_v13 = vmul.f32 %v6575_v38, %v316_v50 }
  0xbf   : > { %v4077_v18 = vmul.f32 %v6578_v35, %v316_v50  ;;  %v326_v53 = vmul.f32 %v6595_v44, %v292_v42 }
  0xc0   : > { %v2212_v22 = vadd.f32 %v2204_v51, %v6559_v30  ;;  %v4082_v57 = vadd.f32 %v4074_v54, %v6561_v23  ;;  %v6634_v9 = vadd.f32 %v332_v47, %v288_v36  ;;  %v6636_v10 = vadd.f32 %v2207_v13, %v2195_v39 }
  0xc1   : > { %v6638_v11 = vadd.f32 %v4077_v18, %v4065_v37  ;;  %v312_v12 = vpop.permute.xlu1 %311  ;;  %v6646_v30 = vrot.slane %v6524_v25, %v376_v59  ;;  %v230_v54 = vmul.f32 %v6531_v32, %v6515_v20 }
  0xc2   : > { %v331_v56 = vmul.f32 %v6595_v44, %v312_v12  ;;  %v2206_v61 = vmul.f32 %v6575_v38, %v312_v12  ;;  %v4076_v15 = vmul.f32 %v6578_v35, %v312_v12  ;;  %v344_v50 = vpop.permute.xlu0 %343 }
  0xc3   : > { %11004 = vst [vmem:[#allocation10_spill] sm:$0xff] %v6638_v11  ;;  %v2221_v23 = vmul.f32 %v6627_v33, %v344_v50  ;;  %v4091_v36 = vmul.f32 %v6630_v21, %v344_v50  ;;  %v282_v20 = vadd.f32 %v274_v16, %v230_v54 }
  0xc4   : > { %v6651_v39 = vadd.f32 %v331_v56, %v6566_v0  ;;  %v6654_v37 = vadd.f32 %v2206_v61, %v6568_v28  ;;  %v6657_v51 = vadd.f32 %v4076_v15, %v6570_v29  ;;  %v378_v29 = vmul.f32 %v6646_v30, %v344_v50 }
  0xc5   : > { %v6662_v25 = vadd.f32 %v2221_v23, %v2209_v45  ;;  %v6664_v59 = vadd.f32 %v4091_v36, %v4079_v48  ;;  %v320_v47 = vpop.permute.xlu1 %319  ;;  %v329_v50 = vmul.f32 %v6595_v44, %v304_v31 }
  0xc6   : > { %v333_v13 = vmul.f32 %v6595_v44, %v320_v47  ;;  %v2208_v0 = vmul.f32 %v6575_v38, %v320_v47  ;;  %v4078_v28 = vmul.f32 %v6578_v35, %v320_v47  ;;  %v356_v18 = vpop.permute.xlu0 %355  ;;  %v334_v35 = vadd.f32 %v326_v53, %v282_v20 }
  0xc7   : > { %11005 = vst [vmem:[#allocation11_spill] sm:$0xff] %v6662_v25  ;;  %11006 = vst [vmem:[#allocation12_spill] sm:$0xff] %v6664_v59  ;;  %v2224_v38 = vmul.f32 %v6627_v33, %v356_v18  ;;  %v4094_v56 = vmul.f32 %v6630_v21, %v356_v18  ;;  %v381_v23 = vmul.f32 %v6646_v30, %v356_v18 }
  0xc8   : > { %v6673_v42 = vadd.f32 %v333_v13, %v6580_v40  ;;  %v6676_v45 = vadd.f32 %v2208_v0, %v6582_v26  ;;  %v6679_v48 = vadd.f32 %v4078_v28, %v6584_v41  ;;  %v6687_v40 = vadd.f32 %v378_v29, %v334_v35 }
  0xc9   : > { %v6682_v12 = vadd.f32 %v2224_v38, %v2212_v22  ;;  %v6689_v15 = vadd.f32 %v4094_v56, %v4082_v57  ;;  %v2240_v57 = vand.u32 2139095040, %v6662_v25  ;;  %v337_v36 = vadd.f32 %v329_v50, %v6557_v34 }
  0xca   : > { %v348_v61 = vpop.permute.xlu1 %347  ;;  %v397_v22 = vand.u32 2139095040, %v6687_v40  ;;  %v275_v18 = vmul.f32 %v6549_v58, %v6540_v52  ;;  %v231_v29 = vmul.f32 %v6531_v32, %v6526_v27  ;;  %v327_v38 = vmul.f32 %v6595_v44, %v6586_v43 }
  0xcb   : > { %11007 = vst [vmem:[#allocation13_spill] sm:$0xff] %v6682_v12  ;;  %11008 = vst [vmem:[#allocation14_spill] sm:$0xff] %v6689_v15  ;;  %v2222_v26 = vmul.f32 %v6627_v33, %v348_v61  ;;  %v2241_v54 = vshrl.u32 %v2240_v57, 23  ;;  %v6707_v53 = vadd.f32 %v381_v23, %v337_v36  ;;  %v2549_v34 = vand.u32 2139095040, %v6682_v12 }
  0xcc   : > { %v398_v16 = vshrl.u32 %v397_v22, 23  ;;  %v4092_v22 = vmul.f32 %v6630_v21, %v348_v61  ;;  %v283_v50 = vadd.f32 %v275_v18, %v231_v29  ;;  %v379_v52 = vmul.f32 %v6646_v30, %v348_v61 }
  0xcd   : > { %v6693_v41 = vadd.f32 %v2222_v26, %v6597_v46  ;;  %v4110_v46 = vand.u32 2139095040, %v6664_v59  ;;  %v6028_v13 = vadd.s32 4294967169, %v2241_v54  ;;  %v706_v28 = vand.u32 2139095040, %v6707_v53 }
  0xce   : > { %v5962_v31 = vadd.s32 4294967169, %v398_v16  ;;  %v2550_v26 = vshrl.u32 %v2549_v34, 23  ;;  %v6724_v16 = vadd.f32 %v4092_v22, %v6599_v49  ;;  %v335_v27 = vadd.f32 %v327_v38, %v283_v50  ;;  %v6805_v2 = vpop.permute.xlu1 %351 }
  0xcf   : > { %11009 = vst [vmem:[#allocation15_spill] sm:$0xff] %v6693_v41  ;;  %v4111_v47 = vshrl.u32 %v4110_v46, 23  ;;  %v2247_v35 = vadd.s32 1, %v6028_v13  ;;  %v707_v56 = vshrl.u32 %v706_v28, 23  ;;  %v4419_v36 = vand.u32 2139095040, %v6689_v15 }
  0xd0   : > { %v404_v0 = vadd.s32 1, %v5962_v31  ;;  %11010 = vst [vmem:[#allocation16_spill] sm:$0xff] %v6724_v16  ;;  %v6040_v46 = vadd.s32 4294967169, %v2550_v26  ;;  %v276_v54 = vmul.f32 %v6549_v58, %v6551_v63  ;;  %v6731_v31 = vadd.f32 %v379_v52, %v335_v27  ;;  %v364_v58 = vpop.permute.xlu0 %363 }
  0xd1   : > { %v6093_v20 = vadd.s32 4294967169, %v4111_v47  ;;  %vm2248_vm1 = vcmp.gt.s32.totalorder %v2247_v35, 0  ;;  %v5974_v43 = vadd.s32 4294967169, %v707_v56  ;;  %v232_v49 = vmul.f32 %v6531_v32, %v6513_v19 }
  0xd2   : > { %vm405_vm0 = vcmp.gt.s32.totalorder %v404_v0, 0  ;;  %11011 = vst [vmem:[#allocation17_spill] sm:$0xff] %v6731_v31  ;;  %v328_v47 = vmul.f32 %v6595_v44, %v6601_v55  ;;  %v2249_v13 = vsel %vm2248_vm1, %v2247_v35, 0  ;;  %v2556_v34 = vadd.s32 1, %v6040_v46 }
  0xd3   : > { %v4117_v57 = vadd.s32 1, %v6093_v20  ;;  %v406_v23 = vsel %vm405_vm0, %v404_v0, 0  ;;  %v713_v28 = vadd.s32 1, %v5974_v43  ;;  %v4420_v18 = vshrl.u32 %v4419_v36, 23 }
  0xd4   : > { %v6733_v61 = vand.u32 31, %v406_v23  ;;  %v284_v20 = vadd.f32 %v276_v54, %v232_v49  ;;  %v500_v29 = vand.u32 2139095040, %v6731_v31  ;;  %v6743_v38 = vand.u32 31, %v2249_v13 }
  0xd5   : > { %vm4118_vm2 = vcmp.gt.s32.totalorder %v4117_v57, 0  ;;  %v6747_v19 = vshrl.u32 %v406_v23, 5  ;;  %vm714_vm3 = vcmp.gt.s32.totalorder %v713_v28, 0  ;;  %vm2557_vm4 = vcmp.gt.s32.totalorder %v2556_v34, 0 }
  0xd6   : > { %v4119_v0 = vsel %vm4118_vm2, %v4117_v57, 0  ;;  %v6741_v63 = vsub.s32 32, %v6733_v61  ;;  %11012 = vst [vmem:[#allocation18_spill] sm:$0xff] %v6743_v38  ;;  %v6745_v56 = vadd.f32 %v328_v47, %v284_v20  ;;  %v6105_v55 = vadd.s32 4294967169, %v4420_v18 }
  0xd7   : > { %v6749_v32 = vand.u32 31, %v4119_v0  ;;  %v2226_v35 = vmul.f32 %v6627_v33, %v364_v58  ;;  %v10769_v26 = vmov 2102212464   ;;  %v6755_v50 = vshrl.u32 %v2249_v13, 5 }
  0xd8   : > { %v420_v22 = vshll.u32 %v10769_v26, %v6733_v61  ;;  %v6757_v57 = vshrl.u32 %v4119_v0, 5  ;;  %v501_v52 = vshrl.u32 %v500_v29, 23  ;;  %v10777_v27 = vmov 920167782  }
  0xd9   : > { %11013 = vst [vmem:[#allocation19_spill] sm:$0xff] %v6749_v32  ;;  %11014 = vst [vmem:[#allocation20_spill] sm:$0xff] %v6755_v50  ;;  %v421_v23 = vshrl.u32 %v10777_v27, %v6741_v63  ;;  %v423_v43 = vshll.u32 %v10777_v27, %v6733_v61  ;;  %v10765_v46 = vmov 1326507024   ;;  %v6766_v54 = vsub.s32 32, %v6743_v38 }
  0xda   : > { %11015 = vst [vmem:[#allocation21_spill] sm:$0xff] %v6757_v57  ;;  %v424_v36 = vshrl.u32 %v10765_v46, %v6741_v63  ;;  %v6769_v49 = vsub.s32 32, %v6749_v32  ;;  %v715_v47 = vsel %vm714_vm3, %v713_v28, 0  ;;  %v2558_v13 = vsel %vm2557_vm4, %v2556_v34, 0 }
  0xdb   : > { %11016 = vst [vmem:[#allocation22_spill] sm:$0xff] %v6766_v54  ;;  %v2343_v0 = vand.u32 2139095040, %v6693_v41  ;;  %v4426_v18 = vadd.s32 1, %v6105_v55  ;;  %v383_v20 = vmul.f32 %v6646_v30, %v364_v58  ;;  %v6776_v29 = vadd.f32 %v2226_v35, %v6654_v37 }
  0xdc   : > { %11017 = vst [vmem:[#allocation23_spill] sm:$0xff] %v6769_v49  ;;  %v4096_v44 = vmul.f32 %v6630_v21, %v364_v58  ;;  %vm429_vm5 = vcmp.lt.s32.totalorder %v6747_v19, 4  ;;  %v2263_v46 = vshll.u32 %v10769_v26, %v6743_v38  ;;  %v2266_v28 = vshll.u32 %v10777_v27, %v6743_v38 }
  0xdd   : > { %11018 = vst [vmem:[#allocation24_spill] sm:$0xff] %v6776_v29  ;;  %v5966_v7 = vadd.s32 4294967169, %v501_v52  ;;  %v2264_v34 = vshrl.u32 %v10777_v27, %v6766_v54  ;;  %vm2272_vm6 = vcmp.lt.s32.totalorder %v6755_v50, 4  ;;  %v6787_v55 = vand.u32 31, %v715_v47 }
  0xde   : > { %v6789_v37 = vand.u32 31, %v2558_v13  ;;  %v6792_v58 = vadd.f32 %v4096_v44, %v6657_v51  ;;  %v6794_v35 = vor.u32 %v421_v23, %v420_v22  ;;  %v425_v8 = vor.u32 %v424_v36, %v423_v43 }
  0xdf   : > { %v11021_v26 = vmov 1326507024   ;;  %v11022_v52 = vmov 2102212464   ;;  %v4134_v3 = vshrl.u32 %v10777_v27, %v6769_v49  ;;  %vm4427_vm7 = vcmp.gt.s32.totalorder %v4426_v18, 0 }
  0xe0   : > { %11019 = vst [vmem:[#allocation25_spill] sm:$0xff] %v6789_v37  ;;  %11020 = vst [vmem:[#allocation26_spill] sm:$0xff] %v6792_v58  ;;  %v2267_v5 = vshrl.u32 %v11021_v26, %v6766_v54  ;;  %v4133_v6 = vshll.u32 %v11022_v52, %v6749_v32  ;;  %v2344_v1 = vshrl.u32 %v2343_v0, 23  ;;  %v6803_v4 = vadd.f32 %v383_v20, %v6651_v39 }
  0xe1   : > { %v4136_v51 = vshll.u32 %v10777_v27, %v6749_v32  ;;  %v4137_v44 = vshrl.u32 %v11021_v26, %v6769_v49  ;;  %v507_v22 = vadd.s32 1, %v5966_v7  ;;  %v4213_v23 = vand.u32 2139095040, %v6724_v16 }
  0xe2   : > { %11023 = vst [vmem:[#allocation27_spill] sm:$0xff] %v6803_v4  ;;  %v6812_v43 = vor.u32 %v2264_v34, %v2263_v46  ;;  %vm10917_vm8 = vcmp.lt.s32.totalorder %v6757_v57, 4  ;;  %v6816_v36 = vsub.s32 32, %v6787_v55  ;;  %v6819_v39 = vsub.s32 32, %v6789_v37 }
  0xe3   : > { %v6824_v0 = vsel %vm429_vm5, %v6794_v35, 920167782  ;;  %v2268_v20 = vor.u32 %v2267_v5, %v2266_v28  ;;  %v4428_v27 = vsel %vm4427_vm7, %v4426_v18, 0  ;;  %v2223_v7 = vmul.f32 %v6627_v33, %v6805_v2 }
  0xe4   : > { %11024 = vst [vmem:[#allocation28_spill] sm:$0xff] %v6812_v43  ;;  %11025 = vst [vmem:[#allocation29_spill] sm:$0xff] %v6819_v39  ;;  %v6830_v46 = vsel %vm429_vm5, %v425_v8, 1326507024  ;;  %v6832_v34 = vor.u32 %v4134_v3, %v4133_v6  ;;  %v6032_v15 = vadd.s32 4294967169, %v2344_v1  ;;  %v912_v16 = vand.u32 2139095040, %v6803_v4 }
  0xe5   : > { %v4138_v49 = vor.u32 %v4137_v44, %v4136_v51  ;;  %vm508_vm9 = vcmp.gt.s32.totalorder %v507_v22, 0  ;;  %v4214_v32 = vshrl.u32 %v4213_v23, 23  ;;  %v6836_v59 = vadd.f32 %v2223_v7, %v6611_v62 }
  0xe6   : > { %11026 = vst [vmem:[#allocation30_spill] sm:$0xff] %v6832_v34  ;;  %v11028_v5 = vmov 920167782   ;;  %v733_v28 = vshrl.u32 %v11021_v26, %v6816_v36  ;;  %v6844_v3 = vand.u32 31, %v4428_v27  ;;  %v6849_v1 = vsel %vm2272_vm6, %v6812_v43, 920167782 }
  0xe7   : > { %11027 = vst [vmem:[#allocation31_spill] sm:$0xff] %v6836_v59  ;;  %v730_v18 = vshrl.u32 %v11028_v5, %v6816_v36  ;;  %v2573_v8 = vshrl.u32 %v11028_v5, %v6819_v39  ;;  %11030 = vst [vmem:[#allocation33_spill] sm:$0xff] %v6849_v1  ;;  %v6853_v6 = vsel %vm2272_vm6, %v2268_v20, 1326507024  ;;  %v729_v62 = vshll.u32 %v11022_v52, %v6787_v55 }
  0xe8   : > { %11029 = vst [vmem:[#allocation32_spill] sm:$0xff] %v6844_v3  ;;  %11031 = vst [vmem:[#allocation34_spill] sm:$0xff] %v6853_v6  ;;  %v732_v51 = vshll.u32 %v11028_v5, %v6787_v55  ;;  %v2572_v44 = vshll.u32 %v11022_v52, %v6789_v37  ;;  %v509_v23 = vsel %vm508_vm9, %v507_v22, 0  ;;  %v2350_v7 = vadd.s32 1, %v6032_v15 }
  0xe9   : > { %v913_v12 = vshrl.u32 %v912_v16, 23  ;;  %v6861_v41 = vshrl.u32 %v715_v47, 5  ;;  %v6863_v43 = vshrl.u32 %v2558_v13, 5  ;;  %v2576_v20 = vshrl.u32 %v11021_v26, %v6819_v39 }
  0xea   : > { %v6097_v6 = vadd.s32 4294967169, %v4214_v32  ;;  %v6867_v1 = vor.u32 %v730_v18, %v729_v62  ;;  %v734_v50 = vor.u32 %v733_v28, %v732_v51  ;;  %v6869_v38 = vor.u32 %v2573_v8, %v2572_v44 }
  0xeb   : > { %11032 = vst [vmem:[#allocation35_spill] sm:$0xff] %v6863_v43  ;;  %v6872_v54 = vsub.s32 32, %v6844_v3  ;;  %v6877_v15 = vsel %vm10917_vm8, %v6832_v34, 920167782  ;;  %v6881_v16 = vsel %vm10917_vm8, %v4138_v49, 1326507024  ;;  %v2575_v32 = vshll.u32 %v11028_v5, %v6789_v37 }
  0xec   : > { %11033 = vst [vmem:[#allocation36_spill] sm:$0xff] %v6867_v1  ;;  %11034 = vst [vmem:[#allocation37_spill] sm:$0xff] %v6869_v38  ;;  %v6885_v47 = vand.u32 31, %v509_v23  ;;  %vm2351_vm10 = vcmp.gt.s32.totalorder %v2350_v7, 0  ;;  %v5982_v13 = vadd.s32 4294967169, %v913_v12  ;;  %v2755_v22 = vand.u32 2139095040, %v6776_v29 }
  0xed   : > { %11035 = vst [vmem:[#allocation38_spill] sm:$0xff] %v6872_v54  ;;  %11036 = vst [vmem:[#allocation39_spill] sm:$0xff] %v6877_v15  ;;  %v380_v18 = vmul.f32 %v6646_v30, %v6805_v2  ;;  %vm738_vm11 = vcmp.lt.s32.totalorder %v6861_v41, 4  ;;  %v2577_v28 = vor.u32 %v2576_v20, %v2575_v32  ;;  %vm10938_vm12 = vcmp.lt.s32.totalorder %v6863_v43, 4 }
  0xee   : > { %11037 = vst [vmem:[#allocation40_spill] sm:$0xff] %v6881_v16  ;;  %v4220_v8 = vadd.s32 1, %v6097_v6  ;;  %v6895_v49 = vsel %vm738_vm11, %v6867_v1, 920167782  ;;  %v6899_v62 = vsel %vm738_vm11, %v734_v50, 1326507024  ;;  %v4443_v51 = vshrl.u32 %v11028_v5, %v6872_v54 }
  0xef   : > { %11038 = vst [vmem:[#allocation41_spill] sm:$0xff] %v6895_v49  ;;  %11039 = vst [vmem:[#allocation42_spill] sm:$0xff] %v6899_v62  ;;  %v6904_v12 = vsel %vm10938_vm12, %v6869_v38, 920167782  ;;  %v6908_v44 = vshrl.u32 %v4428_v27, 5  ;;  %v4446_v6 = vshrl.u32 %v11021_v26, %v6872_v54  ;;  %v6913_v20 = vsub.s32 32, %v6885_v47 }
  0xf0   : > { %11040 = vst [vmem:[#allocation43_spill] sm:$0xff] %v6904_v12  ;;  %v2352_v32 = vsel %vm2351_vm10, %v2350_v7, 0  ;;  %v4442_v50 = vshll.u32 %v11022_v52, %v6844_v3  ;;  %v919_v15 = vadd.s32 1, %v5982_v13  ;;  %v2756_v34 = vshrl.u32 %v2755_v22, 23 }
  0xf1   : > { %11041 = vst [vmem:[#allocation44_spill] sm:$0xff] %v6908_v44  ;;  %v6918_v16 = vadd.f32 %v380_v18, %v6745_v56  ;;  %v4445_v57 = vshll.u32 %v11028_v5, %v6844_v3  ;;  %vm4221_vm13 = vcmp.gt.s32.totalorder %v4220_v8, 0  ;;  %v4625_v27 = vand.u32 2139095040, %v6792_v58 }
  0xf2   : > { %v4093_v54 = vmul.f32 %v6630_v21, %v6805_v2  ;;  %v6927_v7 = vsel %vm10938_vm12, %v2577_v28, 1326507024  ;;  %v6929_v29 = vor.u32 %v4443_v51, %v4442_v50  ;;  %v6931_v13 = vshrl.u32 %v509_v23, 5  ;;  %v6948_v50 = vpop.permute.xlu0 %371 }
  0xf3   : > { %11042 = vst [vmem:[#allocation45_spill] sm:$0xff] %v6927_v7  ;;  %v6933_v22 = vand.u32 31, %v2352_v32  ;;  %v4447_v56 = vor.u32 %v4446_v6, %v4445_v57  ;;  %vm10893_vm14 = vcmp.lt.s32.totalorder %v6908_v44, 4  ;;  %v524_v18 = vshrl.u32 %v11028_v5, %v6913_v20 }
  0xf4   : > { %11043 = vst [vmem:[#allocation46_spill] sm:$0xff] %v6929_v29  ;;  %v6939_v58 = vadd.f32 %v4093_v54, %v6613_v60  ;;  %v4222_v2 = vsel %vm4221_vm13, %v4220_v8, 0  ;;  %vm920_vm15 = vcmp.gt.s32.totalorder %v919_v15, 0  ;;  %v6048_v3 = vadd.s32 4294967169, %v2756_v34 }
  0xf5   : > { %11044 = vst [vmem:[#allocation47_spill] sm:$0xff] %v6933_v22  ;;  %v603_v28 = vand.u32 2139095040, %v6918_v16  ;;  %v523_v23 = vshll.u32 %v11022_v52, %v6885_v47  ;;  %v526_v51 = vshll.u32 %v11028_v5, %v6885_v47  ;;  %v527_v57 = vshrl.u32 %v11021_v26, %v6913_v20 }
  0xf6   : > { %11045 = vst [vmem:[#allocation48_spill] sm:$0xff] %v6939_v58  ;;  %v4626_v6 = vshrl.u32 %v4625_v27, 23  ;;  %v6953_v60 = vsel %vm10893_vm14, %v6929_v29, 920167782  ;;  %vm532_vm0 = vcmp.lt.s32.totalorder %v6931_v13, 4  ;;  %v6956_v54 = vshrl.u32 %v2352_v32, 5 }
  0xf7   : > { %11046 = vst [vmem:[#allocation49_spill] sm:$0xff] %v6953_v60  ;;  %v6959_v34 = vsub.s32 32, %v6933_v22  ;;  %v6963_v8 = vsel %vm10893_vm14, %v4447_v56, 1326507024  ;;  %v6965_v38 = vor.u32 %v524_v18, %v523_v23  ;;  %v6967_v27 = vand.u32 31, %v4222_v2  ;;  %v6973_v60 = vpop.permute.xlu1 %359 }
  0xf8   : > { %11047 = vst [vmem:[#allocation50_spill] sm:$0xff] %v6956_v54  ;;  %11049 = vst [vmem:[#allocation52_spill] sm:$0xff] %v6963_v8  ;;  %v921_v7 = vsel %vm920_vm15, %v919_v15, 0  ;;  %v2762_v12 = vadd.s32 1, %v6048_v3  ;;  %v604_v43 = vshrl.u32 %v603_v28, 23  ;;  %v385_v29 = vmul.f32 %v6646_v30, %v6948_v50 }
  0xf9   : > { %11048 = vst [vmem:[#allocation51_spill] sm:$0xff] %v6959_v34  ;;  %11050 = vst [vmem:[#allocation53_spill] sm:$0xff] %v6967_v27  ;;  %v2228_v32 = vmul.f32 %v6627_v33, %v6948_v50  ;;  %v528_v37 = vor.u32 %v527_v57, %v526_v51  ;;  %v2366_v56 = vshll.u32 %v11022_v52, %v6933_v22  ;;  %v6113_v8 = vadd.s32 4294967169, %v4626_v6 }
  0xfa   : > { %v2446_v18 = vand.u32 2139095040, %v6836_v59  ;;  %v2367_v15 = vshrl.u32 %v11028_v5, %v6959_v34  ;;  %v2369_v3 = vshll.u32 %v11028_v5, %v6933_v22  ;;  %v2370_v28 = vshrl.u32 %v11021_v26, %v6959_v34 }
  0xfb   : > { %vm10949_vm1 = vcmp.lt.s32.totalorder %v6956_v54, 4  ;;  %v6988_v23 = vsel %vm532_vm0, %v6965_v38, 920167782  ;;  %v6991_v51 = vsub.s32 32, %v6967_v27  ;;  %v6993_v57 = vand.u32 31, %v921_v7 }
  0xfc   : > { %v2225_v6 = vmul.f32 %v6627_v33, %v6973_v60  ;;  %vm2763_vm2 = vcmp.gt.s32.totalorder %v2762_v12, 0  ;;  %v5970_v44 = vadd.s32 4294967169, %v604_v43  ;;  %v6998_v39 = vadd.f32 %v385_v29, %v6673_v42 }
  0xfd   : > { %11051 = vst [vmem:[#allocation54_spill] sm:$0xff] %v6991_v51  ;;  %11052 = vst [vmem:[#allocation55_spill] sm:$0xff] %v6993_v57  ;;  %v7001_v59 = vadd.f32 %v2228_v32, %v6676_v45  ;;  %v4632_v34 = vadd.s32 1, %v6113_v8  ;;  %v2447_v22 = vshrl.u32 %v2446_v18, 23  ;;  %v4316_v25 = vand.u32 2139095040, %v6939_v58 }
  0xfe   : > { %11053 = vst [vmem:[#allocation56_spill] sm:$0xff] %v6998_v39  ;;  %v7005_v11 = vadd.f32 %v2225_v6, %v6617_v17  ;;  %v7009_v4 = vsel %vm532_vm0, %v528_v37, 1326507024  ;;  %v7011_v1 = vor.u32 %v2367_v15, %v2366_v56  ;;  %v2371_v43 = vor.u32 %v2370_v28, %v2369_v3 }
  0xff   : > { %11054 = vst [vmem:[#allocation57_spill] sm:$0xff] %v7001_v59  ;;  %v7013_v62 = vshrl.u32 %v4222_v2, 5  ;;  %v4236_v42 = vshll.u32 %v11022_v52, %v6967_v27  ;;  %v4237_v45 = vshrl.u32 %v11028_v5, %v6991_v51  ;;  %v4239_v29 = vshll.u32 %v11028_v5, %v6967_v27 }
 0x100   : > { %11055 = vst [vmem:[#allocation58_spill] sm:$0xff] %v7005_v11  ;;  %11056 = vst [vmem:[#allocation59_spill] sm:$0xff] %v7011_v1  ;;  %v4240_v17 = vshrl.u32 %v11021_v26, %v6991_v51  ;;  %v2764_v37 = vsel %vm2763_vm2, %v2762_v12, 0  ;;  %v610_v8 = vadd.s32 1, %v5970_v44  ;;  %v1118_v32 = vand.u32 2139095040, %v6998_v39 }
 0x101   : > { %11057 = vst [vmem:[#allocation60_spill] sm:$0xff] %v7013_v62  ;;  %v2961_v2 = vand.u32 2139095040, %v7001_v59  ;;  %v7027_v56 = vsub.s32 32, %v6993_v57  ;;  %vm4633_vm3 = vcmp.gt.s32.totalorder %v4632_v34, 0  ;;  %v6036_v18 = vadd.s32 4294967169, %v2447_v22 }
 0x102   : > { %v4317_v15 = vshrl.u32 %v4316_v25, 23  ;;  %v7032_v3 = vsel %vm10949_vm1, %v7011_v1, 920167782  ;;  %v7036_v28 = vsel %vm10949_vm1, %v2371_v43, 1326507024  ;;  %vm10911_vm4 = vcmp.lt.s32.totalorder %v7013_v62, 4 }
 0x103   : > { %11058 = vst [vmem:[#allocation61_spill] sm:$0xff] %v7027_v56  ;;  %11059 = vst [vmem:[#allocation62_spill] sm:$0xff] %v7032_v3  ;;  %v7039_v12 = vor.u32 %v4237_v45, %v4236_v42  ;;  %v4241_v44 = vor.u32 %v4240_v17, %v4239_v29  ;;  %v7041_v6 = vshrl.u32 %v921_v7, 5  ;;  %v7043_v58 = vand.u32 31, %v2764_v37 }
 0x104   : > { %11060 = vst [vmem:[#allocation63_spill] sm:$0xff] %v7036_v28  ;;  %v4634_v22 = vsel %vm4633_vm3, %v4632_v34, 0  ;;  %vm611_vm7 = vcmp.gt.s32.totalorder %v610_v8, 0  ;;  %v1119_v25 = vshrl.u32 %v1118_v32, 23  ;;  %v2962_v51 = vshrl.u32 %v2961_v2, 23 }
 0x105   : > { %11061 = vst [vmem:[#allocation64_spill] sm:$0xff] %v7039_v12  ;;  %11062 = vst [vmem:[#allocation65_spill] sm:$0xff] %v7041_v6  ;;  %v936_v27 = vshrl.u32 %v11028_v5, %v7027_v56  ;;  %v2453_v59 = vadd.s32 1, %v6036_v18  ;;  %v6101_v1 = vadd.s32 4294967169, %v4317_v15  ;;  %v4098_v43 = vmul.f32 %v6630_v21, %v6948_v50 }
 0x106   : > { %11063 = vst [vmem:[#allocation66_spill] sm:$0xff] %v7043_v58  ;;  %v935_v42 = vshll.u32 %v11022_v52, %v6993_v57  ;;  %v938_v7 = vshll.u32 %v11028_v5, %v6993_v57  ;;  %v939_v34 = vshrl.u32 %v11021_v26, %v7027_v56  ;;  %v382_v45 = vmul.f32 %v6646_v30, %v6973_v60 }
 0x107   : > { %vm944_vm9 = vcmp.lt.s32.totalorder %v7041_v6, 4  ;;  %v7059_v29 = vsub.s32 32, %v7043_v58  ;;  %v7061_v17 = vand.u32 31, %v4634_v22  ;;  %v612_v50 = vsel %vm611_vm7, %v610_v8, 0 }
 0x108   : > { %v7066_v32 = vsel %vm10911_vm4, %v7039_v12, 920167782  ;;  %v7068_v2 = vshrl.u32 %v2764_v37, 5  ;;  %v5990_v18 = vadd.s32 4294967169, %v1119_v25  ;;  %v6056_v15 = vadd.s32 4294967169, %v2962_v51 }
 0x109   : > { %11064 = vst [vmem:[#allocation67_spill] sm:$0xff] %v7059_v29  ;;  %11065 = vst [vmem:[#allocation68_spill] sm:$0xff] %v7061_v17  ;;  %v7070_v28 = vor.u32 %v936_v27, %v935_v42  ;;  %vm2454_vm10 = vcmp.gt.s32.totalorder %v2453_v59, 0  ;;  %v4323_v3 = vadd.s32 1, %v6101_v1  ;;  %v7073_v54 = vadd.f32 %v4098_v43, %v6679_v48 }
 0x10a   : > { %11066 = vst [vmem:[#allocation69_spill] sm:$0xff] %v7066_v32  ;;  %11067 = vst [vmem:[#allocation70_spill] sm:$0xff] %v7068_v2  ;;  %v7077_v39 = vsel %vm10911_vm4, %v4241_v44, 1326507024  ;;  %v940_v8 = vor.u32 %v939_v34, %v938_v7  ;;  %v7079_v56 = vand.u32 31, %v612_v50  ;;  %v7082_v12 = vadd.f32 %v382_v45, %v6615_v14 }
 0x10b   : > { %11068 = vst [vmem:[#allocation71_spill] sm:$0xff] %v7070_v28  ;;  %11069 = vst [vmem:[#allocation72_spill] sm:$0xff] %v7073_v54  ;;  %v2778_v51 = vshll.u32 %v11022_v52, %v7043_v58  ;;  %v2779_v27 = vshrl.u32 %v11028_v5, %v7059_v29  ;;  %v2781_v48 = vshll.u32 %v11028_v5, %v7043_v58  ;;  %v7091_v1 = vsub.s32 32, %v7061_v17 }
 0x10c   : > { %11070 = vst [vmem:[#allocation73_spill] sm:$0xff] %v7077_v39  ;;  %11071 = vst [vmem:[#allocation74_spill] sm:$0xff] %v7082_v12  ;;  %v2455_v37 = vsel %vm2454_vm10, %v2453_v59, 0  ;;  %v1125_v44 = vadd.s32 1, %v5990_v18  ;;  %v2968_v25 = vadd.s32 1, %v6056_v15  ;;  %v4095_v43 = vmul.f32 %v6630_v21, %v6973_v60 }
 0x10d   : > { %11072 = vst [vmem:[#allocation75_spill] sm:$0xff] %v7091_v1  ;;  %v7098_v14 = vsel %vm944_vm9, %v7070_v28, 920167782  ;;  %vm10929_vm13 = vcmp.lt.s32.totalorder %v7068_v2, 4  ;;  %vm4324_vm15 = vcmp.gt.s32.totalorder %v4323_v3, 0  ;;  %v4831_v42 = vand.u32 2139095040, %v7073_v54 }
 0x10e   : > { %11073 = vst [vmem:[#allocation76_spill] sm:$0xff] %v7098_v14  ;;  %v2782_v7 = vshrl.u32 %v11021_v26, %v7059_v29  ;;  %v7104_v34 = vshrl.u32 %v4634_v22, 5  ;;  %v7107_v59 = vsub.s32 32, %v7079_v56  ;;  %v809_v60 = vand.u32 2139095040, %v7082_v12 }
 0x10f   : > { %v7112_v45 = vsel %vm944_vm9, %v940_v8, 1326507024  ;;  %v7114_v18 = vor.u32 %v2779_v27, %v2778_v51  ;;  %v4649_v15 = vshrl.u32 %v11028_v5, %v7091_v1  ;;  %v7118_v54 = vand.u32 31, %v2455_v37 }
 0x110   : > { %11074 = vst [vmem:[#allocation77_spill] sm:$0xff] %v7104_v34  ;;  %11075 = vst [vmem:[#allocation78_spill] sm:$0xff] %v7112_v45  ;;  %v4325_v39 = vsel %vm4324_vm15, %v4323_v3, 0  ;;  %vm1126_vm2 = vcmp.gt.s32.totalorder %v1125_v44, 0  ;;  %vm2969_vm3 = vcmp.gt.s32.totalorder %v2968_v25, 0  ;;  %v7121_v22 = vadd.f32 %v4095_v43, %v6619_v24 }
 0x111   : > { %11076 = vst [vmem:[#allocation79_spill] sm:$0xff] %v7114_v18  ;;  %11077 = vst [vmem:[#allocation80_spill] sm:$0xff] %v7118_v54  ;;  %v4648_v32 = vshll.u32 %v11022_v52, %v7061_v17  ;;  %v4651_v8 = vshll.u32 %v11028_v5, %v7061_v17  ;;  %v4652_v51 = vshrl.u32 %v11021_v26, %v7091_v1  ;;  %v4832_v27 = vshrl.u32 %v4831_v42, 23 }
 0x112   : > { %11078 = vst [vmem:[#allocation81_spill] sm:$0xff] %v7121_v22  ;;  %v2783_v62 = vor.u32 %v2782_v7, %v2781_v48  ;;  %vm10889_vm7 = vcmp.lt.s32.totalorder %v7104_v34, 4  ;;  %v627_v3 = vshrl.u32 %v11028_v5, %v7107_v59  ;;  %v810_v58 = vshrl.u32 %v809_v60, 23 }
 0x113   : > { %v630_v24 = vshrl.u32 %v11021_v26, %v7107_v59  ;;  %v7134_v43 = vand.u32 31, %v4325_v39  ;;  %v1127_v29 = vsel %vm1126_vm2, %v1125_v44, 0  ;;  %v2970_v14 = vsel %vm2969_vm3, %v2968_v25, 0 }
 0x114   : > { %v7139_v17 = vsel %vm10929_vm13, %v7114_v18, 920167782  ;;  %v7141_v42 = vor.u32 %v4649_v15, %v4648_v32  ;;  %v7143_v48 = vshrl.u32 %v612_v50, 5  ;;  %v7146_v7 = vsub.s32 32, %v7118_v54 }
 0x115   : > { %11079 = vst [vmem:[#allocation82_spill] sm:$0xff] %v7134_v43  ;;  %11080 = vst [vmem:[#allocation83_spill] sm:$0xff] %v7139_v17  ;;  %v4653_v60 = vor.u32 %v4652_v51, %v4651_v8  ;;  %v626_v1 = vshll.u32 %v11022_v52, %v7079_v56  ;;  %v629_v44 = vshll.u32 %v11028_v5, %v7079_v56  ;;  %v6121_v25 = vadd.s32 4294967169, %v4832_v27 }
 0x116   : > { %11081 = vst [vmem:[#allocation84_spill] sm:$0xff] %v7141_v42  ;;  %11082 = vst [vmem:[#allocation85_spill] sm:$0xff] %v7146_v7  ;;  %v7154_v28 = vsel %vm10929_vm13, %v2783_v62, 1326507024  ;;  %v7156_v17 = vand.u32 31, %v1127_v29  ;;  %v7158_v32 = vand.u32 31, %v2970_v14  ;;  %v2470_v27 = vshrl.u32 %v11028_v5, %v7146_v7 }
 0x117   : > { %11083 = vst [vmem:[#allocation86_spill] sm:$0xff] %v7154_v28  ;;  %v5978_v50 = vadd.s32 4294967169, %v810_v58  ;;  %v7160_v15 = vor.u32 %v627_v3, %v626_v1  ;;  %v631_v18 = vor.u32 %v630_v24, %v629_v44  ;;  %v7162_v8 = vshrl.u32 %v2455_v37, 5 }
 0x118   : > { %11084 = vst [vmem:[#allocation87_spill] sm:$0xff] %v7156_v17  ;;  %11085 = vst [vmem:[#allocation88_spill] sm:$0xff] %v7158_v32  ;;  %v7165_v51 = vsub.s32 32, %v7134_v43  ;;  %vm635_vm10 = vcmp.lt.s32.totalorder %v7143_v48, 4  ;;  %v2473_v62 = vshrl.u32 %v11021_v26, %v7146_v7  ;;  %v2652_v28 = vand.u32 2139095040, %v7005_v11 }
 0x119   : > { %11086 = vst [vmem:[#allocation89_spill] sm:$0xff] %v7162_v8  ;;  %v7176_v58 = vsel %vm10889_vm7, %v7141_v42, 920167782  ;;  %v7180_v1 = vsel %vm10889_vm7, %v4653_v60, 1326507024  ;;  %v2469_v37 = vshll.u32 %v11022_v52, %v7118_v54  ;;  %v4838_v3 = vadd.s32 1, %v6121_v25 }
 0x11a   : > { %11087 = vst [vmem:[#allocation90_spill] sm:$0xff] %v7165_v51  ;;  %11088 = vst [vmem:[#allocation91_spill] sm:$0xff] %v7176_v58  ;;  %v2472_v24 = vshll.u32 %v11028_v5, %v7118_v54  ;;  %v7187_v44 = vsub.s32 32, %v7156_v17  ;;  %v7190_v2 = vsub.s32 32, %v7158_v32  ;;  %v816_v11 = vadd.s32 1, %v5978_v50 }
 0x11b   : > { %11089 = vst [vmem:[#allocation92_spill] sm:$0xff] %v7180_v1  ;;  %v7195_v58 = vsel %vm635_vm10, %v7160_v15, 920167782  ;;  %v7199_v60 = vsel %vm635_vm10, %v631_v18, 1326507024  ;;  %vm10945_vm15 = vcmp.lt.s32.totalorder %v7162_v8, 4  ;;  %v4340_v25 = vshrl.u32 %v11028_v5, %v7165_v51 }
 0x11c   : > { %11090 = vst [vmem:[#allocation93_spill] sm:$0xff] %v7187_v44  ;;  %11091 = vst [vmem:[#allocation94_spill] sm:$0xff] %v7190_v2  ;;  %v7204_v42 = vor.u32 %v2470_v27, %v2469_v37  ;;  %v2474_v1 = vor.u32 %v2473_v62, %v2472_v24  ;;  %v7206_v34 = vshrl.u32 %v4325_v39, 5  ;;  %v2653_v50 = vshrl.u32 %v2652_v28, 23 }
 0x11d   : > { %v4339_v54 = vshll.u32 %v11022_v52, %v7134_v43  ;;  %v4342_v7 = vshll.u32 %v11028_v5, %v7134_v43  ;;  %v4343_v18 = vshrl.u32 %v11021_v26, %v7165_v51  ;;  %vm4839_vm2 = vcmp.gt.s32.totalorder %v4838_v3, 0 }
 0x11e   : > { %11092 = vst [vmem:[#allocation95_spill] sm:$0xff] %v7204_v42  ;;  %11093 = vst [vmem:[#allocation96_spill] sm:$0xff] %v7206_v34  ;;  %v1142_v45 = vshrl.u32 %v11028_v5, %v7187_v44  ;;  %v1145_v27 = vshrl.u32 %v11021_v26, %v7187_v44  ;;  %v2985_v39 = vshrl.u32 %v11028_v5, %v7190_v2  ;;  %vm817_vm3 = vcmp.gt.s32.totalorder %v816_v11, 0 }
 0x11f   : > { %v7220_v28 = vor.u32 %v4340_v25, %v4339_v54  ;;  %v7222_v62 = vshrl.u32 %v1127_v29, 5  ;;  %v1141_v37 = vshll.u32 %v11022_v52, %v7156_v17  ;;  %v2988_v24 = vshrl.u32 %v11021_v26, %v7190_v2 }
 0x120   : > { %v1144_v51 = vshll.u32 %v11028_v5, %v7156_v17  ;;  %v2984_v43 = vshll.u32 %v11022_v52, %v7158_v32  ;;  %v4840_v44 = vsel %vm4839_vm2, %v4838_v3, 0  ;;  %v6044_v6 = vadd.s32 4294967169, %v2653_v50 }
 0x121   : > { %11094 = vst [vmem:[#allocation97_spill] sm:$0xff] %v7220_v28  ;;  %v4344_v57 = vor.u32 %v4343_v18, %v4342_v7  ;;  %v7232_v12 = vshrl.u32 %v2970_v14, 5  ;;  %v2987_v54 = vshll.u32 %v11028_v5, %v7158_v32  ;;  %v818_v29 = vsel %vm817_vm3, %v816_v11, 0 }
 0x122   : > { %v7239_v25 = vsel %vm10945_vm15, %v7204_v42, 920167782  ;;  %v7241_v2 = vor.u32 %v1142_v45, %v1141_v37  ;;  %v1146_v17 = vor.u32 %v1145_v27, %v1144_v51  ;;  %v7243_v49 = vor.u32 %v2985_v39, %v2984_v43  ;;  %v7260_v51 = vpop.permute.xlu1 %367 }
 0x123   : > { %11095 = vst [vmem:[#allocation98_spill] sm:$0xff] %v7232_v12  ;;  %11096 = vst [vmem:[#allocation99_spill] sm:$0xff] %v7239_v25  ;;  %v7247_v3 = vsel %vm10945_vm15, %v2474_v1, 1326507024  ;;  %vm10910_vm2 = vcmp.lt.s32.totalorder %v7206_v34, 4  ;;  %v2989_v14 = vor.u32 %v2988_v24, %v2987_v54  ;;  %v7250_v7 = vand.u32 31, %v4840_v44 }
 0x124   : > { %11097 = vst [vmem:[#allocation100_spill] sm:$0xff] %v7241_v2  ;;  %11098 = vst [vmem:[#allocation101_spill] sm:$0xff] %v7243_v49  ;;  %v7255_v11 = vsel %vm10910_vm2, %v7220_v28, 920167782  ;;  %vm1150_vm3 = vcmp.lt.s32.totalorder %v7222_v62, 4  ;;  %v7258_v45 = vand.u32 31, %v818_v29 }
 0x125   : > { %11099 = vst [vmem:[#allocation102_spill] sm:$0xff] %v7247_v3  ;;  %11100 = vst [vmem:[#allocation103_spill] sm:$0xff] %v7250_v7  ;;  %v2659_v43 = vadd.s32 1, %v6044_v6  ;;  %v7264_v1 = vsel %vm10910_vm2, %v4344_v57, 1326507024  ;;  %vm10920_vm7 = vcmp.lt.s32.totalorder %v7232_v12, 4  ;;  %v418_v12 = vshrl.u32 %v11022_v52, %v6741_v63 }
 0x126   : > { %11101 = vst [vmem:[#allocation104_spill] sm:$0xff] %v7255_v11  ;;  %11102 = vst [vmem:[#allocation105_spill] sm:$0xff] %v7264_v1  ;;  %v7267_v50 = vshrl.u32 %v4840_v44, 5  ;;  %v10890_v18 = vmov 2475754826   ;;  %v7292_v54 = vsub.s32 32, %v7250_v7 }
 0x127   : > { %v412_v27 = vshrl.u32 %v10890_v18, %v6741_v63  ;;  %v7274_v39 = vsel %vm1150_vm3, %v7241_v2, 920167782  ;;  %v7278_v6 = vsel %vm1150_vm3, %v1146_v17, 1326507024  ;;  %v7283_v57 = vsel %vm10920_vm7, %v7243_v49, 920167782 }
 0x128   : > { %11103 = vst [vmem:[#allocation106_spill] sm:$0xff] %v7267_v50  ;;  %11104 = vst [vmem:[#allocation107_spill] sm:$0xff] %v7283_v57  ;;  %v10894_v44 = vmov 2131351028   ;;  %v7289_v24 = vsel %vm10920_vm7, %v2989_v14, 1326507024  ;;  %v384_v17 = vmul.f32 %v6646_v30, %v7260_v51  ;;  %v2227_v30 = vmul.f32 %v6627_v33, %v7260_v51 }
 0x129   : > { %v415_v37 = vshrl.u32 %v10894_v44, %v6741_v63  ;;  %11105 = vst [vmem:[#allocation108_spill] sm:$0xff] %v7289_v24  ;;  %11106 = vst [vmem:[#allocation109_spill] sm:$0xff] %v7292_v54  ;;  %v10901_v18 = vmov 683565275   ;;  %v7299_v11 = vsub.s32 32, %v7258_v45  ;;  %vm2660_vm14 = vcmp.gt.s32.totalorder %v2659_v43, 0 }
 0x12a   : > { %v411_v50 = vshll.u32 %v10901_v18, %v6733_v61  ;;  %v11107_v44 = vand.u32 2147483647, %v6687_v40  ;;  %v11108_v14 = vmov 2475754826   ;;  %v7305_v34 = vshrl.u32 %v818_v29, 5 }
 0x12b   : > { %v414_v1 = vshll.u32 %v11108_v14, %v6733_v61  ;;  %v832_v54 = vshll.u32 %v11022_v52, %v7258_v45  ;;  %v7313_v18 = vshll.u32 %v11028_v5, %v7258_v45  ;;  %v11109_v57 = vmov 2131351028  }
 0x12c   : > { %v401_v28 = vand.u32 8388607, %v11107_v44  ;;  %v413_v49 = vor.u32 %v412_v27, %v411_v50  ;;  %v417_v44 = vshll.u32 %v11109_v57, %v6733_v61  ;;  %v2661_v29 = vsel %vm2660_vm14, %v2659_v43, 0 }
 0x12d   : > { %v416_v24 = vor.u32 %v415_v37, %v414_v1  ;;  %v4522_v32 = vand.u32 2139095040, %v7121_v22  ;;  %v7321_v7 = vadd.f32 %v384_v17, %v6634_v9  ;;  %v11110_v33 = vmov 683565275  }
 0x12e   : > { %v410_v50 = vshrl.u32 %v11110_v33, %v6741_v63  ;;  %v833_v27 = vshrl.u32 %v11028_v5, %v7299_v11  ;;  %v402_v42 = vor.u32 8388608, %v401_v28  ;;  %v419_v1 = vor.u32 %v418_v12, %v417_v44 }
 0x12f   : > { %vm426_vm2 = vcmp.lt.s32.totalorder %v6747_v19, 1  ;;  %v7330_v61 = vshrl.u32 %v11021_v26, %v7299_v11  ;;  %vm427_vm14 = vcmp.lt.s32.totalorder %v6747_v19, 2  ;;  %vm428_vm4 = vcmp.lt.s32.totalorder %v6747_v19, 3 }
 0x130   : > { %v430_v9 = vsel %vm426_vm2, %v410_v50, %v413_v49  ;;  %v431_v43 = vsel %vm429_vm5, %v419_v1, 2102212464  ;;  %v434_v63 = vsel %vm426_vm2, %v413_v49, %v416_v24  ;;  %v436_v37 = vsel %vm428_vm4, %v419_v1, %v6824_v0 }
 0x131   : > { %v438_v17 = vsel %vm426_vm2, %v416_v24, %v419_v1  ;;  %v7337_v28 = vshrl.u32 %v2661_v29, 5  ;;  %v1015_v12 = vand.u32 2139095040, %v7321_v7  ;;  %v432_v44 = vsel %vm428_vm4, %v416_v24, %v431_v43 }
 0x132   : > { %v437_v22 = vsel %vm427_vm14, %v434_v63, %v436_v37  ;;  %v7342_v3 = vand.u32 31, %v2661_v29  ;;  %v4523_v25 = vshrl.u32 %v4522_v32, 23  ;;  %v440_v50 = vsel %vm428_vm4, %v6794_v35, %v6830_v46 }
 0x133   : > { %v442_v8 = vshll.u32 %v402_v42, 8  ;;  %v7346_v2 = vor.u32 %v833_v27, %v832_v54  ;;  %v433_v0 = vsel %vm427_vm14, %v430_v9, %v432_v44  ;;  %v441_v49 = vsel %vm427_vm14, %v438_v17, %v440_v50 }
 0x134   : > { %11111 = vst [vmem:[#allocation110_spill] sm:$0xff] %v7342_v3  ;;  %v10919_v24 = vand.u32 2147483647, %v6731_v31  ;;  %v837_v35 = vor.u32 %v7330_v61, %v7313_v18  ;;  %v1016_v46 = vshrl.u32 %v1015_v12, 23  ;;  %v7363_v42 = vadd.f32 %v2227_v30, %v6636_v10 }
 0x135   : > { %v7353_v1 = vmul.u32.u64.low %v442_v8, %v441_v49  ;;  %v7354_v43 = vmul.u32.u64.high %v442_v8, %v441_v49, %v7353_v1  ;;  %v7356_v29 = vmul.u32.u64.low %v442_v8, %v437_v22  ;;  %v7357_v63 = vmul.u32.u64.high %v442_v8, %v437_v22, %v7356_v29 }
 0x136   : > { %11112 = vst [vmem:[#allocation111_spill] sm:$0xff] %v7363_v42  ;;  %v504_v19 = vand.u32 8388607, %v10919_v24  ;;  %v449_v32 = vmul.u32 %v442_v8, %v433_v0  ;;  %v514_v54 = vshll.u32 %v11110_v33, %v6885_v47  ;;  %v515_v27 = vshrl.u32 %v11108_v14, %v6913_v20 }
 0x137   : > { %v517_v22 = vshll.u32 %v11108_v14, %v6885_v47  ;;  %vm841_vm5 = vcmp.lt.s32.totalorder %v7305_v34, 4  ;;  %v518_v10 = vshrl.u32 %v11109_v57, %v6913_v20  ;;  %v520_v30 = vshll.u32 %v11109_v57, %v6885_v47 }
 0x138   : > { %v505_v18 = vor.u32 8388608, %v504_v19  ;;  %v521_v8 = vshrl.u32 %v11022_v52, %v6913_v20  ;;  %vm451_vm4 = vc.u32 %v7354_v43, %v7356_v29  ;;  %v452_v61 = vadd.s32 1, %v7357_v63 }
 0x139   : > { %v513_v9 = vshrl.u32 %v11110_v33, %v6913_v20  ;;  %v516_v37 = vor.u32 %v515_v27, %v514_v54  ;;  %v519_v17 = vor.u32 %v518_v10, %v517_v22  ;;  %vm529_vm2 = vcmp.lt.s32.totalorder %v6931_v13, 1 }
 0x13a   : > { %v522_v12 = vor.u32 %v521_v8, %v520_v30  ;;  %vm530_vm14 = vcmp.lt.s32.totalorder %v6931_v13, 2  ;;  %v453_v47 = vsel %vm451_vm4, %v452_v61, %v7357_v63  ;;  %vm531_vm8 = vcmp.lt.s32.totalorder %v6931_v13, 3 }
 0x13b   : > { %v533_v44 = vsel %vm529_vm2, %v513_v9, %v516_v37  ;;  %v545_v50 = vshll.u32 %v505_v18, 8  ;;  %v454_v0 = vadd.s32 %v453_v47, %v449_v32  ;;  %v537_v1 = vsel %vm529_vm2, %v516_v37, %v519_v17 }
 0x13c   : > { %v534_v49 = vsel %vm532_vm0, %v522_v12, 2102212464  ;;  %v539_v20 = vsel %vm531_vm8, %v522_v12, %v6988_v23  ;;  %v541_v27 = vsel %vm529_vm2, %v519_v17, %v522_v12  ;;  %v543_v22 = vsel %vm531_vm8, %v6965_v38, %v7009_v4 }
 0x13d   : > { %v535_v19 = vsel %vm531_vm8, %v519_v17, %v534_v49  ;;  %v540_v54 = vsel %vm530_vm14, %v537_v1, %v539_v20  ;;  %v5986_v63 = vadd.s32 4294967169, %v1016_v46  ;;  %v7398_v10 = vmul.f32 %v6630_v21, %v7260_v51 }
 0x13e   : > { %v455_v32 = vadd.s32 536870912, %v454_v0  ;;  %v544_v18 = vsel %vm530_vm14, %v541_v27, %v543_v22  ;;  %v7405_v23 = vmul.u32.u64.low %v545_v50, %v540_v54  ;;  %v7406_v61 = vmul.u32.u64.high %v545_v50, %v540_v54, %v7405_v23 }
 0x13f   : > { %11113 = vst [vmem:[#allocation112_spill] sm:$0xff] %v7398_v10  ;;  %v7402_v30 = vmul.u32.u64.low %v545_v50, %v544_v18  ;;  %v7403_v8 = vmul.u32.u64.high %v545_v50, %v544_v18, %v7402_v30  ;;  %v7410_v9 = vsub.s32 32, %v7342_v3  ;;  %v536_v21 = vsel %vm530_vm14, %v533_v44, %v535_v19 }
 0x140   : > { %v7412_v4 = vshrl.u32 %v455_v32, 30  ;;  %v10918_v38 = vand.u32 2147483647, %v6918_v16  ;;  %v7420_v51 = vsel %vm841_vm5, %v7346_v2, 920167782  ;;  %v7428_v37 = vshll.u32 %v11022_v52, %v7342_v3 }
 0x141   : > { %11114 = vst [vmem:[#allocation113_spill] sm:$0xff] %v7410_v9  ;;  %v7424_v46 = vsel %vm841_vm5, %v837_v35, 1326507024  ;;  %v7432_v17 = vshll.u32 %v11028_v5, %v7342_v3  ;;  %v6109_v13 = vadd.s32 4294967169, %v4523_v25  ;;  %v1022_v12 = vadd.s32 1, %v5986_v63 }
 0x142   : > { %v2858_v47 = vand.u32 2139095040, %v7363_v42  ;;  %v457_v44 = vshll.u32 %v7412_v4, 30  ;;  %v552_v49 = vmul.u32 %v545_v50, %v536_v21  ;;  %vm554_vm8 = vc.u32 %v7403_v8, %v7405_v23 }
 0x143   : > { %v555_v35 = vadd.s32 1, %v7406_v61  ;;  %v618_v1 = vshrl.u32 %v11108_v14, %v7107_v59  ;;  %v607_v19 = vand.u32 8388607, %v10918_v38  ;;  %v620_v25 = vshll.u32 %v11108_v14, %v7079_v56 }
 0x144   : > { %v7441_v20 = vsub.s32 %v454_v0, %v457_v44  ;;  %v621_v54 = vshrl.u32 %v11109_v57, %v7107_v59  ;;  %v617_v27 = vshll.u32 %v11110_v33, %v7079_v56  ;;  %v623_v22 = vshll.u32 %v11109_v57, %v7079_v56 }
 0x145   : > { %v556_v50 = vsel %vm554_vm8, %v555_v35, %v7406_v61  ;;  %v624_v0 = vshrl.u32 %v11022_v52, %v7107_v59  ;;  %vm1023_vm0 = vcmp.gt.s32.totalorder %v1022_v12, 0  ;;  %v7459_v30 = vshrl.u32 %v11028_v5, %v7410_v9 }
 0x146   : > { %v460_v63 = vsub.s32 0, %v7441_v20  ;;  %v557_v32 = vadd.s32 %v556_v50, %v552_v49  ;;  %v622_v18 = vor.u32 %v621_v54, %v620_v25  ;;  %v7463_v61 = vshrl.u32 %v11021_v26, %v7410_v9 }
 0x147   : > { %vm396_vm4 = vcmp.lt.s32.totalorder %v6687_v40, 0  ;;  %v619_v21 = vor.u32 %v618_v1, %v617_v27  ;;  %v625_v56 = vor.u32 %v624_v0, %v623_v22  ;;  %v7466_v44 = vadd.s32 1, %v6109_v13 }
 0x148   : > { %v7468_v35 = vshrl.u32 %v2858_v47, 23  ;;  %v5963_v38 = vmin.u32 %v460_v63, %v7441_v20  ;;  %v608_v49 = vor.u32 8388608, %v607_v19  ;;  %v1024_v25 = vsel %vm1023_vm0, %v1022_v12, 0 }
 0x149   : > { %v480_v54 = vsub.s32 4, %v7412_v4  ;;  %v558_v50 = vadd.s32 536870912, %v557_v32  ;;  %vm632_vm2 = vcmp.lt.s32.totalorder %v7143_v48, 1  ;;  %vm633_vm14 = vcmp.lt.s32.totalorder %v7143_v48, 2 }
 0x14a   : > { %v462_v24 = vclz %v5963_v38  ;;  %vm634_vm8 = vcmp.lt.s32.totalorder %v7143_v48, 3  ;;  %v644_v13 = vsel %vm632_vm2, %v622_v18, %v625_v56  ;;  %v11115_v47 = vand.u32 2147483647, %v6687_v40 }
 0x14b   : > { %v7483_v12 = vshrl.u32 %v558_v50, 30  ;;  %v640_v19 = vsel %vm632_vm2, %v619_v21, %v622_v18  ;;  %v642_v38 = vsel %vm634_vm8, %v625_v56, %v7195_v58  ;;  %v646_v27 = vsel %vm634_vm8, %v7160_v15, %v7199_v60 }
 0x14c   : > { %vm7479_vm7 = vcmp.le.f32.partialorder %v11115_v47, 0.7853982  ;;  %v5964_v22 = vadd.s32 4294967294, %v462_v24  ;;  %v637_v0 = vsel %vm635_vm10, %v625_v56, 2102212464  ;;  %v647_v63 = vsel %vm633_vm14, %v644_v13, %v646_v27 }
 0x14d   : > { %v648_v50 = vshll.u32 %v608_v49, 8  ;;  %v7498_v47 = vshrl.u32 %v1024_v25, 5  ;;  %v7500_v42 = vand.u32 31, %v1024_v25  ;;  %v560_v3 = vshll.u32 %v7483_v12, 30 }
 0x14e   : > { %v616_v58 = vshrl.u32 %v11110_v33, %v7107_v59  ;;  %vm5965_vm0 = vcmp.lt.s32.totalorder %v5964_v22, 0  ;;  %v643_v15 = vsel %vm633_vm14, %v640_v19, %v642_v38  ;;  %v638_v25 = vsel %vm634_vm8, %v622_v18, %v637_v0 }
 0x14f   : > { %v7507_v60 = vmul.u32.u64.low %v648_v50, %v647_v63  ;;  %v7508_v24 = vmul.u32.u64.high %v648_v50, %v647_v63, %v7507_v60  ;;  %v465_v56 = vsel %vm5965_vm0, 0, %v5964_v22  ;;  %v7510_v9 = vsub.s32 %v557_v32, %v560_v3 }
 0x150   : > { %v636_v49 = vsel %vm632_vm2, %v616_v58, %v619_v21  ;;  %v450_v13 = vadd.s32 %v7356_v29, %v7354_v43  ;;  %v466_v59 = vsub.s32 32, %v465_v56  ;;  %v470_v27 = vsub.s32 4294967266, %v465_v56 }
 0x151   : > { %v481_v19 = vsel %vm396_vm4, %v480_v54, %v7412_v4  ;;  %v563_v38 = vsub.s32 0, %v7510_v9  ;;  %v7522_v22 = vmul.u32.u64.low %v648_v50, %v643_v15  ;;  %v7523_v3 = vmul.u32.u64.high %v648_v50, %v643_v15, %v7522_v22 }
 0x152   : > { %v10927_v32 = vand.u32 2147483647, %v6707_v53  ;;  %v467_v21 = vshll.u32 %v7441_v20, %v465_v56  ;;  %v468_v18 = vshrl.u32 %v450_v13, %v466_v59  ;;  %v471_v0 = vadd.s32 127, %v470_v27 }
 0x153   : > { %v639_v43 = vsel %vm633_vm14, %v636_v49, %v638_v25  ;;  %v7531_v29 = vsub.s32 32, %v7500_v42  ;;  %v7535_v4 = vshll.u32 %v11022_v52, %v7500_v42  ;;  %v553_v54 = vadd.s32 %v7405_v23, %v7403_v8 }
 0x154   : > { %v5967_v63 = vmin.u32 %v563_v38, %v7510_v9  ;;  %v469_v58 = vor.u32 %v468_v18, %v467_v21  ;;  %v472_v15 = vshll.u32 %v471_v0, 23  ;;  %v7542_v20 = vsel %vm7479_vm7, 0, %v481_v19 }
 0x155   : > { %11118 = vst [vmem:[#allocation114_spill] sm:$0xff] %v7542_v20  ;;  %vm657_vm10 = vc.u32 %v7508_v24, %v7522_v22  ;;  %v655_v60 = vmul.u32 %v648_v50, %v639_v43  ;;  %v658_v56 = vadd.s32 1, %v7523_v3  ;;  %v710_v49 = vand.u32 8388607, %v10927_v32 }
 0x156   : > { %v565_v48 = vclz %v5967_v63  ;;  %v473_v25 = vor.u32 4788187, %v472_v15  ;;  %v476_v8 = vcvt.s32.f32 %v469_v58  ;;  %v720_v23 = vshll.u32 %v11110_v33, %v6787_v55 }
 0x157   : > { %v721_v13 = vshrl.u32 %v11108_v14, %v6816_v36  ;;  %vm499_vm2 = vcmp.lt.s32.totalorder %v6731_v31, 0  ;;  %v659_v27 = vsel %vm657_vm10, %v658_v56, %v7523_v3  ;;  %v723_v50 = vshll.u32 %v11108_v14, %v6787_v55 }
 0x158   : > { %v5968_v59 = vadd.s32 4294967294, %v565_v48  ;;  %v724_v19 = vshrl.u32 %v11109_v57, %v6816_v36  ;;  %v474_v38 = vand.u32 2147483647, %v473_v25  ;;  %v660_v21 = vadd.s32 %v659_v27, %v655_v60 }
 0x159   : > { %v726_v18 = vshll.u32 %v11109_v57, %v6787_v55  ;;  %v727_v0 = vshrl.u32 %v11022_v52, %v6816_v36  ;;  %v7564_v43 = vand.u32 3, %v7542_v20  ;;  %v722_v63 = vor.u32 %v721_v13, %v720_v23 }
 0x15a   : > { %vm5969_vm14 = vcmp.lt.s32.totalorder %v5968_v59, 0  ;;  %v725_v3 = vor.u32 %v724_v19, %v723_v50  ;;  %v477_v58 = vmul.f32 %v476_v8, %v474_v38  ;;  %v661_v48 = vadd.s32 536870912, %v660_v21 }
 0x15b   : > { %v568_v15 = vsel %vm5969_vm14, 0, %v5968_v59  ;;  %v728_v56 = vor.u32 %v727_v0, %v726_v18  ;;  %v11119_v32 = vand.u32 2147483647, %v6731_v31  ;;  %v583_v27 = vsub.s32 4, %v7483_v12  ;;  %v11122_v18 = vld [vmem:[#allocation41_spill] sm:$0xff] }
 0x15c   : > { %v569_v55 = vsub.s32 32, %v568_v15  ;;  %v573_v25 = vsub.s32 4294967266, %v568_v15  ;;  %v719_v20 = vshrl.u32 %v11110_v33, %v6816_v36  ;;  %v478_v10 = vxor.u32 2147483648, %v477_v58 }
 0x15d   : > { %vm7568_vm8 = vcmp.le.f32.partialorder %v11119_v32, 0.7853982  ;;  %v7575_v23 = vshrl.u32 %v661_v48, 30  ;;  %v711_v8 = vor.u32 8388608, %v710_v49  ;;  %vm735_vm0 = vcmp.lt.s32.totalorder %v6861_v41, 1 }
 0x15e   : > { %v570_v13 = vshll.u32 %v7510_v9, %v568_v15  ;;  %v571_v59 = vshrl.u32 %v553_v54, %v569_v55  ;;  %v574_v32 = vadd.s32 127, %v573_v25  ;;  %vm737_vm10 = vcmp.lt.s32.totalorder %v6861_v41, 3 }
 0x15f   : > { %v479_v50 = vsel %vm396_vm4, %v478_v10, %v477_v58  ;;  %v663_v19 = vshll.u32 %v7575_v23, 30  ;;  %v740_v36 = vsel %vm738_vm11, %v728_v56, 2102212464  ;;  %v743_v38 = vsel %vm735_vm0, %v722_v63, %v725_v3 }
 0x160   : > { %v482_v49 = vsel %vm7479_vm7, %v6687_v40, %v479_v50  ;;  %v572_v9 = vor.u32 %v571_v59, %v570_v13  ;;  %v575_v54 = vshll.u32 %v574_v32, 23  ;;  %v745_v0 = vsel %vm737_vm10, %v728_v56, %v11122_v18 }
 0x161   : > { %6290 = vcosq.f32 %v482_v49  ;;  %v584_v10 = vsel %vm499_vm2, %v583_v27, %v7483_v12  ;;  %v7596_v58 = vsub.s32 %v660_v21, %v663_v19  ;;  %vm736_vm11 = vcmp.lt.s32.totalorder %v6861_v41, 2  ;;  %v11123_v21 = vld [vmem:[#allocation42_spill] sm:$0xff]  ;;  %v11124_v27 = vld [vmem:[#allocation36_spill] sm:$0xff] }
 0x162   : > { %6292 = vsinq.f32 %v482_v49  ;;  %v576_v15 = vor.u32 4788187, %v575_v54  ;;  %v739_v1 = vsel %vm735_vm0, %v719_v20, %v722_v63  ;;  %v741_v48 = vsel %vm737_vm10, %v725_v3, %v740_v36 }
 0x163   : > { %v666_v55 = vsub.s32 0, %v7596_v58  ;;  %v746_v25 = vsel %vm736_vm11, %v743_v38, %v745_v0  ;;  %v747_v12 = vsel %vm735_vm0, %v725_v3, %v728_v56  ;;  %v749_v13 = vsel %vm737_vm10, %v11124_v27, %v11123_v21  ;;  %v11125_v0 = vld [vmem:[#allocation74_spill] sm:$0xff] }
 0x164   : > { %v577_v59 = vand.u32 2147483647, %v576_v15  ;;  %v579_v32 = vcvt.s32.f32 %v572_v9  ;;  %v750_v20 = vsel %vm736_vm11, %v747_v12, %v749_v13  ;;  %v751_v63 = vshll.u32 %v711_v8, 8 }
 0x165   : > { %v7616_v50 = vshrl.u32 %v11028_v5, %v7531_v29  ;;  %v7620_v19 = vshll.u32 %v11028_v5, %v7500_v42  ;;  %v7624_v3 = vsel %vm7568_vm8, 0, %v584_v10  ;;  %v5971_v56 = vmin.u32 %v666_v55, %v7596_v58 }
 0x166   : > { %v580_v36 = vmul.f32 %v579_v32, %v577_v59  ;;  %v742_v38 = vsel %vm736_vm11, %v739_v1, %v741_v48  ;;  %v7629_v49 = vmul.u32.u64.low %v751_v63, %v750_v20  ;;  %v7630_v8 = vmul.u32.u64.high %v751_v63, %v750_v20, %v7629_v49 }
 0x167   : > { %v668_v9 = vclz %v5971_v56  ;;  %v7632_v54 = vmul.u32.u64.low %v751_v63, %v746_v25  ;;  %v7633_v18 = vmul.u32.u64.high %v751_v63, %v746_v25, %v7632_v54  ;;  %v10931_v15 = vand.u32 2147483647, %v11125_v0 }
 0x168   : > { %vm486_vm7 = vweird.f32 %v6687_v40  ;;  %vm488_vm4 = vcmp.lt.s32.totalorder %v7564_v43, 2  ;;  %vm489_vm14 = vcmp.eq.s32.totalorder %v7564_v43, 0  ;;  %v581_v10 = vxor.u32 2147483648, %v580_v36 }
 0x169   : > { %vm492_vm0 = vcmp.eq.s32.totalorder %v7564_v43, 2  ;;  %v7642_v41 = vand.u32 3, %v7624_v3  ;;  %v656_v1 = vadd.s32 %v7522_v22, %v7508_v24  ;;  %v5972_v48 = vadd.s32 4294967294, %v668_v9 }
 0x16a   : > { %v582_v55 = vsel %vm499_vm2, %v581_v10, %v580_v36  ;;  %vm602_vm10 = vcmp.lt.s32.totalorder %v6918_v16, 0  ;;  %v686_v25 = vsub.s32 4, %v7575_v23  ;;  %v758_v12 = vmul.u32 %v751_v63, %v742_v38  ;;  %v7681_v10 = vld [vmem:[%s10763_s2] ss:$0 sm:$0xff] }
 0x16b   : > { %v7652_v21 = vand.u32 8388607, %v10931_v15  ;;  %v7654_v27 = vpop.eup %6290  ;;  %v585_v13 = vsel %vm7568_vm8, %v6731_v31, %v582_v55  ;;  %vm5973_vm11 = vcmp.lt.s32.totalorder %v5972_v48, 0  ;;  %vm760_vm13 = vc.u32 %v7630_v8, %v7632_v54 }
 0x16c   : > { %11126 = vst [vmem:[#allocation41_spill] sm:$0xff] %v7654_v27  ;;  %v761_v24 = vadd.s32 1, %v7633_v18  ;;  %v7662_v22 = vpop.eup %6292  ;;  %v10930_v59 = vxor.u32 2147483648, %v7654_v27  ;;  %6294 = vcosq.f32 %v585_v13  ;;  %v671_v32 = vsel %vm5973_vm11, 0, %v5972_v48 }
 0x16d   : > { %11127 = vst [vmem:[#allocation42_spill] sm:$0xff] %v7662_v22  ;;  %v824_v20 = vshrl.u32 %v11108_v14, %v7299_v11  ;;  %v10935_v63 = vxor.u32 2147483648, %v7662_v22  ;;  %6296 = vsinq.f32 %v585_v13  ;;  %v672_v60 = vsub.s32 32, %v671_v32 }
 0x16e   : > { %v826_v56 = vshll.u32 %v11108_v14, %v7258_v45  ;;  %v494_v36 = vsel %vm492_vm0, %v10930_v59, %v7662_v22  ;;  %v676_v38 = vsub.s32 4294967266, %v671_v32  ;;  %v762_v49 = vsel %vm760_vm13, %v761_v24, %v7633_v18 }
 0x16f   : > { %v827_v9 = vshrl.u32 %v11109_v57, %v7299_v11  ;;  %v491_v48 = vsel %vm489_vm14, %v7654_v27, %v10935_v63  ;;  %v673_v55 = vshll.u32 %v7596_v58, %v671_v32  ;;  %v674_v13 = vshrl.u32 %v656_v1, %v672_v60 }
 0x170   : > { %v763_v59 = vadd.s32 %v762_v49, %v758_v12  ;;  %v495_v18 = vsel %vm488_vm4, %v491_v48, %v494_v36  ;;  %v677_v24 = vadd.s32 127, %v676_v38  ;;  %v829_v15 = vshll.u32 %v11109_v57, %v7258_v45 }
 0x171   : > { %v830_v5 = vshrl.u32 %v11022_v52, %v7299_v11  ;;  %v496_v22 = vsel %vm486_vm7, nan, %v495_v18  ;;  %vm592_vm13 = vcmp.eq.s32.totalorder %v7642_v41, 0  ;;  %v675_v63 = vor.u32 %v674_v13, %v673_v55 }
 0x172   : > { %v764_v27 = vadd.s32 536870912, %v763_v59  ;;  %v823_v58 = vshll.u32 %v11110_v33, %v7258_v45  ;;  %v1224_v43 = vmul.f32 %v7681_v10, %v496_v22  ;;  %vm591_vm2 = vcmp.lt.s32.totalorder %v7642_v41, 2 }
 0x173   : > { %v11128_v1 = vand.u32 2147483647, %v6918_v16  ;;  %v678_v32 = vshll.u32 %v677_v24, 23  ;;  %v828_v60 = vor.u32 %v827_v9, %v826_v56  ;;  %v831_v36 = vor.u32 %v830_v5, %v829_v15 }
 0x174   : > { %vm589_vm4 = vweird.f32 %v6731_v31  ;;  %vm595_vm14 = vcmp.eq.s32.totalorder %v7642_v41, 2  ;;  %v687_v45 = vsel %vm602_vm10, %v686_v25, %v7575_v23  ;;  %v765_v22 = vshrl.u32 %v764_v27, 30  ;;  %2089 = vrot.lane.b32.xlu1 %v1224_v43, %s6410_s29  ;;  %v11134_v31 = vld [vmem:[#allocation65_spill] sm:$0xff] }
 0x175   : > { %vm7704_vm8 = vcmp.le.f32.partialorder %v11128_v1, 0.7853982  ;;  %v825_v38 = vor.u32 %v824_v20, %v823_v58  ;;  %v679_v49 = vor.u32 4788187, %v678_v32  ;;  %v814_v48 = vor.u32 8388608, %v7652_v21 }
 0x176   : > { %v822_v56 = vshrl.u32 %v11110_v33, %v7299_v11  ;;  %vm838_vm0 = vcmp.lt.s32.totalorder %v7305_v34, 1  ;;  %v682_v5 = vcvt.s32.f32 %v675_v63  ;;  %v766_v15 = vshll.u32 %v765_v22, 30  ;;  %v7720_v23 = vpop.eup %6294 }
 0x177   : > { %vm839_vm11 = vcmp.lt.s32.totalorder %v7305_v34, 2  ;;  %vm840_vm12 = vcmp.lt.s32.totalorder %v7305_v34, 3  ;;  %v680_v25 = vand.u32 2147483647, %v679_v49  ;;  %v843_v27 = vsel %vm841_vm5, %v831_v36, 2102212464  ;;  %v7730_v20 = vpop.eup %6296 }
 0x178   : > { %v850_v21 = vsel %vm838_vm0, %v828_v60, %v831_v36  ;;  %v852_v11 = vsel %vm840_vm12, %v7346_v2, %v7424_v46  ;;  %v10939_v63 = vxor.u32 2147483648, %v7720_v23  ;;  %v7733_v9 = vsub.s32 %v763_v59, %v766_v15 }
 0x179   : > { %v846_v55 = vsel %vm838_vm0, %v825_v38, %v828_v60  ;;  %v853_v13 = vsel %vm839_vm11, %v850_v21, %v852_v11  ;;  %v10940_v18 = vxor.u32 2147483648, %v7730_v20  ;;  %v683_v24 = vmul.f32 %v682_v5, %v680_v25  ;;  %v11131_v11 = vld [vmem:[#allocation27_spill] sm:$0xff] }
 0x17a   : > { %v848_v58 = vsel %vm840_vm12, %v831_v36, %v7420_v51  ;;  %v854_v2 = vshll.u32 %v814_v48, 8  ;;  %v597_v46 = vsel %vm595_vm14, %v10939_v63, %v7730_v20  ;;  %v769_v59 = vsub.s32 0, %v7733_v9 }
 0x17b   : > { %v842_v43 = vsel %vm838_vm0, %v822_v56, %v825_v38  ;;  %v844_v1 = vsel %vm840_vm12, %v828_v60, %v843_v27  ;;  %v594_v51 = vsel %vm592_vm13, %v7720_v23, %v10940_v18  ;;  %v684_v32 = vxor.u32 2147483648, %v683_v24 }
 0x17c   : > { %v7758_v36 = vmul.u32.u64.low %v854_v2, %v853_v13  ;;  %v7759_v49 = vmul.u32.u64.high %v854_v2, %v853_v13, %v7758_v36  ;;  %v598_v48 = vsel %vm591_vm2, %v594_v51, %v597_v46  ;;  %v7765_v5 = vsel %vm7704_vm8, 0, %v687_v45  ;;  %v11132_v51 = vld [vmem:[#allocation55_spill] sm:$0xff] }
 0x17d   : > { %v5975_v38 = vmin.u32 %v769_v59, %v7733_v9  ;;  %v849_v60 = vsel %vm839_vm11, %v846_v55, %v848_v58  ;;  %v599_v56 = vsel %vm589_vm4, nan, %v598_v48  ;;  %v685_v15 = vsel %vm602_vm10, %v684_v32, %v683_v24  ;;  %v11133_v36 = vld [vmem:[#allocation61_spill] sm:$0xff] }
 0x17e   : > { %v789_v25 = vsub.s32 4, %v765_v22  ;;  %v845_v41 = vsel %vm839_vm11, %v842_v43, %v844_v1  ;;  %v1225_v27 = vmul.f32 %v7681_v10, %v599_v56  ;;  %v688_v45 = vsel %vm7704_vm8, %v6918_v16, %v685_v15 }
 0x17f   : > { %v771_v21 = vclz %v5975_v38  ;;  %v10941_v13 = vand.u32 2147483647, %v11131_v11  ;;  %6298 = vcosq.f32 %v688_v45  ;;  %v7782_v55 = vand.u32 3, %v7765_v5 }
 0x180   : > { %v7784_v58 = vmul.u32.u64.low %v854_v2, %v849_v60  ;;  %v7785_v46 = vmul.u32.u64.high %v854_v2, %v849_v60, %v7784_v58  ;;  %v7790_v34 = vshrl.u32 %v11021_v26, %v7531_v29  ;;  %2091 = vrot.lane.b32.xlu0 %v1225_v27, %s6410_s29  ;;  %6300 = vsinq.f32 %v688_v45 }
 0x181   : > { %vm705_vm12 = vcmp.lt.s32.totalorder %v6707_v53, 0  ;;  %v5976_v12 = vadd.s32 4294967294, %v771_v21  ;;  %v759_v24 = vadd.s32 %v7632_v54, %v7630_v8  ;;  %v861_v43 = vmul.u32 %v854_v2, %v845_v41 }
 0x182   : > { %v7798_v59 = vsel %vm705_vm12, %v789_v25, %v765_v22  ;;  %v916_v1 = vand.u32 8388607, %v10941_v13  ;;  %vm863_vm10 = vc.u32 %v7759_v49, %v7784_v58  ;;  %v926_v32 = vshll.u32 %v11110_v33, %v11132_v51 }
 0x183   : > { %vm5977_vm5 = vcmp.lt.s32.totalorder %v5976_v12, 0  ;;  %v927_v48 = vshrl.u32 %v11108_v14, %v11133_v36  ;;  %vm698_vm13 = vcmp.eq.s32.totalorder %v7782_v55, 2  ;;  %v864_v54 = vadd.s32 1, %v7785_v46 }
 0x184   : > { %v774_v8 = vsel %vm5977_vm5, 0, %v5976_v12  ;;  %v929_v22 = vshll.u32 %v11108_v14, %v11132_v51  ;;  %v930_v2 = vshrl.u32 %v11109_v57, %v11133_v36  ;;  %vm695_vm2 = vcmp.eq.s32.totalorder %v7782_v55, 0 }
 0x185   : > { %v775_v38 = vsub.s32 32, %v774_v8  ;;  %v779_v60 = vsub.s32 4294967266, %v774_v8  ;;  %v925_v56 = vshrl.u32 %v11110_v33, %v11133_v36  ;;  %v932_v15 = vshll.u32 %v11109_v57, %v11132_v51 }
 0x186   : > { %vm694_vm8 = vcmp.lt.s32.totalorder %v7782_v55, 2  ;;  %v865_v25 = vsel %vm863_vm10, %v864_v54, %v7785_v46  ;;  %v928_v41 = vor.u32 %v927_v48, %v926_v32  ;;  %v931_v27 = vor.u32 %v930_v2, %v929_v22  ;;  %v11135_v48 = vld [vmem:[#allocation78_spill] sm:$0xff]  ;;  %v11136_v54 = vld [vmem:[#allocation71_spill] sm:$0xff] }
 0x187   : > { %v933_v45 = vshrl.u32 %v11022_v52, %v11133_v36  ;;  %vm692_vm14 = vweird.f32 %v6918_v16  ;;  %v776_v21 = vshll.u32 %v7733_v9, %v774_v8  ;;  %v777_v12 = vshrl.u32 %v759_v24, %v775_v38  ;;  %v11137_v24 = vld [vmem:[#allocation76_spill] sm:$0xff] }
 0x188   : > { %v780_v63 = vadd.s32 127, %v779_v60  ;;  %v866_v18 = vadd.s32 %v865_v25, %v861_v43  ;;  %v917_v13 = vor.u32 8388608, %v916_v1  ;;  %vm941_vm0 = vcmp.lt.s32.totalorder %v11134_v31, 1 }
 0x189   : > { %v934_v26 = vor.u32 %v933_v45, %v932_v15  ;;  %vm943_vm11 = vcmp.lt.s32.totalorder %v11134_v31, 3  ;;  %v778_v51 = vor.u32 %v777_v12, %v776_v21  ;;  %v7831_v22 = vpop.eup %6298  ;;  %vm942_vm5 = vcmp.lt.s32.totalorder %v11134_v31, 2 }
 0x18a   : > { %v781_v46 = vshll.u32 %v780_v63, 23  ;;  %v867_v32 = vadd.s32 536870912, %v866_v18  ;;  %v955_v36 = vsel %vm943_vm11, %v11136_v54, %v11135_v48  ;;  %v949_v9 = vsel %vm941_vm0, %v928_v41, %v931_v27  ;;  %v7841_v1 = vpop.eup %6300 }
 0x18b   : > { %v951_v43 = vsel %vm943_vm11, %v934_v26, %v11137_v24  ;;  %v953_v63 = vsel %vm941_vm0, %v931_v27, %v934_v26  ;;  %v10944_v8 = vxor.u32 2147483648, %v7831_v22  ;;  %v946_v60 = vsel %vm944_vm9, %v934_v26, 2102212464 }
 0x18c   : > { %v782_v2 = vor.u32 4788187, %v781_v46  ;;  %v7844_v38 = vshrl.u32 %v867_v32, 30  ;;  %v696_v15 = vxor.u32 2147483648, %v7841_v1  ;;  %v785_v25 = vcvt.s32.f32 %v778_v51 }
 0x18d   : > { %v956_v45 = vsel %vm942_vm5, %v953_v63, %v955_v36  ;;  %v957_v21 = vshll.u32 %v917_v13, 8  ;;  %v700_v12 = vsel %vm698_vm13, %v10944_v8, %v7841_v1  ;;  %v952_v32 = vsel %vm942_vm5, %v949_v9, %v951_v43 }
 0x18e   : > { %v783_v48 = vand.u32 2147483647, %v782_v2  ;;  %v869_v46 = vshll.u32 %v7844_v38, 30  ;;  %v697_v26 = vsel %vm695_vm2, %v7831_v22, %v696_v15  ;;  %v945_v13 = vsel %vm941_vm0, %v925_v56, %v928_v41 }
 0x18f   : > { %v7866_v51 = vmul.u32.u64.low %v957_v21, %v956_v45  ;;  %v7867_v54 = vmul.u32.u64.high %v957_v21, %v956_v45, %v7866_v51  ;;  %v701_v36 = vsel %vm694_vm8, %v697_v26, %v700_v12  ;;  %v947_v9 = vsel %vm943_vm11, %v931_v27, %v946_v60 }
 0x190   : > { %v786_v24 = vmul.f32 %v785_v25, %v783_v48  ;;  %v7871_v63 = vsub.s32 %v866_v18, %v869_v46  ;;  %v702_v43 = vsel %vm692_vm14, nan, %v701_v36  ;;  %v11138_v2 = vand.u32 2147483647, %v6707_v53 }
 0x191   : > { %v7883_v56 = vmul.u32.u64.low %v957_v21, %v952_v32  ;;  %v7884_v41 = vmul.u32.u64.high %v957_v21, %v952_v32, %v7883_v56  ;;  %v1226_v55 = vmul.f32 %v7681_v10, %v702_v43  ;;  %v7896_v25 = vor.u32 %v7459_v30, %v7428_v37 }
 0x192   : > { %vm7879_vm9 = vcmp.le.f32.partialorder %v11138_v2, 0.7853982  ;;  %v787_v18 = vxor.u32 2147483648, %v786_v24  ;;  %v872_v60 = vsub.s32 0, %v7871_v63  ;;  %v7900_v45 = vor.u32 %v7616_v50, %v7535_v4 }
 0x193   : > { %v7891_v27 = vsel %vm7879_vm9, 0, %v7798_v59  ;;  %v6052_v12 = vadd.s32 4294967169, %v7468_v35  ;;  %v948_v48 = vsel %vm942_vm5, %v945_v13, %v947_v9  ;;  %v1043_v46 = vor.u32 %v7790_v34, %v7620_v19  ;;  %2093 = vrot.lane.b32.xlu1 %v1226_v55, %s6410_s29 }
 0x194   : > { %v788_v59 = vsel %vm705_vm12, %v787_v18, %v786_v24  ;;  %v5979_v37 = vmin.u32 %v872_v60, %v7871_v63  ;;  %vm966_vm10 = vc.u32 %v7867_v54, %v7883_v56  ;;  %vm1047_vm13 = vcmp.lt.s32.totalorder %v7498_v47, 4 }
 0x195   : > { %v791_v31 = vsel %vm7879_vm9, %v6707_v53, %v788_v59  ;;  %v7918_v30 = vand.u32 3, %v7891_v27  ;;  %v967_v35 = vadd.s32 1, %v7884_v41  ;;  %v964_v50 = vmul.u32 %v957_v21, %v948_v48 }
 0x196   : > { %6302 = vcosq.f32 %v791_v31  ;;  %v874_v4 = vclz %v5979_v37  ;;  %v1012_v19 = vand.u32 2147483647, %v7321_v7  ;;  %v1053_v34 = vsel %vm1047_vm13, %v7900_v45, 920167782 }
 0x197   : > { %v7925_v32 = vadd.s32 1, %v6052_v12  ;;  %6304 = vsinq.f32 %v791_v31  ;;  %v968_v8 = vsel %vm966_vm10, %v967_v35, %v7884_v41  ;;  %v1057_v26 = vsel %vm1047_vm13, %v1043_v46, 1326507024 }
 0x198   : > { %v5980_v13 = vadd.s32 4294967294, %v874_v4  ;;  %v892_v51 = vsub.s32 4, %v7844_v38  ;;  %v969_v36 = vadd.s32 %v968_v8, %v964_v50  ;;  %vm808_vm12 = vcmp.lt.s32.totalorder %v11125_v0, 0 }
 0x199   : > { %v862_v21 = vadd.s32 %v7784_v58, %v7759_v49  ;;  %v1030_v24 = vshrl.u32 %v11108_v14, %v7531_v29  ;;  %v1033_v9 = vshrl.u32 %v11109_v57, %v7531_v29  ;;  %vm801_vm2 = vcmp.eq.s32.totalorder %v7918_v30, 2 }
 0x19a   : > { %vm5981_vm8 = vcmp.lt.s32.totalorder %v5980_v13, 0  ;;  %v970_v43 = vadd.s32 536870912, %v969_v36  ;;  %v1019_v2 = vand.u32 8388607, %v1012_v19  ;;  %v1036_v41 = vshrl.u32 %v11022_v52, %v7531_v29 }
 0x19b   : > { %vm798_vm0 = vcmp.eq.s32.totalorder %v7918_v30, 0  ;;  %v877_v55 = vsel %vm5981_vm8, 0, %v5980_v13  ;;  %v1029_v49 = vshll.u32 %v11110_v33, %v7500_v42  ;;  %v1032_v58 = vshll.u32 %v11108_v14, %v7500_v42 }
 0x19c   : > { %v1035_v18 = vshll.u32 %v11109_v57, %v7500_v42  ;;  %vm797_vm11 = vcmp.lt.s32.totalorder %v7918_v30, 2  ;;  %v878_v60 = vsub.s32 32, %v877_v55  ;;  %v882_v12 = vsub.s32 4294967266, %v877_v55 }
 0x19d   : > { %v893_v48 = vsel %vm808_vm12, %v892_v51, %v7844_v38  ;;  %v7954_v46 = vshrl.u32 %v970_v43, 30  ;;  %vm795_vm5 = vweird.f32 %v6707_v53  ;;  %v1028_v59 = vshrl.u32 %v11110_v33, %v7531_v29 }
 0x19e   : > { %v1031_v37 = vor.u32 %v1030_v24, %v1029_v49  ;;  %v1034_v31 = vor.u32 %v1033_v9, %v1032_v58  ;;  %v1037_v35 = vor.u32 %v1036_v41, %v1035_v18  ;;  %vm2866_vm9 = vcmp.gt.s32.totalorder %v7925_v32, 0 }
 0x19f   : > { %v879_v42 = vshll.u32 %v7871_v63, %v877_v55  ;;  %v880_v4 = vshrl.u32 %v862_v21, %v878_v60  ;;  %v883_v50 = vadd.s32 127, %v882_v12  ;;  %v972_v8 = vshll.u32 %v7954_v46, 30 }
 0x1a0   : > { %v1020_v13 = vor.u32 8388608, %v1019_v2  ;;  %vm1044_vm10 = vcmp.lt.s32.totalorder %v7498_v47, 1  ;;  %vm1045_vm8 = vcmp.lt.s32.totalorder %v7498_v47, 2  ;;  %vm1046_vm15 = vcmp.lt.s32.totalorder %v7498_v47, 3  ;;  %v7965_v38 = vpop.eup %6302 }
 0x1a1   : > { %v881_v29 = vor.u32 %v880_v4, %v879_v42  ;;  %v884_v51 = vshll.u32 %v883_v50, 23  ;;  %v7967_v24 = vsub.s32 %v969_v36, %v972_v8  ;;  %v1049_v63 = vsel %vm1047_vm13, %v1037_v35, 2102212464  ;;  %v7971_v21 = vpop.eup %6304 }
 0x1a2   : > { %v10947_v9 = vxor.u32 2147483648, %v7965_v38  ;;  %v1052_v43 = vsel %vm1044_vm10, %v1031_v37, %v1034_v31  ;;  %v1056_v2 = vsel %vm1044_vm10, %v1034_v31, %v1037_v35  ;;  %v1058_v41 = vsel %vm1046_vm15, %v7900_v45, %v1057_v26 }
 0x1a3   : > { %v10948_v36 = vxor.u32 2147483648, %v7971_v21  ;;  %v885_v55 = vor.u32 4788187, %v884_v51  ;;  %v975_v49 = vsub.s32 0, %v7967_v24  ;;  %v1054_v58 = vsel %vm1046_vm15, %v1037_v35, %v1053_v34 }
 0x1a4   : > { %v803_v18 = vsel %vm801_vm2, %v10947_v9, %v7971_v21  ;;  %v888_v60 = vcvt.s32.f32 %v881_v29  ;;  %v1048_v12 = vsel %vm1044_vm10, %v1028_v59, %v1031_v37  ;;  %v1050_v45 = vsel %vm1046_vm15, %v1034_v31, %v1049_v63 }
 0x1a5   : > { %v800_v26 = vsel %vm798_vm0, %v7965_v38, %v10948_v36  ;;  %v886_v34 = vand.u32 2147483647, %v885_v55  ;;  %v5983_v35 = vmin.u32 %v975_v49, %v7967_v24  ;;  %v1059_v42 = vsel %vm1045_vm8, %v1056_v2, %v1058_v41 }
 0x1a6   : > { %v804_v4 = vsel %vm797_vm11, %v800_v26, %v803_v18  ;;  %v11141_v59 = vand.u32 2147483647, %v11125_v0  ;;  %v1055_v31 = vsel %vm1045_vm8, %v1052_v43, %v1054_v58  ;;  %v1060_v50 = vshll.u32 %v1020_v13, 8 }
 0x1a7   : > { %v805_v8 = vsel %vm795_vm5, nan, %v804_v4  ;;  %v889_v29 = vmul.f32 %v888_v60, %v886_v34  ;;  %v977_v30 = vclz %v5983_v35  ;;  %v1051_v2 = vsel %vm1045_vm8, %v1048_v12, %v1050_v45  ;;  %v11144_v60 = vld [vmem:[#allocation56_spill] sm:$0xff] }
 0x1a8   : > { %vm8006_vm13 = vcmp.le.f32.partialorder %v11141_v59, 0.7853982  ;;  %v1227_v63 = vmul.f32 %v7681_v10, %v805_v8  ;;  %v8021_v41 = vmul.u32.u64.low %v1060_v50, %v1059_v42  ;;  %v8022_v55 = vmul.u32.u64.high %v1060_v50, %v1059_v42, %v8021_v41  ;;  %v11145_v42 = vld [vmem:[#allocation87_spill] sm:$0xff]  ;;  %v11146_v59 = vld [vmem:[#allocation93_spill] sm:$0xff] }
 0x1a9   : > { %v8016_v51 = vsel %vm8006_vm13, 0, %v893_v48  ;;  %v890_v49 = vxor.u32 2147483648, %v889_v29  ;;  %v5984_v43 = vadd.s32 4294967294, %v977_v30  ;;  %v2680_v18 = vor.u32 %v7463_v61, %v7432_v17 }
 0x1aa   : > { %v8024_v13 = vmul.u32.u64.low %v1060_v50, %v1055_v31  ;;  %v8025_v58 = vmul.u32.u64.high %v1060_v50, %v1055_v31, %v8024_v13  ;;  %v8033_v48 = vsel %vm2866_vm9, %v7925_v32, 0  ;;  %2095 = vrot.lane.b32.xlu0 %v1227_v63, %s6410_s29  ;;  %v8037_v47 = vand.u32 3, %v8016_v51 }
 0x1ab   : > { %v10946_v12 = vand.u32 2147483647, %v11144_v60  ;;  %v891_v45 = vsel %vm808_vm12, %v890_v49, %v889_v29  ;;  %v965_v26 = vadd.s32 %v7883_v56, %v7867_v54  ;;  %vm5985_vm15 = vcmp.lt.s32.totalorder %v5984_v43, 0 }
 0x1ac   : > { %v1067_v34 = vmul.u32 %v1060_v50, %v1051_v2  ;;  %v894_v32 = vsel %vm8006_vm13, %v11125_v0, %v891_v45  ;;  %v980_v35 = vsel %vm5985_vm15, 0, %v5984_v43  ;;  %v1132_v4 = vshll.u32 %v11110_v33, %v11145_v42 }
 0x1ad   : > { %v1133_v31 = vshrl.u32 %v11108_v14, %v11146_v59  ;;  %6306 = vcosq.f32 %v894_v32  ;;  %v981_v8 = vsub.s32 32, %v980_v35  ;;  %v985_v30 = vsub.s32 4294967266, %v980_v35 }
 0x1ae   : > { %vm1069_vm12 = vc.u32 %v8022_v55, %v8024_v13  ;;  %6308 = vsinq.f32 %v894_v32  ;;  %v1070_v54 = vadd.s32 1, %v8025_v58  ;;  %v1122_v56 = vand.u32 8388607, %v10946_v12 }
 0x1af   : > { %v1135_v37 = vshll.u32 %v11108_v14, %v11145_v42  ;;  %vm911_vm2 = vcmp.lt.s32.totalorder %v11131_v11, 0  ;;  %v982_v50 = vshll.u32 %v7967_v24, %v980_v35  ;;  %v983_v29 = vshrl.u32 %v965_v26, %v981_v8 }
 0x1b0   : > { %v986_v63 = vadd.s32 127, %v985_v30  ;;  %v1136_v2 = vshrl.u32 %v11109_v57, %v11146_v59  ;;  %v1071_v41 = vsel %vm1069_vm12, %v1070_v54, %v8025_v58  ;;  %v1134_v49 = vor.u32 %v1133_v31, %v1132_v4 }
 0x1b1   : > { %v1138_v43 = vshll.u32 %v11109_v57, %v11145_v42  ;;  %v1139_v45 = vshrl.u32 %v11022_v52, %v11146_v59  ;;  %v984_v32 = vor.u32 %v983_v29, %v982_v50  ;;  %v1072_v9 = vadd.s32 %v1071_v41, %v1067_v34  ;;  %v11150_v29 = vld [vmem:[#allocation100_spill] sm:$0xff] }
 0x1b2   : > { %v987_v12 = vshll.u32 %v986_v63, 23  ;;  %v1137_v36 = vor.u32 %v1136_v2, %v1135_v37  ;;  %vm901_vm0 = vcmp.eq.s32.totalorder %v8037_v47, 0  ;;  %vm904_vm11 = vcmp.eq.s32.totalorder %v8037_v47, 2 }
 0x1b3   : > { %v1123_v24 = vor.u32 8388608, %v1122_v56  ;;  %v1140_v26 = vor.u32 %v1139_v45, %v1138_v43  ;;  %vm900_vm9 = vcmp.lt.s32.totalorder %v8037_v47, 2  ;;  %v11147_v58 = vand.u32 2147483647, %v11131_v11 }
 0x1b4   : > { %v988_v42 = vor.u32 4788187, %v987_v12  ;;  %v1073_v4 = vadd.s32 536870912, %v1072_v9  ;;  %vm1147_vm8 = vcmp.lt.s32.totalorder %v7222_v62, 1  ;;  %vm1149_vm13 = vcmp.lt.s32.totalorder %v7222_v62, 3 }
 0x1b5   : > { %vm8072_vm10 = vcmp.le.f32.partialorder %v11147_v58, 0.7853982  ;;  %v995_v34 = vsub.s32 4, %v7954_v46  ;;  %v1155_v31 = vsel %vm1147_vm8, %v1134_v49, %v1137_v36  ;;  %v1157_v8 = vsel %vm1149_vm13, %v1140_v26, %v7274_v39 }
 0x1b6   : > { %v1159_v30 = vsel %vm1147_vm8, %v1137_v36, %v1140_v26  ;;  %v989_v54 = vand.u32 2147483647, %v988_v42  ;;  %v991_v56 = vcvt.s32.f32 %v984_v32  ;;  %v1074_v12 = vshrl.u32 %v1073_v4, 30 }
 0x1b7   : > { %v1131_v37 = vshrl.u32 %v11110_v33, %v11146_v59  ;;  %vm4530_vm15 = vcmp.gt.s32.totalorder %v7466_v44, 0  ;;  %vm1148_vm12 = vcmp.lt.s32.totalorder %v7222_v62, 2  ;;  %v1152_v50 = vsel %vm1150_vm3, %v1140_v26, 2102212464  ;;  %v8096_v2 = vpop.eup %6306 }
 0x1b8   : > { %v1161_v39 = vsel %vm1149_vm13, %v11150_v29, %v7278_v6  ;;  %v1163_v63 = vshll.u32 %v1123_v24, 8  ;;  %vm10953_vm1 = vcmp.lt.s32.totalorder %v7337_v28, 4  ;;  %v992_v41 = vmul.f32 %v991_v56, %v989_v54  ;;  %v8103_v32 = vpop.eup %6308 }
 0x1b9   : > { %v1075_v43 = vshll.u32 %v1074_v12, 30  ;;  %v1158_v59 = vsel %vm1148_vm12, %v1155_v31, %v1157_v8  ;;  %v1162_v45 = vsel %vm1148_vm12, %v1159_v30, %v1161_v39  ;;  %v10952_v26 = vxor.u32 2147483648, %v8096_v2 }
 0x1ba   : > { %v996_v6 = vsel %vm911_vm2, %v995_v34, %v7954_v46  ;;  %v8109_v24 = vmul.u32.u64.low %v1163_v63, %v1162_v45  ;;  %v8110_v58 = vmul.u32.u64.high %v1163_v63, %v1162_v45, %v8109_v24  ;;  %v902_v42 = vxor.u32 2147483648, %v8103_v32 }
 0x1bb   : > { %v993_v4 = vxor.u32 2147483648, %v992_v41  ;;  %v8113_v54 = vsub.s32 %v1072_v9, %v1075_v43  ;;  %v1151_v31 = vsel %vm1147_vm8, %v1131_v37, %v1134_v49  ;;  %v906_v8 = vsel %vm904_vm11, %v10952_v26, %v8103_v32 }
 0x1bc   : > { %v1153_v46 = vsel %vm1149_vm13, %v1137_v36, %v1152_v50  ;;  %v8124_v34 = vmul.u32.u64.low %v1163_v63, %v1158_v59  ;;  %v8125_v30 = vmul.u32.u64.high %v1163_v63, %v1158_v59, %v8124_v34  ;;  %v903_v9 = vsel %vm901_vm0, %v8096_v2, %v902_v42 }
 0x1bd   : > { %v994_v49 = vsel %vm911_vm2, %v993_v4, %v992_v41  ;;  %v1078_v56 = vsub.s32 0, %v8113_v54  ;;  %v1098_v37 = vsub.s32 4, %v1074_v12  ;;  %vm898_vm3 = vweird.f32 %v11125_v0  ;;  %v11151_v4 = vld [vmem:[#allocation10_spill] sm:$0xff] }
 0x1be   : > { %v907_v36 = vsel %vm900_vm9, %v903_v9, %v906_v8  ;;  %v997_v50 = vsel %vm8072_vm10, %v11131_v11, %v994_v49  ;;  %v998_v29 = vsel %vm8072_vm10, 0, %v996_v6  ;;  %v1154_v43 = vsel %vm1148_vm12, %v1151_v31, %v1153_v46  ;;  %v11152_v31 = vld [vmem:[#allocation112_spill] sm:$0xff] }
 0x1bf   : > { %v908_v39 = vsel %vm898_vm3, nan, %v907_v36  ;;  %6310 = vcosq.f32 %v997_v50  ;;  %v5987_v41 = vmin.u32 %v1078_v56, %v8113_v54  ;;  %vm1014_vm2 = vcmp.lt.s32.totalorder %v7321_v7, 0  ;;  %v11156_v56 = vld [vmem:[#allocation114_spill] sm:$0xff] }
 0x1c0   : > { %v1228_v59 = vmul.f32 %v7681_v10, %v908_v39  ;;  %6312 = vsinq.f32 %v997_v50  ;;  %vm1172_vm0 = vc.u32 %v8110_v58, %v8124_v34  ;;  %v1002_v47 = vand.u32 3, %v998_v29 }
 0x1c1   : > { %v1080_v45 = vclz %v5987_v41  ;;  %v1099_v35 = vsel %vm1014_vm2, %v1098_v37, %v1074_v12  ;;  %v1173_v6 = vadd.s32 1, %v8125_v30  ;;  %v8157_v24 = vsel %vm10953_vm1, %v7896_v25, 920167782 }
 0x1c2   : > { %v8164_v62 = vsel %vm10953_vm1, %v2680_v18, 1326507024  ;;  %v8168_v8 = vadd.f32 %v11152_v31, %v11151_v4  ;;  %2097 = vrot.lane.b32.xlu1 %v1228_v59, %s6410_s29  ;;  %v1170_v12 = vmul.u32 %v1163_v63, %v1154_v43  ;;  %v8174_v46 = vsel %vm4530_vm15, %v7466_v44, 0 }
 0x1c3   : > { %vm8178_vm11 = vcmp.le.f32.partialorder %v1012_v19, 0.7853982  ;;  %v5988_v61 = vadd.s32 4294967294, %v1080_v45  ;;  %v1174_v18 = vsel %vm1172_vm0, %v1173_v6, %v8125_v30  ;;  %v8184_v9 = vshrl.u32 %v8033_v48, 5 }
 0x1c4   : > { %11153 = vst [vmem:[#allocation36_spill] sm:$0xff] %v8168_v8  ;;  %v8188_v63 = vsel %vm8178_vm11, 0, %v1099_v35  ;;  %v1175_v49 = vadd.s32 %v1174_v18, %v1170_v12  ;;  %v1325_v44 = vadd.s32 3, %v11156_v56  ;;  %vm1003_vm9 = vcmp.lt.s32.totalorder %v1002_v47, 2 }
 0x1c5   : > { %vm1004_vm10 = vcmp.eq.s32.totalorder %v1002_v47, 0  ;;  %vm1007_vm8 = vcmp.eq.s32.totalorder %v1002_v47, 2  ;;  %vm5989_vm13 = vcmp.lt.s32.totalorder %v5988_v61, 0  ;;  %vm10954_vm15 = vweird.f32 %v11131_v11 }
 0x1c6   : > { %v1068_v19 = vadd.s32 %v8024_v13, %v8022_v55  ;;  %v1083_v30 = vsel %vm5989_vm13, 0, %v5988_v61  ;;  %v1176_v37 = vadd.s32 536870912, %v1175_v49  ;;  %v1429_v36 = vadd.s32 3, %v7624_v3 }
 0x1c7   : > { %v1084_v50 = vsub.s32 32, %v1083_v30  ;;  %v1088_v39 = vsub.s32 4294967266, %v1083_v30  ;;  %v8196_v41 = vand.u32 3, %v8188_v63  ;;  %v1533_v43 = vadd.s32 3, %v7765_v5 }
 0x1c8   : > { %v8200_v59 = vadd.s32 %v8124_v34, %v8110_v58  ;;  %v8202_v45 = vshrl.u32 %v1176_v37, 30  ;;  %v1326_v35 = vand.u32 3, %v1325_v44  ;;  %v1637_v6 = vadd.s32 3, %v7891_v27 }
 0x1c9   : > { %v8205_v55 = vpop.eup %6310  ;;  %v1085_v13 = vshll.u32 %v8113_v54, %v1083_v30  ;;  %v1086_v3 = vshrl.u32 %v1068_v19, %v1084_v50  ;;  %v1089_v4 = vadd.s32 127, %v1088_v39  ;;  %v1741_v31 = vadd.s32 3, %v8016_v51  ;;  %v11157_v30 = vld [vmem:[#allocation42_spill] sm:$0xff] }
 0x1ca   : > { %v8209_v12 = vpop.eup %6312  ;;  %v10950_v5 = vxor.u32 2147483648, %v8205_v55  ;;  %v1178_v58 = vshll.u32 %v8202_v45, 30  ;;  %v8213_v34 = vand.u32 3, %v1429_v36  ;;  %v1845_v61 = vadd.s32 3, %v998_v29  ;;  %v11159_v36 = vld [vmem:[#allocation41_spill] sm:$0xff] }
 0x1cb   : > { %v10951_v18 = vxor.u32 2147483648, %v8209_v12  ;;  %v1087_v27 = vor.u32 %v1086_v3, %v1085_v13  ;;  %v1090_v56 = vshll.u32 %v1089_v4, 23  ;;  %v1534_v44 = vand.u32 3, %v1533_v43 }
 0x1cc   : > { %v1009_v54 = vsel %vm1007_vm8, %v10950_v5, %v8209_v12  ;;  %v8220_v51 = vsub.s32 %v1175_v49, %v1178_v58  ;;  %vm1328_vm12 = vcmp.eq.s32.totalorder %v1326_v35, 0  ;;  %vm1331_vm0 = vcmp.eq.s32.totalorder %v1326_v35, 2 }
 0x1cd   : > { %v1006_v19 = vsel %vm1004_vm10, %v8205_v55, %v10951_v18  ;;  %v1091_v29 = vor.u32 4788187, %v1090_v56  ;;  %v11158_v37 = vxor.u32 2147483648, %v11157_v30  ;;  %v11160_v39 = vxor.u32 2147483648, %v11159_v36 }
 0x1ce   : > { %v1010_v13 = vsel %vm1003_vm9, %v1006_v19, %v1009_v54  ;;  %v1181_v49 = vsub.s32 0, %v8220_v51  ;;  %v1638_v3 = vand.u32 3, %v1637_v6  ;;  %v1742_v4 = vand.u32 3, %v1741_v31 }
 0x1cf   : > { %v1330_v50 = vsel %vm1328_vm12, %v11159_v36, %v11158_v37  ;;  %v1333_v43 = vsel %vm1331_vm0, %v11160_v39, %v11157_v30  ;;  %v1011_v58 = vsel %vm10954_vm15, nan, %v1010_v13  ;;  %v1092_v5 = vand.u32 2147483647, %v1091_v29 }
 0x1d0   : > { %v1094_v18 = vcvt.s32.f32 %v1087_v27  ;;  %vm1327_vm10 = vcmp.lt.s32.totalorder %v1326_v35, 2  ;;  %v1229_v56 = vmul.f32 %v7681_v10, %v1011_v58  ;;  %v5991_v37 = vmin.u32 %v1181_v49, %v8220_v51 }
 0x1d1   : > { %v1334_v26 = vsel %vm1327_vm10, %v1330_v50, %v1333_v43  ;;  %vm1432_vm8 = vcmp.eq.s32.totalorder %v8213_v34, 0  ;;  %vm1535_vm13 = vcmp.lt.s32.totalorder %v1534_v44, 2  ;;  %vm1536_vm9 = vcmp.eq.s32.totalorder %v1534_v44, 0 }
 0x1d2   : > { %v1095_v30 = vmul.f32 %v1094_v18, %v1092_v5  ;;  %vm1539_vm12 = vcmp.eq.s32.totalorder %v1534_v44, 2  ;;  %2099 = vrot.lane.b32.xlu0 %v1229_v56, %s6410_s29  ;;  %vm1117_vm0 = vcmp.lt.s32.totalorder %v11144_v60, 0  ;;  %v1183_v47 = vclz %v5991_v37 }
 0x1d3   : > { %v1538_v35 = vsel %vm1536_vm9, %v7831_v22, %v696_v15  ;;  %v11161_v6 = vxor.u32 2147483648, %v7831_v22  ;;  %vm1639_vm10 = vcmp.lt.s32.totalorder %v1638_v3, 2  ;;  %vm1640_vm1 = vcmp.eq.s32.totalorder %v1638_v3, 0 }
 0x1d4   : > { %v1096_v27 = vxor.u32 2147483648, %v1095_v30  ;;  %vm1643_vm15 = vcmp.eq.s32.totalorder %v1638_v3, 2  ;;  %v5992_v5 = vadd.s32 4294967294, %v1183_v47  ;;  %v11162_v44 = vxor.u32 2147483648, %v7971_v21 }
 0x1d5   : > { %v1541_v31 = vsel %vm1539_vm12, %v11161_v6, %v7841_v1  ;;  %v11163_v15 = vxor.u32 2147483648, %v7965_v38  ;;  %v11164_v1 = vand.u32 2147483647, %v11144_v60  ;;  %v11167_v16 = vxor.u32 2147483648, %v7730_v20 }
 0x1d6   : > { %v1542_v54 = vsel %vm1535_vm13, %v1538_v35, %v1541_v31  ;;  %v1642_v19 = vsel %vm1640_vm1, %v7965_v38, %v11162_v44  ;;  %v1097_v22 = vsel %vm1014_vm2, %v1096_v27, %v1095_v30  ;;  %vm5993_vm1 = vcmp.lt.s32.totalorder %v5992_v5, 0 }
 0x1d7   : > { %v8249_v18 = vsel %vm692_vm14, nan, %v1542_v54  ;;  %v1645_v29 = vsel %vm1643_vm15, %v11163_v15, %v7971_v21  ;;  %vm8261_vm13 = vcmp.le.f32.partialorder %v11164_v1, 0.7853982  ;;  %vm1431_vm14 = vcmp.lt.s32.totalorder %v8213_v34, 2 }
 0x1d8   : > { %v1434_v50 = vsel %vm1432_vm8, %v7720_v23, %v11167_v16  ;;  %v1646_v39 = vsel %vm1639_vm10, %v1642_v19, %v1645_v29  ;;  %v1100_v38 = vsel %vm8178_vm11, %v7321_v7, %v1097_v22  ;;  %v1201_v21 = vsub.s32 4, %v8202_v45  ;;  %v11179_v29 = vld [vmem:[#allocation28_spill] sm:$0xff] }
 0x1d9   : > { %v8277_v43 = vsel %vm795_vm5, nan, %v1646_v39  ;;  %6314 = vcosq.f32 %v1100_v38  ;;  %v1186_v13 = vsel %vm5993_vm1, 0, %v5992_v5  ;;  %vm1435_vm2 = vcmp.eq.s32.totalorder %v8213_v34, 2  ;;  %v11172_v5 = vld [vmem:[#allocation11_spill] sm:$0xff] }
 0x1da   : > { %vm1744_vm15 = vcmp.eq.s32.totalorder %v1742_v4, 0  ;;  %6316 = vsinq.f32 %v1100_v38  ;;  %v1187_v49 = vsub.s32 32, %v1186_v13  ;;  %v1191_v3 = vsub.s32 4294967266, %v1186_v13  ;;  %v11174_v38 = vld [vmem:[#allocation22_spill] sm:$0xff] }
 0x1db   : > { %v1746_v17 = vsel %vm1744_vm15, %v8096_v2, %v902_v42  ;;  %v11168_v58 = vxor.u32 2147483648, %v7720_v23  ;;  %vm1743_vm11 = vcmp.lt.s32.totalorder %v1742_v4, 2  ;;  %vm1747_vm8 = vcmp.eq.s32.totalorder %v1742_v4, 2 }
 0x1dc   : > { %v1846_v53 = vand.u32 3, %v1845_v61  ;;  %v1188_v37 = vshll.u32 %v8220_v51, %v1186_v13  ;;  %v1189_v30 = vshrl.u32 %v8200_v59, %v1187_v49  ;;  %v1192_v47 = vadd.s32 127, %v1191_v3  ;;  %v11175_v49 = vld [vmem:[#allocation18_spill] sm:$0xff] }
 0x1dd   : > { %v1437_v56 = vsel %vm1435_vm2, %v11168_v58, %v7730_v20  ;;  %v11169_v35 = vxor.u32 2147483648, %v8096_v2  ;;  %v1202_v42 = vsel %vm1117_vm0, %v1201_v21, %v8202_v45  ;;  %v1949_v23 = vadd.s32 3, %v8188_v63 }
 0x1de   : > { %vm1848_vm5 = vcmp.eq.s32.totalorder %v1846_v53, 0  ;;  %v1190_v20 = vor.u32 %v1189_v30, %v1188_v37  ;;  %v1193_v4 = vshll.u32 %v1192_v47, 23  ;;  %v11170_v61 = vxor.u32 2147483648, %v8209_v12 }
 0x1df   : > { %v1749_v6 = vsel %vm1747_vm8, %v11169_v35, %v8103_v32  ;;  %vm1851_vm9 = vcmp.eq.s32.totalorder %v1846_v53, 2  ;;  %v1335_v59 = vsel %vm486_vm7, nan, %v1334_v26  ;;  %v1438_v2 = vsel %vm1431_vm14, %v1434_v50, %v1437_v56 }
 0x1e0   : > { %v1750_v31 = vsel %vm1743_vm11, %v1746_v17, %v1749_v6  ;;  %v1850_v51 = vsel %vm1848_vm5, %v8205_v55, %v11170_v61  ;;  %vm1847_vm12 = vcmp.lt.s32.totalorder %v1846_v53, 2  ;;  %v11171_v32 = vxor.u32 2147483648, %v8205_v55 }
 0x1e1   : > { %v1194_v27 = vor.u32 4788187, %v1193_v4  ;;  %v1204_v63 = vsel %vm8261_vm13, 0, %v1202_v42  ;;  %v2237_v44 = vand.u32 2147483647, %v11172_v5  ;;  %v8311_v19 = vand.u32 31, %v8033_v48 }
 0x1e2   : > { %v1853_v45 = vsel %vm1851_vm9, %v11171_v32, %v8209_v12  ;;  %vm1104_vm7 = vweird.f32 %v7321_v7  ;;  %vm1106_vm10 = vcmp.lt.s32.totalorder %v8196_v41, 2  ;;  %vm1107_vm14 = vcmp.eq.s32.totalorder %v8196_v41, 0 }
 0x1e3   : > { %v8307_v54 = vsel %vm1847_vm12, %v1850_v51, %v1853_v45  ;;  %vm1110_vm1 = vcmp.eq.s32.totalorder %v8196_v41, 2  ;;  %v1195_v40 = vand.u32 2147483647, %v1194_v27  ;;  %v1197_v26 = vcvt.s32.f32 %v1190_v20  ;;  %v6315_v12 = vpop.eup %6314  ;;  %v11177_v45 = vld [vmem:[#allocation33_spill] sm:$0xff] }
 0x1e4   : > { %v8317_v55 = vand.u32 3, %v1949_v23  ;;  %v8319_v34 = vand.u32 3, %v1204_v63  ;;  %v2064_v15 = vmul.f32 %v7681_v10, %v1335_v59  ;;  %v8324_v48 = vsel %vm589_vm4, nan, %v1438_v2  ;;  %v6317_v1 = vpop.eup %6316  ;;  %v11176_v2 = vld [vmem:[#allocation20_spill] sm:$0xff] }
 0x1e5   : > { %v2053_v22 = vadd.s32 3, %v1204_v63  ;;  %v1111_v16 = vxor.u32 2147483648, %v6315_v12  ;;  %v1198_v50 = vmul.f32 %v1197_v26, %v1195_v40  ;;  %v2244_v39 = vand.u32 8388607, %v2237_v44  ;;  %v11178_v26 = vld [vmem:[#allocation34_spill] sm:$0xff] }
 0x1e6   : > { %v2255_v21 = vshrl.u32 %v11108_v14, %v11174_v38  ;;  %v1108_v13 = vxor.u32 2147483648, %v6317_v1  ;;  %v2254_v3 = vshll.u32 %v11110_v33, %v11175_v49  ;;  %v2257_v17 = vshll.u32 %v11108_v14, %v11175_v49 }
 0x1e7   : > { %v2258_v58 = vshrl.u32 %v11109_v57, %v11174_v38  ;;  %v1112_v56 = vsel %vm1110_vm1, %v1111_v16, %v6317_v1  ;;  %v1199_v53 = vxor.u32 2147483648, %v1198_v50  ;;  %v1751_v37 = vsel %vm898_vm3, nan, %v1750_v31 }
 0x1e8   : > { %vm1952_vm4 = vcmp.eq.s32.totalorder %v8317_v55, 0  ;;  %v1109_v30 = vsel %vm1107_vm14, %v6315_v12, %v1108_v13  ;;  %vm1955_vm2 = vcmp.eq.s32.totalorder %v8317_v55, 2  ;;  %v2256_v47 = vor.u32 %v2255_v21, %v2254_v3  ;;  %v11180_v21 = vld [vmem:[#allocation15_spill] sm:$0xff] }
 0x1e9   : > { %v2259_v35 = vor.u32 %v2258_v58, %v2257_v17  ;;  %v1113_v6 = vsel %vm1106_vm10, %v1109_v30, %v1112_v56  ;;  %v1200_v42 = vsel %vm1117_vm0, %v1199_v53, %v1198_v50  ;;  %v2260_v23 = vshll.u32 %v11109_v57, %v11175_v49  ;;  %v8390_v58 = vld [vmem:[%s10763_s2] ss:$0 sm:$0xff] }
 0x1ea   : > { %v2261_v0 = vshrl.u32 %v11022_v52, %v11174_v38  ;;  %v1114_v31 = vsel %vm1104_vm7, nan, %v1113_v6  ;;  %v1203_v20 = vsel %vm8261_vm13, %v11144_v60, %v1200_v42  ;;  %v2245_v4 = vor.u32 8388608, %v2244_v39  ;;  %v11182_v42 = vld [vmem:[#allocation51_spill] sm:$0xff] }
 0x1eb   : > { %v2253_v41 = vshrl.u32 %v11110_v33, %v11174_v38  ;;  %v1230_v61 = vmul.f32 %v7681_v10, %v1114_v31  ;;  %6318 = vcosq.f32 %v1203_v20  ;;  %v1957_v51 = vsel %vm1955_vm2, %v1111_v16, %v6317_v1 }
 0x1ec   : > { %v2262_v59 = vor.u32 %v2261_v0, %v2260_v23  ;;  %6320 = vsinq.f32 %v1203_v20  ;;  %vm2269_vm3 = vcmp.lt.s32.totalorder %v11176_v2, 1  ;;  %vm2270_vm0 = vcmp.lt.s32.totalorder %v11176_v2, 2 }
 0x1ed   : > { %vm2271_vm15 = vcmp.lt.s32.totalorder %v11176_v2, 3  ;;  %2101 = vrot.lane.b32.xlu1 %v1230_v61, %s6410_s29  ;;  %v2277_v32 = vsel %vm2269_vm3, %v2256_v47, %v2259_v35  ;;  %v1954_v10 = vsel %vm1952_vm4, %v6315_v12, %v1108_v13  ;;  %v2285_v16 = vshll.u32 %v2245_v4, 8 }
 0x1ee   : > { %v2274_v36 = vsel %vm2272_vm6, %v2262_v59, 2102212464  ;;  %v2279_v27 = vsel %vm2271_vm15, %v2262_v59, %v11177_v45  ;;  %v2281_v63 = vsel %vm2269_vm3, %v2259_v35, %v2262_v59  ;;  %v2283_v1 = vsel %vm2271_vm15, %v11179_v29, %v11178_v26  ;;  %v11184_v29 = vld [vmem:[#allocation62_spill] sm:$0xff] }
 0x1ef   : > { %v2280_v40 = vsel %vm2270_vm0, %v2277_v32, %v2279_v27  ;;  %vm1213_vm13 = vcmp.eq.s32.totalorder %v8319_v34, 2  ;;  %v2273_v50 = vsel %vm2269_vm3, %v2253_v41, %v2256_v47  ;;  %v2275_v39 = vsel %vm2271_vm15, %v2259_v35, %v2274_v36  ;;  %v11181_v35 = vld [vmem:[#allocation47_spill] sm:$0xff] }
 0x1f0   : > { %v2284_v38 = vsel %vm2270_vm0, %v2281_v63, %v2283_v1  ;;  %v2340_v49 = vand.u32 2147483647, %v11180_v21  ;;  %vm1210_vm6 = vcmp.eq.s32.totalorder %v8319_v34, 0  ;;  %vm1209_vm11 = vcmp.lt.s32.totalorder %v8319_v34, 2  ;;  %v11183_v63 = vld [vmem:[#allocation50_spill] sm:$0xff] }
 0x1f1   : > { %v8378_v3 = vmul.u32.u64.low %v2285_v16, %v2284_v38  ;;  %v8379_v12 = vmul.u32.u64.high %v2285_v16, %v2284_v38, %v8378_v3  ;;  %v8381_v13 = vmul.u32.u64.low %v2285_v16, %v2280_v40  ;;  %v8382_v17 = vmul.u32.u64.high %v2285_v16, %v2280_v40, %v8381_v13  ;;  %2130 = vrot.lane.b32.xlu1 %v2064_v15, %s6411_s30 }
 0x1f2   : > { %v2066_v56 = vmul.f32 %v8390_v58, %v8249_v18  ;;  %v2068_v53 = vmul.f32 %v8390_v58, %v1751_v37  ;;  %vm1951_vm8 = vcmp.lt.s32.totalorder %v8317_v55, 2  ;;  %v8396_v30 = vand.u32 3, %v2053_v22 }
 0x1f3   : > { %vm1207_vm5 = vweird.f32 %v11144_v60  ;;  %v1958_v47 = vsel %vm1951_vm8, %v1954_v10, %v1957_v51  ;;  %v2276_v15 = vsel %vm2270_vm0, %v2273_v50, %v2275_v39  ;;  %v2357_v6 = vshll.u32 %v11110_v33, %v11181_v35 }
 0x1f4   : > { %v2358_v23 = vshrl.u32 %v11108_v14, %v11182_v42  ;;  %v2360_v18 = vshll.u32 %v11108_v14, %v11181_v35  ;;  %v2361_v55 = vshrl.u32 %v11109_v57, %v11182_v42  ;;  %v2363_v22 = vshll.u32 %v11109_v57, %v11181_v35  ;;  %v11187_v35 = vld [vmem:[#allocation59_spill] sm:$0xff] }
 0x1f5   : > { %v2364_v37 = vshrl.u32 %v11022_v52, %v11182_v42  ;;  %vm2294_vm9 = vc.u32 %v8379_v12, %v8381_v13  ;;  %v2295_v0 = vadd.s32 1, %v8382_v17  ;;  %v2347_v31 = vand.u32 8388607, %v2340_v49  ;;  %v6319_v4 = vpop.eup %6318  ;;  %2134 = vrot.lane.b32.xlu1 %v2066_v56, %s6411_s30 }
 0x1f6   : > { %v2359_v20 = vor.u32 %v2358_v23, %v2357_v6  ;;  %vm2056_vm12 = vcmp.eq.s32.totalorder %v8396_v30, 0  ;;  %v2292_v41 = vmul.u32 %v2285_v16, %v2276_v15  ;;  %v2362_v61 = vor.u32 %v2361_v55, %v2360_v18  ;;  %v6321_v59 = vpop.eup %6320  ;;  %v11186_v15 = vld [vmem:[#allocation63_spill] sm:$0xff] }
 0x1f7   : > { %v2365_v51 = vor.u32 %v2364_v37, %v2363_v22  ;;  %v1214_v2 = vxor.u32 2147483648, %v6319_v4  ;;  %v1959_v36 = vsel %vm1104_vm7, nan, %v1958_v47  ;;  %vm2059_vm10 = vcmp.eq.s32.totalorder %v8396_v30, 2 }
 0x1f8   : > { %v2296_v32 = vsel %vm2294_vm9, %v2295_v0, %v8382_v17  ;;  %v1211_v45 = vxor.u32 2147483648, %v6321_v59  ;;  %vm2372_vm14 = vcmp.lt.s32.totalorder %v11183_v63, 1  ;;  %vm2374_vm1 = vcmp.lt.s32.totalorder %v11183_v63, 3 }
 0x1f9   : > { %v2297_v27 = vadd.s32 %v2296_v32, %v2292_v41  ;;  %v1215_v10 = vsel %vm1213_vm13, %v1214_v2, %v6321_v59  ;;  %v2348_v40 = vor.u32 8388608, %v2347_v31  ;;  %v2380_v26 = vsel %vm2372_vm14, %v2359_v20, %v2362_v61  ;;  %2138 = vrot.lane.b32.xlu1 %v2068_v53, %s6411_s30 }
 0x1fa   : > { %v2382_v7 = vsel %vm2374_vm1, %v2365_v51, %v11184_v29  ;;  %v1212_v1 = vsel %vm1210_vm6, %v6319_v4, %v1211_v45  ;;  %v2070_v16 = vmul.f32 %v8390_v58, %v1959_v36  ;;  %v2356_v39 = vshrl.u32 %v11110_v33, %v11182_v42 }
 0x1fb   : > { %v2298_v50 = vadd.s32 536870912, %v2297_v27  ;;  %v1216_v38 = vsel %vm1209_vm11, %v1212_v1, %v1215_v10  ;;  %vm2373_vm7 = vcmp.lt.s32.totalorder %v11183_v63, 2  ;;  %vm11185_vm4 = vcmp.lt.s32.totalorder %v11183_v63, 4 }
 0x1fc   : > { %v2377_v3 = vsel %vm11185_vm4, %v2365_v51, 2102212464  ;;  %v2384_v17 = vsel %vm2372_vm14, %v2362_v61, %v2365_v51  ;;  %v1217_v56 = vsel %vm1207_vm5, nan, %v1216_v38  ;;  %v2383_v47 = vsel %vm2373_vm7, %v2380_v26, %v2382_v7  ;;  %v11191_v26 = vld [vmem:[#allocation80_spill] sm:$0xff] }
 0x1fd   : > { %v8448_v53 = vshrl.u32 %v2298_v50, 30  ;;  %v2386_v34 = vsel %vm2374_vm1, %v11187_v35, %v11186_v15  ;;  %v1231_v6 = vmul.f32 %v8390_v58, %v1217_v56  ;;  %v2376_v42 = vsel %vm2372_vm14, %v2356_v39, %v2359_v20  ;;  %2142 = vrot.lane.b32.xlu1 %v2070_v16, %s6411_s30 }
 0x1fe   : > { %v2387_v23 = vsel %vm2373_vm7, %v2384_v17, %v2386_v34  ;;  %v2388_v18 = vshll.u32 %v2348_v40, 8  ;;  %v2058_v55 = vsel %vm2056_vm12, %v6319_v4, %v1211_v45  ;;  %v2061_v22 = vsel %vm2059_vm10, %v1214_v2, %v6321_v59  ;;  %v11189_v2 = vld [vmem:[#allocation31_spill] sm:$0xff] }
 0x1ff   : > { %v2300_v37 = vshll.u32 %v8448_v53, 30  ;;  %v2378_v0 = vsel %vm2374_vm1, %v2362_v61, %v2377_v3  ;;  %2103 = vrot.lane.b32.xlu0 %v1231_v6, %s6410_s29  ;;  %vm11188_vm2 = vweird.f32 %v11131_v11  ;;  %vm2055_vm3 = vcmp.lt.s32.totalorder %v8396_v30, 2 }
 0x200   : > { %v8470_v31 = vmul.u32.u64.low %v2388_v18, %v2387_v23  ;;  %v8471_v20 = vmul.u32.u64.high %v2388_v18, %v2387_v23, %v8470_v31  ;;  %v8473_v41 = vmul.u32.u64.low %v2388_v18, %v2383_v47  ;;  %v8474_v51 = vmul.u32.u64.high %v2388_v18, %v2383_v47, %v8473_v41 }
 0x201   : > { %v1855_v4 = vsel %vm11188_vm2, nan, %v8307_v54  ;;  %v8481_v59 = vsub.s32 %v2297_v27, %v2300_v37  ;;  %v2443_v36 = vand.u32 2147483647, %v11189_v2  ;;  %v8485_v61 = vsub.s32 32, %v8311_v19  ;;  %v11190_v27 = vld [vmem:[#allocation85_spill] sm:$0xff]  ;;  %v11196_v31 = vld [vmem:[#allocation102_spill] sm:$0xff] }
 0x202   : > { %v2065_v32 = vmul.f32 %v8390_v58, %v8324_v48  ;;  %v2062_v45 = vsel %vm2055_vm3, %v2058_v55, %v2061_v22  ;;  %v2379_v10 = vsel %vm2373_vm7, %v2376_v42, %v2378_v0  ;;  %v8493_v11 = vshll.u32 %v11022_v52, %v8311_v19  ;;  %v11194_v55 = vld [vmem:[#allocation89_spill] sm:$0xff] }
 0x203   : > { %v2067_v54 = vmul.f32 %v8390_v58, %v8277_v43  ;;  %v2303_v30 = vsub.s32 0, %v8481_v59  ;;  %v2461_v40 = vshrl.u32 %v11108_v14, %v11190_v27  ;;  %v2069_v48 = vmul.f32 %v8390_v58, %v1855_v4 }
 0x204   : > { %2132 = vrot.lane.b32.xlu0 %v2065_v32, %s6411_s30  ;;  %vm2397_vm0 = vc.u32 %v8471_v20, %v8473_v41  ;;  %v2398_v63 = vadd.s32 1, %v8474_v51  ;;  %v2460_v29 = vshll.u32 %v11110_v33, %v11191_v26  ;;  %v2063_v43 = vsel %vm1207_vm5, nan, %v2062_v45 }
 0x205   : > { %v6029_v7 = vmin.u32 %v2303_v30, %v8481_v59  ;;  %v2395_v1 = vmul.u32 %v2388_v18, %v2379_v10  ;;  %v2450_v16 = vand.u32 8388607, %v2443_v36  ;;  %v2463_v38 = vshll.u32 %v11108_v14, %v11191_v26 }
 0x206   : > { %v2399_v50 = vsel %vm2397_vm0, %v2398_v63, %v8474_v51  ;;  %v2462_v39 = vor.u32 %v2461_v40, %v2460_v29  ;;  %v2464_v3 = vshrl.u32 %v11109_v57, %v11190_v27  ;;  %v2466_v60 = vshll.u32 %v11109_v57, %v11191_v26  ;;  %v11197_v51 = vld [vmem:[#allocation95_spill] sm:$0xff] }
 0x207   : > { %v2305_v17 = vclz %v6029_v7  ;;  %v2400_v56 = vadd.s32 %v2399_v50, %v2395_v1  ;;  %v2467_v47 = vshrl.u32 %v11022_v52, %v11190_v27  ;;  %vm8524_vm15 = vcmp.le.f32.partialorder %v2237_v44, 0.7853982 }
 0x208   : > { %2136 = vrot.lane.b32.xlu0 %v2067_v54, %s6411_s30  ;;  %vm2239_vm13 = vcmp.lt.s32.totalorder %v11172_v5, 0  ;;  %v2293_v35 = vadd.s32 %v8381_v13, %v8379_v12  ;;  %v2323_v34 = vsub.s32 4, %v8448_v53  ;;  %v2465_v6 = vor.u32 %v2464_v3, %v2463_v38  ;;  %v11195_v12 = vld [vmem:[#allocation99_spill] sm:$0xff] }
 0x209   : > { %v6030_v42 = vadd.s32 4294967294, %v2305_v17  ;;  %v2401_v23 = vadd.s32 536870912, %v2400_v56  ;;  %v2468_v18 = vor.u32 %v2467_v47, %v2466_v60  ;;  %vm2475_vm6 = vcmp.lt.s32.totalorder %v11194_v55, 1 }
 0x20a   : > { %v2071_v22 = vmul.f32 %v8390_v58, %v2063_v43  ;;  %v2451_v37 = vor.u32 8388608, %v2450_v16  ;;  %vm2477_vm11 = vcmp.lt.s32.totalorder %v11194_v55, 3  ;;  %v2483_v44 = vsel %vm2475_vm6, %v2462_v39, %v2465_v6 }
 0x20b   : > { %vm6031_vm8 = vcmp.lt.s32.totalorder %v6030_v42, 0  ;;  %v8537_v0 = vshrl.u32 %v2401_v23, 30  ;;  %v2485_v13 = vsel %vm2477_vm11, %v2468_v18, %v11195_v12  ;;  %v2489_v4 = vsel %vm2477_vm11, %v11197_v51, %v11196_v31 }
 0x20c   : > { %2140 = vrot.lane.b32.xlu0 %v2069_v48, %s6411_s30  ;;  %v2308_v32 = vsel %vm6031_vm8, 0, %v6030_v42  ;;  %v2324_v45 = vsel %vm2239_vm13, %v2323_v34, %v8448_v53  ;;  %vm2476_vm5 = vcmp.lt.s32.totalorder %v11194_v55, 2  ;;  %v2487_v10 = vsel %vm2475_vm6, %v2465_v6, %v2468_v18 }
 0x20d   : > { %v2309_v54 = vsub.s32 32, %v2308_v32  ;;  %v2313_v30 = vsub.s32 4294967266, %v2308_v32  ;;  %v2403_v40 = vshll.u32 %v8537_v0, 30  ;;  %vm11198_vm9 = vcmp.lt.s32.totalorder %v11194_v55, 4 }
 0x20e   : > { %v2480_v63 = vsel %vm11198_vm9, %v2468_v18, 2102212464  ;;  %v2459_v48 = vshrl.u32 %v11110_v33, %v11190_v27  ;;  %v2486_v26 = vsel %vm2476_vm5, %v2483_v44, %v2485_v13  ;;  %v2490_v53 = vsel %vm2476_vm5, %v2487_v10, %v2489_v4 }
 0x20f   : > { %v2491_v29 = vshll.u32 %v2451_v37, 8  ;;  %v2310_v43 = vshll.u32 %v8481_v59, %v2308_v32  ;;  %v2311_v7 = vshrl.u32 %v2293_v35, %v2309_v54  ;;  %v2314_v1 = vadd.s32 127, %v2313_v30  ;;  %v11202_v54 = vld [vmem:[#allocation29_spill] sm:$0xff] }
 0x210   : > { %v8563_v16 = vsub.s32 %v2400_v56, %v2403_v40  ;;  %2144 = vrot.lane.b32.xlu0 %v2071_v22, %s6411_s30  ;;  %v2479_v50 = vsel %vm2475_vm6, %v2459_v48, %v2462_v39  ;;  %v2481_v27 = vsel %vm2477_vm11, %v2465_v6, %v2480_v63  ;;  %v8575_v59 = vsel %vm8524_vm15, 0, %v2324_v45  ;;  %v11200_v22 = vld [vmem:[#allocation13_spill] sm:$0xff] }
 0x211   : > { %v8570_v38 = vmul.u32.u64.low %v2491_v29, %v2490_v53  ;;  %v8571_v3 = vmul.u32.u64.high %v2491_v29, %v2490_v53, %v8570_v38  ;;  %v2312_v17 = vor.u32 %v2311_v7, %v2310_v43  ;;  %v2315_v60 = vshll.u32 %v2314_v1, 23 }
 0x212   : > { %v2406_v56 = vsub.s32 0, %v8563_v16  ;;  %v11199_v47 = vmov 920167782   ;;  %v8586_v34 = vmul.u32.u64.low %v2491_v29, %v2486_v26  ;;  %v8587_v6 = vmul.u32.u64.high %v2491_v29, %v2486_v26, %v8586_v34  ;;  %v11203_v26 = vld [vmem:[#allocation25_spill] sm:$0xff] }
 0x213   : > { %v8580_v35 = vshrl.u32 %v11199_v47, %v8485_v61  ;;  %v8584_v39 = vshll.u32 %v11199_v47, %v8311_v19  ;;  %v2316_v42 = vor.u32 4788187, %v2315_v60  ;;  %v2482_v18 = vsel %vm2476_vm5, %v2479_v50, %v2481_v27 }
 0x214   : > { %v6033_v23 = vmin.u32 %v2406_v56, %v8563_v16  ;;  %v2546_v37 = vand.u32 2147483647, %v11200_v22  ;;  %v11201_v44 = vmov 1326507024   ;;  %v8599_v13 = vand.u32 3, %v8575_v59 }
 0x215   : > { %v8596_v12 = vshrl.u32 %v11201_v44, %v8485_v61  ;;  %vm2342_vm12 = vcmp.lt.s32.totalorder %v11180_v21, 0  ;;  %v2396_v31 = vadd.s32 %v8473_v41, %v8471_v20  ;;  %v2317_v51 = vand.u32 2147483647, %v2316_v42 }
 0x216   : > { %v2319_v4 = vcvt.s32.f32 %v2312_v17  ;;  %v2408_v32 = vclz %v6033_v23  ;;  %vm2500_vm10 = vc.u32 %v8571_v3, %v8586_v34  ;;  %v2426_v55 = vsub.s32 4, %v8537_v0 }
 0x217   : > { %v2498_v45 = vmul.u32 %v2491_v29, %v2482_v18  ;;  %v2501_v10 = vadd.s32 1, %v8587_v6  ;;  %v2564_v30 = vshrl.u32 %v11108_v14, %v11202_v54  ;;  %v2553_v48 = vand.u32 8388607, %v2546_v37 }
 0x218   : > { %v2320_v40 = vmul.f32 %v2319_v4, %v2317_v51  ;;  %v6034_v63 = vadd.s32 4294967294, %v2408_v32  ;;  %v2567_v20 = vshrl.u32 %v11109_v57, %v11202_v54  ;;  %v2563_v53 = vshll.u32 %v11110_v33, %v11203_v26  ;;  %v11206_v32 = vld [vmem:[#allocation35_spill] sm:$0xff] }
 0x219   : > { %v2502_v41 = vsel %vm2500_vm10, %v2501_v10, %v8587_v6  ;;  %v2566_v29 = vshll.u32 %v11108_v14, %v11203_v26  ;;  %v2570_v43 = vshrl.u32 %v11022_v52, %v11202_v54  ;;  %v2569_v50 = vshll.u32 %v11109_v57, %v11203_v26 }
 0x21a   : > { %v2321_v7 = vxor.u32 2147483648, %v2320_v40  ;;  %vm6035_vm14 = vcmp.lt.s32.totalorder %v6034_v63, 0  ;;  %v2503_v1 = vadd.s32 %v2502_v41, %v2498_v45  ;;  %v2427_v38 = vsel %vm2342_vm12, %v2426_v55, %v8537_v0 }
 0x21b   : > { %v2411_v27 = vsel %vm6035_vm14, 0, %v6034_v63  ;;  %v2565_v17 = vor.u32 %v2564_v30, %v2563_v53  ;;  %v2568_v60 = vor.u32 %v2567_v20, %v2566_v29  ;;  %vm8630_vm1 = vcmp.le.f32.partialorder %v2340_v49, 0.7853982  ;;  %v11209_v29 = vld [vmem:[#allocation45_spill] sm:$0xff] }
 0x21c   : > { %v2322_v56 = vsel %vm2239_vm13, %v2321_v7, %v2320_v40  ;;  %v2412_v42 = vsub.s32 32, %v2411_v27  ;;  %v2416_v23 = vsub.s32 4294967266, %v2411_v27  ;;  %v2571_v18 = vor.u32 %v2570_v43, %v2569_v50  ;;  %v11210_v43 = vld [vmem:[#allocation37_spill] sm:$0xff] }
 0x21d   : > { %v2325_v51 = vsel %vm8524_vm15, %v11172_v5, %v2322_v56  ;;  %v2504_v4 = vadd.s32 536870912, %v2503_v1  ;;  %v2554_v0 = vor.u32 8388608, %v2553_v48  ;;  %vm2578_vm7 = vcmp.lt.s32.totalorder %v11206_v32, 1  ;;  %v11208_v48 = vld [vmem:[#allocation43_spill] sm:$0xff] }
 0x21e   : > { %6322 = vcosq.f32 %v2325_v51  ;;  %v2413_v55 = vshll.u32 %v8563_v16, %v2411_v27  ;;  %v2414_v45 = vshrl.u32 %v2396_v31, %v2412_v42  ;;  %v2417_v10 = vadd.s32 127, %v2416_v23 }
 0x21f   : > { %6324 = vsinq.f32 %v2325_v51  ;;  %v8639_v49 = vshrl.u32 %v2504_v4, 30  ;;  %vm2580_vm4 = vcmp.lt.s32.totalorder %v11206_v32, 3  ;;  %v2586_v30 = vsel %vm2578_vm7, %v2565_v17, %v2568_v60 }
 0x220   : > { %v2415_v40 = vor.u32 %v2414_v45, %v2413_v55  ;;  %v2418_v15 = vshll.u32 %v2417_v10, 23  ;;  %vm11207_vm2 = vcmp.lt.s32.totalorder %v11206_v32, 4  ;;  %v2588_v20 = vsel %vm2580_vm4, %v2571_v18, %v11208_v48 }
 0x221   : > { %v2583_v63 = vsel %vm11207_vm2, %v2571_v18, 2102212464  ;;  %v2506_v16 = vshll.u32 %v8639_v49, 30  ;;  %v2562_v31 = vshrl.u32 %v11110_v33, %v11202_v54  ;;  %vm2579_vm3 = vcmp.lt.s32.totalorder %v11206_v32, 2  ;;  %v11211_v32 = vld [vmem:[#allocation58_spill] sm:$0xff] }
 0x222   : > { %v2590_v41 = vsel %vm2578_vm7, %v2568_v60, %v2571_v18  ;;  %v2419_v26 = vor.u32 4788187, %v2418_v15  ;;  %v2589_v53 = vsel %vm2579_vm3, %v2586_v30, %v2588_v20  ;;  %v2592_v7 = vsel %vm2580_vm4, %v11210_v43, %v11209_v29 }
 0x223   : > { %v2594_v50 = vshll.u32 %v2554_v0, 8  ;;  %v8661_v27 = vsub.s32 %v2503_v1, %v2506_v16  ;;  %v2582_v54 = vsel %vm2578_vm7, %v2562_v31, %v2565_v17  ;;  %v2584_v56 = vsel %vm2580_vm4, %v2568_v60, %v2583_v63 }
 0x224   : > { %v2593_v42 = vsel %vm2579_vm3, %v2590_v41, %v2592_v7  ;;  %v2420_v23 = vand.u32 2147483647, %v2419_v26  ;;  %v2422_v18 = vcvt.s32.f32 %v2415_v40  ;;  %v8674_v55 = vsel %vm8630_vm1, 0, %v2427_v38 }
 0x225   : > { %v8669_v51 = vmul.u32.u64.low %v2594_v50, %v2593_v42  ;;  %v8670_v4 = vmul.u32.u64.high %v2594_v50, %v2593_v42, %v8669_v51  ;;  %v2509_v1 = vsub.s32 0, %v8661_v27  ;;  %v8683_v17 = vor.u32 %v8580_v35, %v8493_v11 }
 0x226   : > { %v8677_v0 = vmul.u32.u64.low %v2594_v50, %v2589_v53  ;;  %v8678_v45 = vmul.u32.u64.high %v2594_v50, %v2589_v53, %v8677_v0  ;;  %v2886_v60 = vor.u32 %v8596_v12, %v8584_v39  ;;  %vm2329_vm0 = vweird.f32 %v11172_v5  ;;  %v11212_v51 = vld [vmem:[#allocation113_spill] sm:$0xff] }
 0x227   : > { %v2423_v10 = vmul.f32 %v2422_v18, %v2420_v23  ;;  %vm2331_vm15 = vcmp.lt.s32.totalorder %v8599_v13, 2  ;;  %vm2332_vm13 = vcmp.eq.s32.totalorder %v8599_v13, 0  ;;  %v6037_v38 = vmin.u32 %v2509_v1, %v8661_v27 }
 0x228   : > { %v2585_v30 = vsel %vm2579_vm3, %v2582_v54, %v2584_v56  ;;  %v8693_v40 = vpop.eup %6322  ;;  %vm2335_vm6 = vcmp.eq.s32.totalorder %v8599_v13, 2  ;;  %v8697_v35 = vand.u32 3, %v8674_v55  ;;  %vm2603_vm11 = vc.u32 %v8670_v4, %v8677_v0 }
 0x229   : > { %v2424_v11 = vxor.u32 2147483648, %v2423_v10  ;;  %v8701_v15 = vpop.eup %6324  ;;  %v10957_v63 = vxor.u32 2147483648, %v8693_v40  ;;  %v2511_v48 = vclz %v6037_v38  ;;  %v2604_v20 = vadd.s32 1, %v8678_v45 }
 0x22a   : > { %v2649_v16 = vand.u32 2147483647, %v11211_v32  ;;  %v10958_v31 = vxor.u32 2147483648, %v8701_v15  ;;  %v2499_v26 = vadd.s32 %v8586_v34, %v8571_v3  ;;  %v2601_v53 = vmul.u32 %v2594_v50, %v2585_v30  ;;  %v11213_v30 = vld [vmem:[#allocation110_spill] sm:$0xff] }
 0x22b   : > { %v2425_v41 = vsel %vm2342_vm12, %v2424_v11, %v2423_v10  ;;  %v2337_v29 = vsel %vm2335_vm6, %v10957_v63, %v8701_v15  ;;  %vm2445_vm8 = vcmp.lt.s32.totalorder %v11189_v2, 0  ;;  %v6038_v7 = vadd.s32 4294967294, %v2511_v48 }
 0x22c   : > { %v2428_v43 = vsel %vm8630_vm1, %v11180_v21, %v2425_v41  ;;  %v2605_v54 = vsel %vm2603_vm11, %v2604_v20, %v8678_v45  ;;  %v2334_v3 = vsel %vm2332_vm13, %v8693_v40, %v10958_v31  ;;  %v2529_v34 = vsub.s32 4, %v8639_v49 }
 0x22d   : > { %6326 = vcosq.f32 %v2428_v43  ;;  %v2606_v50 = vadd.s32 %v2605_v54, %v2601_v53  ;;  %v2338_v56 = vsel %vm2331_vm15, %v2334_v3, %v2337_v29  ;;  %vm6039_vm5 = vcmp.lt.s32.totalorder %v6038_v7, 0 }
 0x22e   : > { %6328 = vsinq.f32 %v2428_v43  ;;  %v2656_v6 = vand.u32 8388607, %v2649_v16  ;;  %v2339_v42 = vsel %vm2329_vm0, nan, %v2338_v56  ;;  %v2514_v23 = vsel %vm6039_vm5, 0, %v6038_v7 }
 0x22f   : > { %v2607_v18 = vadd.s32 536870912, %v2606_v50  ;;  %v2667_v1 = vshrl.u32 %v11108_v14, %v11212_v51  ;;  %v3061_v45 = vmul.f32 %v8390_v58, %v2339_v42  ;;  %v2515_v10 = vsub.s32 32, %v2514_v23 }
 0x230   : > { %v2519_v38 = vsub.s32 4294967266, %v2514_v23  ;;  %v2666_v13 = vshll.u32 %v11110_v33, %v11213_v30  ;;  %v2516_v11 = vshll.u32 %v8661_v27, %v2514_v23  ;;  %v2669_v20 = vshll.u32 %v11108_v14, %v11213_v30 }
 0x231   : > { %v8737_v48 = vshrl.u32 %v2607_v18, 30  ;;  %v2670_v41 = vshrl.u32 %v11109_v57, %v11212_v51  ;;  %3950 = vrot.lane.b32.xlu1 %v3061_v45, %s6412_s6  ;;  %v2517_v53 = vshrl.u32 %v2499_v26, %v2515_v10  ;;  %v2672_v43 = vshll.u32 %v11109_v57, %v11213_v30 }
 0x232   : > { %v2520_v29 = vadd.s32 127, %v2519_v38  ;;  %v2673_v7 = vshrl.u32 %v11022_v52, %v11212_v51  ;;  %vm2434_vm9 = vcmp.lt.s32.totalorder %v8697_v35, 2  ;;  %v2668_v54 = vor.u32 %v2667_v1, %v2666_v13 }
 0x233   : > { %v2609_v27 = vshll.u32 %v8737_v48, 30  ;;  %v2671_v3 = vor.u32 %v2670_v41, %v2669_v20  ;;  %vm2432_vm12 = vweird.f32 %v11180_v21  ;;  %vm2435_vm10 = vcmp.eq.s32.totalorder %v8697_v35, 0 }
 0x234   : > { %v2518_v56 = vor.u32 %v2517_v53, %v2516_v11  ;;  %v2521_v42 = vshll.u32 %v2520_v29, 23  ;;  %v2674_v26 = vor.u32 %v2673_v7, %v2672_v43  ;;  %vm2438_vm14 = vcmp.eq.s32.totalorder %v8697_v35, 2 }
 0x235   : > { %v2530_v23 = vsel %vm2445_vm8, %v2529_v34, %v8639_v49  ;;  %v8756_v18 = vsub.s32 %v2606_v50, %v2609_v27  ;;  %v2665_v45 = vshrl.u32 %v11110_v33, %v11212_v51  ;;  %vm8762_vm1 = vcmp.le.f32.partialorder %v2443_v36, 0.7853982 }
 0x236   : > { %v2522_v10 = vor.u32 4788187, %v2521_v42  ;;  %v2657_v38 = vor.u32 8388608, %v2656_v6  ;;  %vm2681_vm7 = vcmp.lt.s32.totalorder %v7337_v28, 1  ;;  %vm2683_vm4 = vcmp.lt.s32.totalorder %v7337_v28, 3 }
 0x237   : > { %v8768_v30 = vpop.eup %6326  ;;  %v2612_v49 = vsub.s32 0, %v8756_v18  ;;  %v2632_v34 = vsub.s32 4, %v8737_v48  ;;  %v2689_v50 = vsel %vm2681_vm7, %v2668_v54, %v2671_v3  ;;  %v2691_v36 = vsel %vm2683_vm4, %v2674_v26, %v8157_v24 }
 0x238   : > { %v8777_v51 = vpop.eup %6328  ;;  %v10955_v6 = vxor.u32 2147483648, %v8768_v30  ;;  %v2523_v13 = vand.u32 2147483647, %v2522_v10  ;;  %v2525_v11 = vcvt.s32.f32 %v2518_v56  ;;  %vm2682_vm2 = vcmp.lt.s32.totalorder %v7337_v28, 2 }
 0x239   : > { %v10956_v20 = vxor.u32 2147483648, %v8777_v51  ;;  %v6041_v41 = vmin.u32 %v2612_v49, %v8756_v18  ;;  %v2685_v53 = vsel %vm2681_vm7, %v2665_v45, %v2668_v54  ;;  %vm11216_vm3 = vcmp.lt.s32.totalorder %v7337_v28, 4 }
 0x23a   : > { %v2686_v29 = vsel %vm11216_vm3, %v2674_v26, 2102212464  ;;  %v2440_v24 = vsel %vm2438_vm14, %v10955_v6, %v8777_v51  ;;  %v2526_v43 = vmul.f32 %v2525_v11, %v2523_v13  ;;  %v2692_v7 = vsel %vm2682_vm2, %v2689_v50, %v2691_v36 }
 0x23b   : > { %v2693_v27 = vsel %vm2681_vm7, %v2671_v3, %v2674_v26  ;;  %v2437_v54 = vsel %vm2435_vm10, %v8768_v30, %v10956_v20  ;;  %v2614_v56 = vclz %v6041_v41  ;;  %v2695_v42 = vsel %vm2683_vm4, %v7896_v25, %v8164_v62 }
 0x23c   : > { %v2697_v45 = vshll.u32 %v2657_v38, 8  ;;  %v2441_v10 = vsel %vm2434_vm9, %v2437_v54, %v2440_v24  ;;  %v2527_v49 = vxor.u32 2147483648, %v2526_v43  ;;  %v2687_v26 = vsel %vm2683_vm4, %v2671_v3, %v2686_v29 }
 0x23d   : > { %v2696_v50 = vsel %vm2682_vm2, %v2693_v27, %v2695_v42  ;;  %v2442_v36 = vsel %vm2432_vm12, nan, %v2441_v10  ;;  %v6042_v13 = vadd.s32 4294967294, %v2614_v56  ;;  %vm8821_vm15 = vcmp.le.f32.partialorder %v2546_v37, 0.7853982  ;;  %v11219_v56 = vld [vmem:[#allocation24_spill] sm:$0xff] }
 0x23e   : > { %v8813_v11 = vmul.u32.u64.low %v2697_v45, %v2696_v50  ;;  %v8814_v41 = vmul.u32.u64.high %v2697_v45, %v2696_v50, %v8813_v11  ;;  %v3062_v25 = vmul.f32 %v8390_v58, %v2442_v36  ;;  %v2528_v62 = vsel %vm2445_vm8, %v2527_v49, %v2526_v43  ;;  %v11221_v36 = vld [vmem:[#allocation66_spill] sm:$0xff] }
 0x23f   : > { %v8825_v3 = vmul.u32.u64.low %v2697_v45, %v2692_v7  ;;  %v8826_v38 = vmul.u32.u64.high %v2697_v45, %v2692_v7, %v8825_v3  ;;  %v2531_v29 = vsel %vm8762_vm1, %v11189_v2, %v2528_v62  ;;  %v8834_v24 = vsel %vm8762_vm1, 0, %v2530_v23 }
 0x240   : > { %vm2548_vm13 = vcmp.lt.s32.totalorder %v11200_v22, 0  ;;  %vm6043_vm6 = vcmp.lt.s32.totalorder %v6042_v13, 0  ;;  %3952 = vrot.lane.b32.xlu0 %v3062_v25, %s6412_s6  ;;  %6330 = vcosq.f32 %v2531_v29  ;;  %v2602_v37 = vadd.s32 %v8677_v0, %v8670_v4 }
 0x241   : > { %v2617_v43 = vsel %vm6043_vm6, 0, %v6042_v13  ;;  %v2688_v7 = vsel %vm2682_vm2, %v2685_v53, %v2687_v26  ;;  %6332 = vsinq.f32 %v2531_v29  ;;  %v10961_v1 = vand.u32 2147483647, %v11219_v56  ;;  %v11220_v26 = vld [vmem:[#allocation67_spill] sm:$0xff] }
 0x242   : > { %v2618_v27 = vsub.s32 32, %v2617_v43  ;;  %v2622_v54 = vsub.s32 4294967266, %v2617_v43  ;;  %v2536_v23 = vand.u32 3, %v8834_v24  ;;  %v2633_v42 = vsel %vm2548_vm13, %v2632_v34, %v8737_v48 }
 0x243   : > { %vm2706_vm11 = vc.u32 %v8814_v41, %v8825_v3  ;;  %v2707_v4 = vadd.s32 1, %v8826_v38  ;;  %v2619_v0 = vshll.u32 %v8756_v18, %v2617_v43  ;;  %v2704_v10 = vmul.u32 %v2697_v45, %v2688_v7 }
 0x244   : > { %v2620_v28 = vshrl.u32 %v2602_v37, %v2618_v27  ;;  %v2623_v53 = vadd.s32 127, %v2622_v54  ;;  %v2770_v50 = vshrl.u32 %v11108_v14, %v11220_v26  ;;  %v2772_v13 = vshll.u32 %v11108_v14, %v11221_v36 }
 0x245   : > { %v2708_v49 = vsel %vm2706_vm11, %v2707_v4, %v8826_v38  ;;  %v2773_v48 = vshrl.u32 %v11109_v57, %v11220_v26  ;;  %v2759_v18 = vand.u32 8388607, %v10961_v1  ;;  %vm2537_vm8 = vcmp.lt.s32.totalorder %v2536_v23, 2 }
 0x246   : > { %v2621_v34 = vor.u32 %v2620_v28, %v2619_v0  ;;  %v2624_v11 = vshll.u32 %v2623_v53, 23  ;;  %v2709_v25 = vadd.s32 %v2708_v49, %v2704_v10  ;;  %v2769_v45 = vshll.u32 %v11110_v33, %v11221_v36  ;;  %v11222_v53 = vld [vmem:[#allocation70_spill] sm:$0xff] }
 0x247   : > { %v2774_v62 = vor.u32 %v2773_v48, %v2772_v13  ;;  %v2775_v38 = vshll.u32 %v11109_v57, %v11221_v36  ;;  %v2776_v29 = vshrl.u32 %v11022_v52, %v11220_v26  ;;  %vm2535_vm5 = vweird.f32 %v11189_v2  ;;  %v11223_v13 = vld [vmem:[#allocation86_spill] sm:$0xff]  ;;  %v11224_v48 = vld [vmem:[#allocation79_spill] sm:$0xff] }
 0x248   : > { %vm2538_vm9 = vcmp.eq.s32.totalorder %v2536_v23, 0  ;;  %v2625_v37 = vor.u32 4788187, %v2624_v11  ;;  %v8869_v43 = vsel %vm8821_vm15, 0, %v2633_v42  ;;  %v2710_v7 = vadd.s32 536870912, %v2709_v25 }
 0x249   : > { %vm2541_vm10 = vcmp.eq.s32.totalorder %v2536_v23, 2  ;;  %v2628_v27 = vcvt.s32.f32 %v2621_v34  ;;  %v2771_v54 = vor.u32 %v2770_v50, %v2769_v45  ;;  %v2777_v4 = vor.u32 %v2776_v29, %v2775_v38 }
 0x24a   : > { %v2626_v0 = vand.u32 2147483647, %v2625_v37  ;;  %v8871_v28 = vshrl.u32 %v2710_v7, 30  ;;  %vm2784_vm14 = vcmp.lt.s32.totalorder %v11222_v53, 1  ;;  %vm2786_vm1 = vcmp.lt.s32.totalorder %v11222_v53, 3  ;;  %v8875_v10 = vpop.eup %6330  ;;  %v11225_v7 = vld [vmem:[#allocation83_spill] sm:$0xff] }
 0x24b   : > { %v8878_v49 = vand.u32 3, %v8869_v43  ;;  %v2760_v36 = vor.u32 8388608, %v2759_v18  ;;  %v2796_v42 = vsel %vm2784_vm14, %v2774_v62, %v2777_v4  ;;  %v2798_v50 = vsel %vm2786_vm1, %v11224_v48, %v11223_v13  ;;  %v8886_v34 = vpop.eup %6332 }
 0x24c   : > { %v10959_v11 = vxor.u32 2147483648, %v8875_v10  ;;  %v2629_v45 = vmul.f32 %v2628_v27, %v2626_v0  ;;  %v2712_v38 = vshll.u32 %v8871_v28, 30  ;;  %v2768_v29 = vshrl.u32 %v11110_v33, %v11220_v26 }
 0x24d   : > { %v10960_v18 = vxor.u32 2147483648, %v8886_v34  ;;  %vm2785_vm7 = vcmp.lt.s32.totalorder %v11222_v53, 2  ;;  %v2792_v37 = vsel %vm2784_vm14, %v2771_v54, %v2774_v62  ;;  %v2794_v13 = vsel %vm2786_vm1, %v2777_v4, %v11225_v7 }
 0x24e   : > { %v2543_v27 = vsel %vm2541_vm10, %v10959_v11, %v8886_v34  ;;  %v2630_v0 = vxor.u32 2147483648, %v2629_v45  ;;  %v8903_v48 = vsub.s32 %v2709_v25, %v2712_v38  ;;  %v2799_v26 = vsel %vm2785_vm7, %v2796_v42, %v2798_v50 }
 0x24f   : > { %v2540_v6 = vsel %vm2538_vm9, %v8875_v10, %v10960_v18  ;;  %v2788_v20 = vsel %vm2784_vm14, %v2768_v29, %v2771_v54  ;;  %vm11226_vm4 = vcmp.lt.s32.totalorder %v11222_v53, 4  ;;  %v2800_v63 = vshll.u32 %v2760_v36, 8 }
 0x250   : > { %v2789_v7 = vsel %vm11226_vm4, %v2777_v4, 2102212464  ;;  %v2544_v31 = vsel %vm2537_vm8, %v2540_v6, %v2543_v27  ;;  %v2631_v25 = vsel %vm2548_vm13, %v2630_v0, %v2629_v45  ;;  %v2715_v38 = vsub.s32 0, %v8903_v48  ;;  %v11227_v45 = vld [vmem:[#allocation103_spill] sm:$0xff] }
 0x251   : > { %v2795_v42 = vsel %vm2785_vm7, %v2792_v37, %v2794_v13  ;;  %v2545_v50 = vsel %vm2535_vm5, nan, %v2544_v31  ;;  %v2634_v54 = vsel %vm8821_vm15, %v11200_v22, %v2631_v25  ;;  %v2790_v36 = vsel %vm2786_vm1, %v2774_v62, %v2789_v7 }
 0x252   : > { %v8926_v29 = vmul.u32.u64.low %v2800_v63, %v2799_v26  ;;  %v8927_v4 = vmul.u32.u64.high %v2800_v63, %v2799_v26, %v8926_v29  ;;  %v3063_v6 = vmul.f32 %v8390_v58, %v2545_v50  ;;  %6334 = vcosq.f32 %v2634_v54 }
 0x253   : > { %v6045_v23 = vmin.u32 %v2715_v38, %v8903_v48  ;;  %v8935_v37 = vshll.u32 %v11022_v52, %v11227_v45  ;;  %v8938_v31 = vand.u32 31, %v8174_v46  ;;  %v4728_v35 = vand.u32 2139095040, %v8168_v8 }
 0x254   : > { %6336 = vsinq.f32 %v2634_v54  ;;  %vm2890_vm2 = vcmp.lt.s32.totalorder %v8184_v9, 4  ;;  %3954 = vrot.lane.b32.xlu1 %v3063_v6, %s6412_s6  ;;  %v8943_v27 = vmul.u32.u64.low %v2800_v63, %v2795_v42  ;;  %v8944_v0 = vmul.u32.u64.high %v2800_v63, %v2795_v42, %v8943_v27  ;;  %v11230_v54 = vld [vmem:[#allocation111_spill] sm:$0xff] }
 0x255   : > { %11228 = vst [vmem:[#allocation74_spill] sm:$0xff] %v8935_v37  ;;  %11229 = vst [vmem:[#allocation27_spill] sm:$0xff] %v8938_v31  ;;  %v2717_v13 = vclz %v6045_v23  ;;  %v2896_v62 = vsel %vm2890_vm2, %v8683_v17, 920167782  ;;  %v2900_v26 = vsel %vm2890_vm2, %v2886_v60, 1326507024  ;;  %v2791_v7 = vsel %vm2785_vm7, %v2788_v20, %v2790_v36 }
 0x256   : > { %v2873_v25 = vshrl.u32 %v11108_v14, %v8485_v61  ;;  %vm2644_vm3 = vcmp.eq.s32.totalorder %v8878_v49, 2  ;;  %v2705_v38 = vadd.s32 %v8825_v3, %v8814_v41  ;;  %v2735_v50 = vsub.s32 4, %v8871_v28 }
 0x257   : > { %v6046_v42 = vadd.s32 4294967294, %v2717_v13  ;;  %v10965_v29 = vand.u32 2147483647, %v11230_v54  ;;  %vm2641_vm15 = vcmp.eq.s32.totalorder %v8878_v49, 0  ;;  %vm2809_vm13 = vc.u32 %v8927_v4, %v8943_v27 }
 0x258   : > { %v2872_v39 = vshll.u32 %v11110_v33, %v8311_v19  ;;  %v2875_v12 = vshll.u32 %v11108_v14, %v8311_v19  ;;  %v2876_v60 = vshrl.u32 %v11109_v57, %v8485_v61  ;;  %vm2640_vm6 = vcmp.lt.s32.totalorder %v8878_v49, 2 }
 0x259   : > { %vm6047_vm11 = vcmp.lt.s32.totalorder %v6046_v42, 0  ;;  %v2807_v20 = vmul.u32 %v2800_v63, %v2791_v7  ;;  %v2810_v41 = vadd.s32 1, %v8944_v0  ;;  %v2879_v3 = vshrl.u32 %v11022_v52, %v8485_v61 }
 0x25a   : > { %vm2638_vm8 = vweird.f32 %v11200_v22  ;;  %v2720_v53 = vsel %vm6047_vm11, 0, %v6046_v42  ;;  %v2874_v6 = vor.u32 %v2873_v25, %v2872_v39  ;;  %v2877_v23 = vor.u32 %v2876_v60, %v2875_v12 }
 0x25b   : > { %v2878_v36 = vshll.u32 %v11109_v57, %v8311_v19  ;;  %vm2651_vm9 = vcmp.lt.s32.totalorder %v11211_v32, 0  ;;  %v2721_v13 = vsub.s32 32, %v2720_v53  ;;  %v2725_v11 = vsub.s32 4294967266, %v2720_v53 }
 0x25c   : > { %v2811_v63 = vsel %vm2809_vm13, %v2810_v41, %v8944_v0  ;;  %v2862_v7 = vand.u32 8388607, %v10965_v29  ;;  %v2871_v25 = vshrl.u32 %v11110_v33, %v8485_v61  ;;  %vm2887_vm10 = vcmp.lt.s32.totalorder %v8184_v9, 1  ;;  %v8990_v19 = vpop.eup %6334 }
 0x25d   : > { %v2812_v18 = vadd.s32 %v2811_v63, %v2807_v20  ;;  %v2880_v42 = vor.u32 %v2879_v3, %v2878_v36  ;;  %v2722_v39 = vshll.u32 %v8903_v48, %v2720_v53  ;;  %v2723_v12 = vshrl.u32 %v2705_v38, %v2721_v13 }
 0x25e   : > { %v2726_v60 = vadd.s32 127, %v2725_v11  ;;  %vm2889_vm14 = vcmp.lt.s32.totalorder %v8184_v9, 3  ;;  %v8994_v1 = vpop.eup %6336  ;;  %v10962_v0 = vxor.u32 2147483648, %v8990_v19  ;;  %v2895_v20 = vsel %vm2887_vm10, %v2874_v6, %v2877_v23 }
 0x25f   : > { %v2813_v41 = vadd.s32 536870912, %v2812_v18  ;;  %v2897_v61 = vsel %vm2889_vm14, %v2880_v42, %v2896_v62  ;;  %v10963_v3 = vxor.u32 2147483648, %v8994_v1  ;;  %v2724_v36 = vor.u32 %v2723_v12, %v2722_v39 }
 0x260   : > { %v2727_v63 = vshll.u32 %v2726_v60, 23  ;;  %v2863_v48 = vor.u32 8388608, %v2862_v7  ;;  %v2646_v11 = vsel %vm2644_vm3, %v10962_v0, %v8994_v1  ;;  %vm2888_vm1 = vcmp.lt.s32.totalorder %v8184_v9, 2 }
 0x261   : > { %v9007_v38 = vshrl.u32 %v2813_v41, 30  ;;  %v2892_v53 = vsel %vm2890_vm2, %v2880_v42, 2102212464  ;;  %v2643_v62 = vsel %vm2641_vm15, %v8990_v19, %v10963_v3  ;;  %v2898_v7 = vsel %vm2888_vm1, %v2895_v20, %v2897_v61 }
 0x262   : > { %v2728_v13 = vor.u32 4788187, %v2727_v63  ;;  %v2899_v39 = vsel %vm2887_vm10, %v2877_v23, %v2880_v42  ;;  %v2647_v12 = vsel %vm2640_vm6, %v2643_v62, %v2646_v11  ;;  %v2731_v60 = vcvt.s32.f32 %v2724_v36 }
 0x263   : > { %v2815_v41 = vshll.u32 %v9007_v38, 30  ;;  %v2901_v0 = vsel %vm2889_vm14, %v8683_v17, %v2900_v26  ;;  %v2648_v3 = vsel %vm2638_vm8, nan, %v2647_v12  ;;  %v2903_v61 = vshll.u32 %v2863_v48, 8 }
 0x264   : > { %v2729_v63 = vand.u32 2147483647, %v2728_v13  ;;  %v2902_v20 = vsel %vm2888_vm1, %v2899_v39, %v2901_v0  ;;  %v3064_v42 = vmul.f32 %v8390_v58, %v2648_v3  ;;  %v2736_v49 = vsel %vm2651_vm9, %v2735_v50, %v8871_v28 }
 0x265   : > { %v9035_v36 = vsub.s32 %v2812_v18, %v2815_v41  ;;  %v2891_v11 = vsel %vm2887_vm10, %v2871_v25, %v2874_v6  ;;  %v2893_v26 = vsel %vm2889_vm14, %v2877_v23, %v2892_v53  ;;  %v9046_v0 = vshll.u32 %v11199_v47, %v11227_v45  ;;  %v11232_v53 = vld [vmem:[#allocation57_spill] sm:$0xff]  ;;  %v11235_v45 = vld [vmem:[#allocation98_spill] sm:$0xff] }
 0x266   : > { %v2732_v17 = vmul.f32 %v2731_v60, %v2729_v63  ;;  %v9041_v62 = vmul.u32.u64.low %v2903_v61, %v2902_v20  ;;  %v9042_v13 = vmul.u32.u64.high %v2903_v61, %v2902_v20, %v9041_v62  ;;  %3956 = vrot.lane.b32.xlu0 %v3064_v42, %s6412_s6  ;;  %v9055_v50 = vshrl.u32 %v8174_v46, 5  ;;  %v11233_v20 = vld [vmem:[#allocation94_spill] sm:$0xff] }
 0x267   : > { %11231 = vst [vmem:[#allocation55_spill] sm:$0xff] %v9046_v0  ;;  %v2818_v58 = vsub.s32 0, %v9035_v36  ;;  %v9050_v28 = vmul.u32.u64.low %v2903_v61, %v2898_v7  ;;  %v9051_v18 = vmul.u32.u64.high %v2903_v61, %v2898_v7, %v9050_v28  ;;  %v4729_v6 = vshrl.u32 %v4728_v35, 23  ;;  %v11234_v62 = vld [vmem:[#allocation88_spill] sm:$0xff]  ;;  %v11239_v0 = vld [vmem:[#allocation101_spill] sm:$0xff] }
 0x268   : > { %vm2650_vm7 = vcmp.le.f32.partialorder %v2649_v16, 0.7853982  ;;  %v2733_v23 = vxor.u32 2147483648, %v2732_v17  ;;  %v2894_v48 = vsel %vm2888_vm1, %v2891_v11, %v2893_v26  ;;  %v10964_v7 = vand.u32 2147483647, %v11232_v53 }
 0x269   : > { %v9061_v25 = vsel %vm2650_vm7, 0, %v2736_v49  ;;  %v6049_v3 = vmin.u32 %v2818_v58, %v9035_v36  ;;  %v9068_v39 = vsub.s32 32, %v8938_v31  ;;  %v9072_v46 = vshll.u32 %v11022_v52, %v8938_v31 }
 0x26a   : > { %v2734_v16 = vsel %vm2651_vm9, %v2733_v23, %v2732_v17  ;;  %vm2912_vm4 = vc.u32 %v9042_v13, %v9050_v28  ;;  %v9080_v35 = vshll.u32 %v11199_v47, %v8938_v31  ;;  %v2913_v60 = vadd.s32 1, %v9051_v18 }
 0x26b   : > { %v2737_v9 = vsel %vm2650_vm7, %v11211_v32, %v2734_v16  ;;  %v2820_v12 = vclz %v6049_v3  ;;  %v9085_v41 = vand.u32 3, %v9061_v25  ;;  %v2910_v63 = vmul.u32 %v2903_v61, %v2894_v48 }
 0x26c   : > { %6338 = vcosq.f32 %v2737_v9  ;;  %v2976_v42 = vshrl.u32 %v11108_v14, %v11233_v20  ;;  %v2914_v11 = vsel %vm2912_vm4, %v2913_v60, %v9051_v18  ;;  %v2965_v17 = vand.u32 8388607, %v10964_v7 }
 0x26d   : > { %6340 = vsinq.f32 %v2737_v9  ;;  %v6050_v49 = vadd.s32 4294967294, %v2820_v12  ;;  %v2915_v26 = vadd.s32 %v2914_v11, %v2910_v63  ;;  %v2975_v58 = vshll.u32 %v11110_v33, %v11234_v62 }
 0x26e   : > { %v2978_v23 = vshll.u32 %v11108_v14, %v11234_v62  ;;  %v2979_v61 = vshrl.u32 %v11109_v57, %v11233_v20  ;;  %v9098_v3 = vadd.s32 4294967169, %v4729_v6  ;;  %v2981_v48 = vshll.u32 %v11109_v57, %v11234_v62 }
 0x26f   : > { %vm6051_vm2 = vcmp.lt.s32.totalorder %v6050_v49, 0  ;;  %v2982_v18 = vshrl.u32 %v11022_v52, %v11233_v20  ;;  %v2916_v9 = vadd.s32 536870912, %v2915_v26  ;;  %v2977_v12 = vor.u32 %v2976_v42, %v2975_v58 }
 0x270   : > { %v2823_v16 = vsel %vm6051_vm2, 0, %v6050_v49  ;;  %v2980_v60 = vor.u32 %v2979_v61, %v2978_v23  ;;  %vm2744_vm3 = vcmp.eq.s32.totalorder %v9085_v41, 0  ;;  %vm2754_vm15 = vcmp.lt.s32.totalorder %v11219_v56, 0  ;;  %v11236_v61 = vld [vmem:[#allocation107_spill] sm:$0xff] }
 0x271   : > { %v2808_v63 = vadd.s32 %v8943_v27, %v8927_v4  ;;  %v2824_v6 = vsub.s32 32, %v2823_v16  ;;  %v2828_v11 = vsub.s32 4294967266, %v2823_v16  ;;  %v2983_v7 = vor.u32 %v2982_v18, %v2981_v48 }
 0x272   : > { %vm2747_vm13 = vcmp.eq.s32.totalorder %v9085_v41, 2  ;;  %v9109_v62 = vshrl.u32 %v2916_v9, 30  ;;  %v2966_v29 = vor.u32 8388608, %v2965_v17  ;;  %vm2990_vm6 = vcmp.lt.s32.totalorder %v11235_v45, 1 }
 0x273   : > { %vm2741_vm11 = vweird.f32 %v11211_v32  ;;  %v2825_v42 = vshll.u32 %v9035_v36, %v2823_v16  ;;  %v2826_v49 = vshrl.u32 %v2808_v63, %v2824_v6  ;;  %v2829_v58 = vadd.s32 127, %v2828_v11  ;;  %v11238_v11 = vld [vmem:[#allocation108_spill] sm:$0xff] }
 0x274   : > { %vm2992_vm9 = vcmp.lt.s32.totalorder %v11235_v45, 3  ;;  %v2838_v4 = vsub.s32 4, %v9007_v38  ;;  %v2918_v27 = vshll.u32 %v9109_v62, 30  ;;  %v2998_v23 = vsel %vm2990_vm6, %v2977_v12, %v2980_v60 }
 0x275   : > { %v3000_v17 = vsel %vm2992_vm9, %v2983_v7, %v11236_v61  ;;  %v2827_v48 = vor.u32 %v2826_v49, %v2825_v42  ;;  %v2830_v18 = vshll.u32 %v2829_v58, 23  ;;  %v2974_v36 = vshrl.u32 %v11110_v33, %v11233_v20 }
 0x276   : > { %v3002_v16 = vsel %vm2990_vm6, %v2980_v60, %v2983_v7  ;;  %v9126_v9 = vpop.eup %6338  ;;  %v9128_v63 = vsub.s32 %v2915_v26, %v2918_v27  ;;  %vm2991_vm10 = vcmp.lt.s32.totalorder %v11235_v45, 2  ;;  %vm11237_vm14 = vcmp.lt.s32.totalorder %v11235_v45, 4 }
 0x277   : > { %v2995_v6 = vsel %vm11237_vm14, %v2983_v7, 2102212464  ;;  %v3004_v42 = vsel %vm2992_vm9, %v11239_v0, %v11238_v11  ;;  %v9137_v49 = vpop.eup %6340  ;;  %v10971_v20 = vxor.u32 2147483648, %v9126_v9  ;;  %v2831_v58 = vor.u32 4788187, %v2830_v18 }
 0x278   : > { %v3001_v61 = vsel %vm2991_vm10, %v2998_v23, %v3000_v17  ;;  %v3006_v26 = vshll.u32 %v2966_v29, 8  ;;  %v2745_v27 = vxor.u32 2147483648, %v9137_v49  ;;  %v2834_v37 = vcvt.s32.f32 %v2827_v48 }
 0x279   : > { %v2921_v8 = vsub.s32 0, %v9128_v63  ;;  %v3005_v7 = vsel %vm2991_vm10, %v3002_v16, %v3004_v42  ;;  %v2749_v0 = vsel %vm2747_vm13, %v10971_v20, %v9137_v49  ;;  %v2832_v11 = vand.u32 2147483647, %v2831_v58 }
 0x27a   : > { %v9151_v18 = vmul.u32.u64.low %v3006_v26, %v3005_v7  ;;  %v9152_v31 = vmul.u32.u64.high %v3006_v26, %v3005_v7, %v9151_v18  ;;  %vm2743_vm1 = vcmp.lt.s32.totalorder %v9085_v41, 2  ;;  %v2746_v29 = vsel %vm2744_vm3, %v9126_v9, %v2745_v27 }
 0x27b   : > { %v2839_v23 = vsel %vm2754_vm15, %v2838_v4, %v9007_v38  ;;  %v6053_v17 = vmin.u32 %v2921_v8, %v9128_v63  ;;  %v2750_v48 = vsel %vm2743_vm1, %v2746_v29, %v2749_v0  ;;  %v2835_v16 = vmul.f32 %v2834_v37, %v2832_v11  ;;  %v9178_v8 = vld [vmem:[%s10763_s2] ss:$0 sm:$0xff] }
 0x27c   : > { %v2994_v42 = vsel %vm2990_vm6, %v2974_v36, %v2977_v12  ;;  %v2996_v58 = vsel %vm2992_vm9, %v2980_v60, %v2995_v6  ;;  %v2751_v7 = vsel %vm2741_vm11, nan, %v2750_v48  ;;  %v4546_v38 = vshrl.u32 %v11199_v47, %v9068_v39 }
 0x27d   : > { %v2923_v18 = vclz %v6053_v17  ;;  %v9170_v41 = vmul.u32.u64.low %v3006_v26, %v3001_v61  ;;  %v9171_v20 = vmul.u32.u64.high %v3006_v26, %v3001_v61, %v9170_v41  ;;  %v3065_v37 = vmul.f32 %v9178_v8, %v2751_v7 }
 0x27e   : > { %v2836_v12 = vxor.u32 2147483648, %v2835_v16  ;;  %v2941_v60 = vsub.s32 4, %v9109_v62  ;;  %v4735_v4 = vadd.s32 1, %v9098_v3  ;;  %v11240_v36 = vand.u32 2147483647, %v11219_v56 }
 0x27f   : > { %v6054_v6 = vadd.s32 4294967294, %v2923_v18  ;;  %v2997_v61 = vsel %vm2991_vm10, %v2994_v42, %v2996_v58  ;;  %3958 = vrot.lane.b32.xlu1 %v3065_v37, %s6412_s6  ;;  %vm2857_vm4 = vcmp.lt.s32.totalorder %v11230_v54, 0  ;;  %v2911_v29 = vadd.s32 %v9050_v28, %v9042_v13 }
 0x280   : > { %vm2753_vm7 = vcmp.le.f32.partialorder %v11240_v36, 0.7853982  ;;  %v2837_v0 = vsel %vm2754_vm15, %v2836_v12, %v2835_v16  ;;  %vm3015_vm3 = vc.u32 %v9152_v31, %v9170_v41  ;;  %v3016_v45 = vadd.s32 1, %v9171_v20 }
 0x281   : > { %v9190_v11 = vsel %vm2753_vm7, 0, %v2839_v23  ;;  %v2840_v3 = vsel %vm2753_vm7, %v11219_v56, %v2837_v0  ;;  %vm6055_vm2 = vcmp.lt.s32.totalorder %v6054_v6, 0  ;;  %v2942_v48 = vsel %vm2857_vm4, %v2941_v60, %v9109_v62 }
 0x282   : > { %6342 = vcosq.f32 %v2840_v3  ;;  %v2926_v17 = vsel %vm6055_vm2, 0, %v6054_v6  ;;  %v3013_v23 = vmul.u32 %v3006_v26, %v2997_v61  ;;  %v3370_v58 = vadd.s32 3, %v8834_v24 }
 0x283   : > { %6344 = vsinq.f32 %v2840_v3  ;;  %v2927_v16 = vsub.s32 32, %v2926_v17  ;;  %v2931_v42 = vsub.s32 4294967266, %v2926_v17  ;;  %vm4736_vm15 = vcmp.gt.s32.totalorder %v4735_v4, 0 }
 0x284   : > { %v2845_v13 = vand.u32 3, %v9190_v11  ;;  %v11241_v28 = vand.u32 2147483647, %v11230_v54  ;;  %v3017_v18 = vsel %vm3015_vm3, %v3016_v45, %v9171_v20  ;;  %v2928_v37 = vshll.u32 %v9128_v63, %v2926_v17 }
 0x285   : > { %v2929_v62 = vshrl.u32 %v2911_v29, %v2927_v16  ;;  %v2932_v26 = vadd.s32 127, %v2931_v42  ;;  %v3018_v12 = vadd.s32 %v3017_v18, %v3013_v23  ;;  %v9213_v60 = vshrl.u32 %v11201_v44, %v9068_v39 }
 0x286   : > { %vm9205_vm13 = vcmp.le.f32.partialorder %v11241_v28, 0.7853982  ;;  %v3162_v36 = vadd.s32 3, %v8575_v59  ;;  %v3474_v6 = vadd.s32 3, %v8869_v43  ;;  %v3371_v3 = vand.u32 3, %v3370_v58 }
 0x287   : > { %v9217_v24 = vsel %vm9205_vm13, 0, %v2942_v48  ;;  %v2930_v61 = vor.u32 %v2929_v62, %v2928_v37  ;;  %v2933_v0 = vshll.u32 %v2932_v26, 23  ;;  %v3019_v20 = vadd.s32 536870912, %v3018_v12 }
 0x288   : > { %v9222_v63 = vor.u32 %v4546_v38, %v9072_v46  ;;  %v9225_v29 = vsel %vm4736_vm15, %v4735_v4, 0  ;;  %vm2846_vm6 = vcmp.lt.s32.totalorder %v2845_v13, 2  ;;  %vm2847_vm9 = vcmp.eq.s32.totalorder %v2845_v13, 0 }
 0x289   : > { %vm2844_vm10 = vweird.f32 %v11219_v56  ;;  %vm2850_vm14 = vcmp.eq.s32.totalorder %v2845_v13, 2  ;;  %v2934_v45 = vor.u32 4788187, %v2933_v0  ;;  %v9229_v59 = vand.u32 3, %v9217_v24 }
 0x28a   : > { %v3020_v43 = vshrl.u32 %v3019_v20, 30  ;;  %v2937_v17 = vcvt.s32.f32 %v2930_v61  ;;  %v3163_v48 = vand.u32 3, %v3162_v36  ;;  %v3266_v23 = vadd.s32 3, %v8674_v55 }
 0x28b   : > { %v3475_v16 = vand.u32 3, %v3474_v6  ;;  %v2935_v46 = vand.u32 2147483647, %v2934_v45  ;;  %vm3373_vm1 = vcmp.eq.s32.totalorder %v3371_v3, 0  ;;  %vm3376_vm7 = vcmp.eq.s32.totalorder %v3371_v3, 2 }
 0x28c   : > { %v3021_v38 = vshll.u32 %v3020_v43, 30  ;;  %v9232_v4 = vpop.eup %6342  ;;  %v9235_v42 = vadd.s32 %v9170_v41, %v9152_v31  ;;  %vm3372_vm2 = vcmp.lt.s32.totalorder %v3371_v3, 2  ;;  %v11244_v58 = vxor.u32 2147483648, %v8886_v34 }
 0x28d   : > { %v11245_v18 = vxor.u32 2147483648, %v8875_v10  ;;  %v9243_v55 = vpop.eup %6344  ;;  %v2851_v62 = vxor.u32 2147483648, %v9232_v4  ;;  %v2938_v26 = vmul.f32 %v2937_v17, %v2935_v46  ;;  %vm3477_vm3 = vcmp.eq.s32.totalorder %v3475_v16, 0 }
 0x28e   : > { %v3375_v28 = vsel %vm3373_vm1, %v8875_v10, %v11244_v58  ;;  %v9246_v36 = vsub.s32 %v3018_v12, %v3021_v38  ;;  %v2848_v31 = vxor.u32 2147483648, %v9243_v55  ;;  %vm2960_vm15 = vcmp.lt.s32.totalorder %v11232_v53, 0 }
 0x28f   : > { %v3378_v37 = vsel %vm3376_vm7, %v11245_v18, %v8886_v34  ;;  %v3267_v41 = vand.u32 3, %v3266_v23  ;;  %v11246_v61 = vxor.u32 2147483648, %v8994_v1  ;;  %v2852_v10 = vsel %vm2850_vm14, %v2851_v62, %v9243_v55 }
 0x290   : > { %v3379_v6 = vsel %vm3372_vm2, %v3375_v28, %v3378_v37  ;;  %v2939_v34 = vxor.u32 2147483648, %v2938_v26  ;;  %v3024_v12 = vsub.s32 0, %v9246_v36  ;;  %vm3165_vm1 = vcmp.eq.s32.totalorder %v3163_v48, 0 }
 0x291   : > { %v3479_v0 = vsel %vm3477_vm3, %v8990_v19, %v11246_v61  ;;  %v2849_v20 = vsel %vm2847_vm9, %v9232_v4, %v2848_v31  ;;  %v11247_v3 = vxor.u32 2147483648, %v8701_v15  ;;  %v3380_v17 = vsel %vm2535_vm5, nan, %v3379_v6 }
 0x292   : > { %v3578_v23 = vadd.s32 3, %v9061_v25  ;;  %v2853_v46 = vsel %vm2846_vm6, %v2849_v20, %v2852_v10  ;;  %v2940_v38 = vsel %vm2857_vm4, %v2939_v34, %v2938_v26  ;;  %v11248_v58 = vand.u32 2147483647, %v11232_v53 }
 0x293   : > { %v3167_v45 = vsel %vm3165_vm1, %v8693_v40, %v11247_v3  ;;  %v6057_v18 = vmin.u32 %v3024_v12, %v9246_v36  ;;  %vm3168_vm9 = vcmp.eq.s32.totalorder %v3163_v48, 2  ;;  %v2854_v2 = vsel %vm2844_vm10, nan, %v2853_v46 }
 0x294   : > { %vm9273_vm14 = vcmp.le.f32.partialorder %v11248_v58, 0.7853982  ;;  %v2943_v25 = vsel %vm9205_vm13, %v11230_v54, %v2940_v38  ;;  %v3044_v13 = vsub.s32 4, %v3020_v43  ;;  %v11251_v37 = vxor.u32 2147483648, %v8693_v40 }
 0x295   : > { %v3066_v6 = vmul.f32 %v9178_v8, %v2854_v2  ;;  %6346 = vcosq.f32 %v2943_v25  ;;  %v3026_v61 = vclz %v6057_v18  ;;  %vm3480_vm5 = vcmp.eq.s32.totalorder %v3475_v16, 2 }
 0x296   : > { %v3170_v26 = vsel %vm3168_vm9, %v11251_v37, %v8701_v15  ;;  %6348 = vsinq.f32 %v2943_v25  ;;  %vm3476_vm4 = vcmp.lt.s32.totalorder %v3475_v16, 2  ;;  %v11252_v10 = vxor.u32 2147483648, %v8990_v19 }
 0x297   : > { %v3579_v12 = vand.u32 3, %v3578_v23  ;;  %3960 = vrot.lane.b32.xlu0 %v3066_v6, %s6412_s6  ;;  %v6058_v7 = vadd.s32 4294967294, %v3026_v61  ;;  %vm3164_vm13 = vcmp.lt.s32.totalorder %v3163_v48, 2  ;;  %vm3268_vm6 = vcmp.lt.s32.totalorder %v3267_v41, 2  ;;  %v11256_v6 = vld [vmem:[#allocation12_spill] sm:$0xff] }
 0x298   : > { %v3482_v34 = vsel %vm3480_vm5, %v11252_v10, %v8994_v1  ;;  %v3171_v40 = vsel %vm3164_vm13, %v3167_v45, %v3170_v26  ;;  %vm3269_vm7 = vcmp.eq.s32.totalorder %v3267_v41, 0  ;;  %vm3272_vm2 = vcmp.eq.s32.totalorder %v3267_v41, 2 }
 0x299   : > { %v3483_v20 = vsel %vm3476_vm4, %v3479_v0, %v3482_v34  ;;  %vm6059_vm3 = vcmp.lt.s32.totalorder %v6058_v7, 0  ;;  %v3045_v16 = vsel %vm2960_vm15, %v3044_v13, %v3020_v43  ;;  %v11253_v1 = vxor.u32 2147483648, %v8777_v51 }
 0x29a   : > { %v9293_v15 = vsel %vm2638_vm8, nan, %v3483_v20  ;;  %v11254_v48 = vxor.u32 2147483648, %v8768_v30  ;;  %v3029_v0 = vsel %vm6059_vm3, 0, %v6058_v7  ;;  %vm3581_vm1 = vcmp.eq.s32.totalorder %v3579_v12, 0 }
 0x29b   : > { %v3271_v19 = vsel %vm3269_vm7, %v8768_v30, %v11253_v1  ;;  %vm3584_vm9 = vcmp.eq.s32.totalorder %v3579_v12, 2  ;;  %v3786_v45 = vadd.s32 3, %v9217_v24  ;;  %vm2949_vm8 = vcmp.lt.s32.totalorder %v9229_v59, 2 }
 0x29c   : > { %v3274_v3 = vsel %vm3272_vm2, %v11254_v48, %v8777_v51  ;;  %v3030_v22 = vsub.s32 32, %v3029_v0  ;;  %v3034_v23 = vsub.s32 4294967266, %v3029_v0  ;;  %v3583_v43 = vsel %vm3581_vm1, %v9126_v9, %v2745_v27 }
 0x29d   : > { %v11255_v46 = vxor.u32 2147483648, %v9126_v9  ;;  %vm2947_vm5 = vweird.f32 %v11230_v54  ;;  %v3047_v30 = vsel %vm9273_vm14, 0, %v3045_v16  ;;  %v3172_v51 = vsel %vm2329_vm0, nan, %v3171_v40 }
 0x29e   : > { %v3275_v24 = vsel %vm3268_vm6, %v3271_v19, %v3274_v3  ;;  %v3682_v58 = vadd.s32 3, %v9190_v11  ;;  %v3031_v18 = vshll.u32 %v9246_v36, %v3029_v0  ;;  %v3032_v27 = vshrl.u32 %v9235_v42, %v3030_v22 }
 0x29f   : > { %v3586_v38 = vsel %vm3584_vm9, %v11255_v46, %v9137_v49  ;;  %v3035_v2 = vadd.s32 127, %v3034_v23  ;;  %vm3580_vm4 = vcmp.lt.s32.totalorder %v3579_v12, 2  ;;  %vm2950_vm13 = vcmp.eq.s32.totalorder %v9229_v59, 0  ;;  %v6347_v25 = vpop.eup %6346  ;;  %v11258_v46 = vld [vmem:[#allocation23_spill] sm:$0xff] }
 0x2a0   : > { %vm2953_vm7 = vcmp.eq.s32.totalorder %v9229_v59, 2  ;;  %v3587_v9 = vsel %vm3580_vm4, %v3583_v43, %v3586_v38  ;;  %v3787_v49 = vand.u32 3, %v3786_v45  ;;  %v3033_v13 = vor.u32 %v3032_v27, %v3031_v18  ;;  %v6349_v36 = vpop.eup %6348  ;;  %v11257_v59 = vld [vmem:[#allocation19_spill] sm:$0xff] }
 0x2a1   : > { %v3036_v5 = vshll.u32 %v3035_v2, 23  ;;  %v3901_v41 = vmul.f32 %v9178_v8, %v3172_v51  ;;  %v9325_v11 = vsel %vm2432_vm12, nan, %v3275_v24  ;;  %v2954_v37 = vxor.u32 2147483648, %v6347_v25 }
 0x2a2   : > { %v9327_v42 = vand.u32 3, %v3047_v30  ;;  %v9330_v26 = vmul.f32 %v9178_v8, %v3380_v17  ;;  %v4107_v61 = vand.u32 2147483647, %v11256_v6  ;;  %v2951_v10 = vxor.u32 2147483648, %v6349_v36 }
 0x2a3   : > { %v3037_v34 = vor.u32 4788187, %v3036_v5  ;;  %v3588_v12 = vsel %vm2741_vm11, nan, %v3587_v9  ;;  %v9335_v7 = vand.u32 3, %v3682_v58  ;;  %v2955_v21 = vsel %vm2953_vm7, %v2954_v37, %v6349_v36 }
 0x2a4   : > { %v3040_v20 = vcvt.s32.f32 %v3033_v13  ;;  %vm3789_vm0 = vcmp.eq.s32.totalorder %v3787_v49, 0  ;;  %vm3792_vm12 = vcmp.eq.s32.totalorder %v3787_v49, 2  ;;  %v2952_v40 = vsel %vm2950_vm13, %v6347_v25, %v2951_v10  ;;  %v11259_v13 = vld [vmem:[#allocation21_spill] sm:$0xff] }
 0x2a5   : > { %v3038_v17 = vand.u32 2147483647, %v3037_v34  ;;  %v3791_v16 = vsel %vm3789_vm0, %v6347_v25, %v2951_v10  ;;  %v3794_v1 = vsel %vm3792_vm12, %v2954_v37, %v6349_v36  ;;  %v2956_v19 = vsel %vm2949_vm8, %v2952_v40, %v2955_v21  ;;  %v11260_v37 = vld [vmem:[#allocation40_spill] sm:$0xff]  ;;  %v11261_v10 = vld [vmem:[#allocation30_spill] sm:$0xff] }
 0x2a6   : > { %v9344_v32 = vmul.f32 %v9178_v8, %v3588_v12  ;;  %v9346_v48 = vadd.s32 3, %v3047_v30  ;;  %v4114_v3 = vand.u32 8388607, %v4107_v61  ;;  %v2957_v0 = vsel %vm2947_vm5, nan, %v2956_v19 }
 0x2a7   : > { %v3041_v45 = vmul.f32 %v3040_v20, %v3038_v17  ;;  %vm3685_vm11 = vcmp.eq.s32.totalorder %v9335_v7, 0  ;;  %vm3788_vm6 = vcmp.lt.s32.totalorder %v3787_v49, 2  ;;  %v3067_v22 = vmul.f32 %v9178_v8, %v2957_v0  ;;  %v11262_v20 = vld [vmem:[#allocation16_spill] sm:$0xff]  ;;  %v11264_v17 = vld [vmem:[#allocation39_spill] sm:$0xff] }
 0x2a8   : > { %v3795_v23 = vsel %vm3788_vm6, %v3791_v16, %v3794_v1  ;;  %v4124_v43 = vshll.u32 %v11110_v33, %v11257_v59  ;;  %v4125_v38 = vshrl.u32 %v11108_v14, %v11258_v46  ;;  %v4115_v51 = vor.u32 8388608, %v4114_v3 }
 0x2a9   : > { %v3042_v30 = vxor.u32 2147483648, %v3041_v45  ;;  %v4127_v24 = vshll.u32 %v11108_v14, %v11257_v59  ;;  %v4128_v58 = vshrl.u32 %v11109_v57, %v11258_v46  ;;  %3962 = vrot.lane.b32.xlu1 %v3067_v22, %s6412_s6  ;;  %v4123_v18 = vshrl.u32 %v11110_v33, %v11258_v46 }
 0x2aa   : > { %v4126_v27 = vor.u32 %v4125_v38, %v4124_v43  ;;  %v4130_v2 = vshll.u32 %v11109_v57, %v11257_v59  ;;  %v4131_v9 = vshrl.u32 %v11022_v52, %v11258_v46  ;;  %vm3684_vm2 = vcmp.lt.s32.totalorder %v9335_v7, 2 }
 0x2ab   : > { %v3043_v49 = vsel %vm2960_vm15, %v3042_v30, %v3041_v45  ;;  %v4129_v25 = vor.u32 %v4128_v58, %v4127_v24  ;;  %vm4139_vm3 = vcmp.lt.s32.totalorder %v11259_v13, 1  ;;  %vm4141_vm1 = vcmp.lt.s32.totalorder %v11259_v13, 3 }
 0x2ac   : > { %v3046_v5 = vsel %vm9273_vm14, %v11232_v53, %v3043_v49  ;;  %v4132_v36 = vor.u32 %v4131_v9, %v4130_v2  ;;  %vm4140_vm9 = vcmp.lt.s32.totalorder %v11259_v13, 2  ;;  %v4153_v34 = vsel %vm4141_vm1, %v11261_v10, %v11260_v37 }
 0x2ad   : > { %6350 = vcosq.f32 %v3046_v5  ;;  %v4147_v12 = vsel %vm4139_vm3, %v4126_v27, %v4129_v25  ;;  %v4155_v21 = vshll.u32 %v4115_v51, 8  ;;  %v4210_v40 = vand.u32 2147483647, %v11262_v20  ;;  %3991 = vrot.lane.b32.xlu1 %v3901_v41, %s6413_s9 }
 0x2ae   : > { %6352 = vsinq.f32 %v3046_v5  ;;  %vm11263_vm15 = vcmp.lt.s32.totalorder %v11259_v13, 4  ;;  %v4149_v16 = vsel %vm4141_vm1, %v4132_v36, %v11264_v17  ;;  %v4151_v1 = vsel %vm4139_vm3, %v4129_v25, %v4132_v36 }
 0x2af   : > { %v4144_v28 = vsel %vm11263_vm15, %v4132_v36, 2102212464  ;;  %v4143_v19 = vsel %vm4139_vm3, %v4123_v18, %v4126_v27  ;;  %v4150_v0 = vsel %vm4140_vm9, %v4147_v12, %v4149_v16  ;;  %v4154_v41 = vsel %vm4140_vm9, %v4151_v1, %v4153_v34  ;;  %v11267_v36 = vld [vmem:[#allocation60_spill] sm:$0xff]  ;;  %v11268_v12 = vld [vmem:[#allocation69_spill] sm:$0xff] }
 0x2b0   : > { %v4145_v3 = vsel %vm4141_vm1, %v4129_v25, %v4144_v28  ;;  %v3687_v45 = vsel %vm3685_vm11, %v9232_v4, %v2848_v31  ;;  %vm3688_vm14 = vcmp.eq.s32.totalorder %v9335_v7, 2  ;;  %vm3056_vm8 = vcmp.eq.s32.totalorder %v9327_v42, 2  ;;  %v11265_v4 = vld [vmem:[#allocation53_spill] sm:$0xff] }
 0x2b1   : > { %v9407_v22 = vmul.u32.u64.low %v4155_v21, %v4154_v41  ;;  %v9408_v59 = vmul.u32.u64.high %v4155_v21, %v4154_v41, %v9407_v22  ;;  %v3690_v43 = vsel %vm3688_vm14, %v2851_v62, %v9243_v55  ;;  %v4217_v30 = vand.u32 8388607, %v4210_v40  ;;  %3995 = vrot.lane.b32.xlu1 %v9330_v26, %s6413_s9  ;;  %v11266_v62 = vld [vmem:[#allocation54_spill] sm:$0xff]  ;;  %v11271_v41 = vld [vmem:[#allocation64_spill] sm:$0xff] }
 0x2b2   : > { %v9414_v46 = vmul.u32.u64.low %v4155_v21, %v4150_v0  ;;  %v9415_v38 = vmul.u32.u64.high %v4155_v21, %v4150_v0, %v9414_v46  ;;  %vm3053_vm4 = vcmp.eq.s32.totalorder %v9327_v42, 0  ;;  %v3796_v31 = vsel %vm2947_vm5, nan, %v3795_v23  ;;  %v11270_v0 = vld [vmem:[#allocation73_spill] sm:$0xff] }
 0x2b3   : > { %v4146_v51 = vsel %vm4140_vm9, %v4143_v19, %v4145_v3  ;;  %v4227_v55 = vshll.u32 %v11110_v33, %v11265_v4  ;;  %v4228_v24 = vshrl.u32 %v11108_v14, %v11266_v62  ;;  %vm3052_vm13 = vcmp.lt.s32.totalorder %v9327_v42, 2 }
 0x2b4   : > { %v4230_v58 = vshll.u32 %v11108_v14, %v11265_v4  ;;  %v4231_v26 = vshrl.u32 %v11109_v57, %v11266_v62  ;;  %v4233_v54 = vshll.u32 %v11109_v57, %v11265_v4  ;;  %v4234_v23 = vshrl.u32 %v11022_v52, %v11266_v62 }
 0x2b5   : > { %vm3050_vm5 = vweird.f32 %v11232_v53  ;;  %v3691_v18 = vsel %vm3684_vm2, %v3687_v45, %v3690_v43  ;;  %vm4164_vm7 = vc.u32 %v9408_v59, %v9414_v46  ;;  %v4218_v27 = vor.u32 8388608, %v4217_v30  ;;  %3999 = vrot.lane.b32.xlu1 %v9344_v32, %s6413_s9  ;;  %v11276_v53 = vld [vmem:[#allocation105_spill] sm:$0xff] }
 0x2b6   : > { %v4229_v2 = vor.u32 %v4228_v24, %v4227_v55  ;;  %v3891_v9 = vand.u32 3, %v9346_v48  ;;  %v4165_v49 = vadd.s32 1, %v9415_v38  ;;  %v4232_v25 = vor.u32 %v4231_v26, %v4230_v58 }
 0x2b7   : > { %v4235_v13 = vor.u32 %v4234_v23, %v4233_v54  ;;  %vm4554_vm0 = vcmp.lt.s32.totalorder %v9055_v50, 4  ;;  %v3907_v5 = vmul.f32 %v9178_v8, %v3796_v31  ;;  %v4162_v7 = vmul.u32 %v4155_v21, %v4146_v51  ;;  %v6351_v37 = vpop.eup %6350 }
 0x2b8   : > { %vm4242_vm12 = vcmp.lt.s32.totalorder %v11267_v36, 1  ;;  %vm4244_vm11 = vcmp.lt.s32.totalorder %v11267_v36, 3  ;;  %v4166_v10 = vsel %vm4164_vm7, %v4165_v49, %v9415_v38  ;;  %v4226_v48 = vshrl.u32 %v11110_v33, %v11266_v62  ;;  %v6353_v28 = vpop.eup %6352 }
 0x2b9   : > { %v4250_v34 = vsel %vm4242_vm12, %v4229_v2, %v4232_v25  ;;  %v4252_v32 = vsel %vm4244_vm11, %v4235_v13, %v11268_v12  ;;  %v3057_v17 = vxor.u32 2147483648, %v6351_v37  ;;  %v4167_v21 = vadd.s32 %v4166_v10, %v4162_v7  ;;  %4003 = vrot.lane.b32.xlu1 %v3907_v5, %s6413_s9  ;;  %v11272_v7 = vld [vmem:[#allocation48_spill] sm:$0xff] }
 0x2ba   : > { %vm4243_vm6 = vcmp.lt.s32.totalorder %v11267_v36, 2  ;;  %v4258_v16 = vshll.u32 %v4218_v27, 8  ;;  %v3054_v1 = vxor.u32 2147483648, %v6353_v28  ;;  %vm11269_vm2 = vcmp.lt.s32.totalorder %v11267_v36, 4 }
 0x2bb   : > { %v4247_v19 = vsel %vm11269_vm2, %v4235_v13, 2102212464  ;;  %v4254_v3 = vsel %vm4242_vm12, %v4232_v25, %v4235_v13  ;;  %v4256_v45 = vsel %vm4244_vm11, %v11271_v41, %v11270_v0  ;;  %v3058_v22 = vsel %vm3056_vm8, %v3057_v17, %v6353_v28 }
 0x2bc   : > { %v4168_v43 = vadd.s32 536870912, %v4167_v21  ;;  %v4253_v38 = vsel %vm4243_vm6, %v4250_v34, %v4252_v32  ;;  %v4257_v30 = vsel %vm4243_vm6, %v4254_v3, %v4256_v45  ;;  %v3055_v31 = vsel %vm3053_vm4, %v6351_v37, %v3054_v1 }
 0x2bd   : > { %vm3893_vm3 = vcmp.eq.s32.totalorder %v3891_v9, 0  ;;  %v9479_v51 = vmul.u32.u64.low %v4258_v16, %v4257_v30  ;;  %v9480_v4 = vmul.u32.u64.high %v4258_v16, %v4257_v30, %v9479_v51  ;;  %v3059_v55 = vsel %vm3052_vm13, %v3055_v31, %v3058_v22 }
 0x2be   : > { %v9484_v62 = vshrl.u32 %v4168_v43, 30  ;;  %v4246_v24 = vsel %vm4242_vm12, %v4226_v48, %v4229_v2  ;;  %v4248_v58 = vsel %vm4244_vm11, %v4232_v25, %v4247_v19  ;;  %v3060_v26 = vsel %vm3050_vm5, nan, %v3059_v55 }
 0x2bf   : > { %vm3896_vm1 = vcmp.eq.s32.totalorder %v3891_v9, 2  ;;  %v9492_v54 = vmul.u32.u64.low %v4258_v16, %v4253_v38  ;;  %v9493_v23 = vmul.u32.u64.high %v4258_v16, %v4253_v38, %v9492_v54  ;;  %v3068_v27 = vmul.f32 %v9178_v8, %v3060_v26  ;;  %v11275_v26 = vld [vmem:[#allocation96_spill] sm:$0xff] }
 0x2c0   : > { %v3895_v42 = vsel %vm3893_vm3, %v6351_v37, %v3054_v1  ;;  %v3898_v49 = vsel %vm3896_vm1, %v3057_v17, %v6353_v28  ;;  %v4170_v13 = vshll.u32 %v9484_v62, 30  ;;  %v4550_v2 = vor.u32 %v9213_v60, %v9080_v35  ;;  %v11273_v1 = vld [vmem:[#allocation82_spill] sm:$0xff] }
 0x2c1   : > { %v9503_v25 = vsel %vm4554_vm0, %v9222_v63, 920167782  ;;  %v4249_v5 = vsel %vm4243_vm6, %v4246_v24, %v4248_v58  ;;  %v4313_v10 = vand.u32 2147483647, %v11272_v7  ;;  %v9509_v48 = vand.u32 31, %v9225_v29  ;;  %3964 = vrot.lane.b32.xlu0 %v3068_v27, %s6412_s6  ;;  %v11277_v27 = vld [vmem:[#allocation97_spill] sm:$0xff] }
 0x2c2   : > { %vm3892_vm9 = vcmp.lt.s32.totalorder %v3891_v9, 2  ;;  %v9512_v37 = vsub.s32 %v4167_v21, %v4170_v13  ;;  %vm4267_vm15 = vc.u32 %v9480_v4, %v9492_v54  ;;  %v3902_v34 = vmul.f32 %v9178_v8, %v9325_v11  ;;  %v11274_v21 = vld [vmem:[#allocation90_spill] sm:$0xff] }
 0x2c3   : > { %v3692_v36 = vsel %vm2844_vm10, nan, %v3691_v18  ;;  %v3899_v12 = vsel %vm3892_vm9, %v3895_v42, %v3898_v49  ;;  %v4268_v32 = vadd.s32 1, %v9493_v23  ;;  %v4265_v17 = vmul.u32 %v4258_v16, %v4249_v5 }
 0x2c4   : > { %v4173_v28 = vsub.s32 0, %v9512_v37  ;;  %v4330_v9 = vshll.u32 %v11110_v33, %v11273_v1  ;;  %v4331_v19 = vshrl.u32 %v11108_v14, %v11274_v21  ;;  %v4320_v11 = vand.u32 8388607, %v4313_v10 }
 0x2c5   : > { %v4269_v3 = vsel %vm4267_vm15, %v4268_v32, %v9493_v23  ;;  %v4333_v56 = vshll.u32 %v11108_v14, %v11273_v1  ;;  %v4334_v18 = vshrl.u32 %v11109_v57, %v11274_v21  ;;  %3993 = vrot.lane.b32.xlu0 %v3902_v34, %s6413_s9  ;;  %v3904_v16 = vmul.f32 %v9178_v8, %v9293_v15 }
 0x2c6   : > { %v3906_v0 = vmul.f32 %v9178_v8, %v3692_v36  ;;  %v6094_v41 = vmin.u32 %v4173_v28, %v9512_v37  ;;  %v4336_v45 = vshll.u32 %v11109_v57, %v11273_v1  ;;  %v4270_v22 = vadd.s32 %v4269_v3, %v4265_v17 }
 0x2c7   : > { %v4332_v43 = vor.u32 %v4331_v19, %v4330_v9  ;;  %v4335_v38 = vor.u32 %v4334_v18, %v4333_v56  ;;  %v4337_v30 = vshrl.u32 %v11022_v52, %v11274_v21  ;;  %v3900_v31 = vsel %vm3050_vm5, nan, %v3899_v12 }
 0x2c8   : > { %vm4109_vm10 = vcmp.lt.s32.totalorder %v11256_v6, 0  ;;  %v4163_v15 = vadd.s32 %v9414_v46, %v9408_v59  ;;  %v4175_v51 = vclz %v6094_v41  ;;  %v4271_v55 = vadd.s32 536870912, %v4270_v22  ;;  %v11278_v46 = vld [vmem:[#allocation104_spill] sm:$0xff] }
 0x2c9   : > { %v4321_v24 = vor.u32 8388608, %v4320_v11  ;;  %v4338_v58 = vor.u32 %v4337_v30, %v4336_v45  ;;  %vm4347_vm14 = vcmp.lt.s32.totalorder %v11275_v26, 3  ;;  %3997 = vrot.lane.b32.xlu0 %v3904_v16, %s6413_s9  ;;  %vm4345_vm8 = vcmp.lt.s32.totalorder %v11275_v26, 1 }
 0x2ca   : > { %v6095_v23 = vadd.s32 4294967294, %v4175_v51  ;;  %vm4346_vm4 = vcmp.lt.s32.totalorder %v11275_v26, 2  ;;  %v4359_v42 = vsel %vm4347_vm14, %v11277_v27, %v11276_v53  ;;  %v9555_v49 = vshrl.u32 %v4271_v55, 30 }
 0x2cb   : > { %v4353_v59 = vsel %vm4345_vm8, %v4332_v43, %v4335_v38  ;;  %v4355_v13 = vsel %vm4347_vm14, %v4338_v58, %v11278_v46  ;;  %v4357_v5 = vsel %vm4345_vm8, %v4335_v38, %v4338_v58  ;;  %v4193_v34 = vsub.s32 4, %v9484_v62 }
 0x2cc   : > { %vm6096_vm13 = vcmp.lt.s32.totalorder %v6095_v23, 0  ;;  %v4329_v36 = vshrl.u32 %v11110_v33, %v11274_v21  ;;  %v4360_v12 = vsel %vm4346_vm4, %v4357_v5, %v4359_v42  ;;  %v4273_v28 = vshll.u32 %v9555_v49, 30 }
 0x2cd   : > { %v4178_v32 = vsel %vm6096_vm13, 0, %v6095_v23  ;;  %vm11279_vm5 = vcmp.lt.s32.totalorder %v11275_v26, 4  ;;  %v4361_v1 = vshll.u32 %v4321_v24, 8  ;;  %4001 = vrot.lane.b32.xlu0 %v3906_v0, %s6413_s9  ;;  %v3908_v9 = vmul.f32 %v9178_v8, %v3900_v31 }
 0x2ce   : > { %v4350_v17 = vsel %vm11279_vm5, %v4338_v58, 2102212464  ;;  %v4179_v19 = vsub.s32 32, %v4178_v32  ;;  %v4183_v3 = vsub.s32 4294967266, %v4178_v32  ;;  %v4356_v11 = vsel %vm4346_vm4, %v4353_v59, %v4355_v13  ;;  %v11282_v58 = vld [vmem:[#allocation14_spill] sm:$0xff] }
 0x2cf   : > { %v9576_v21 = vsub.s32 %v4270_v22, %v4273_v28  ;;  %v4349_v56 = vsel %vm4345_vm8, %v4329_v36, %v4332_v43  ;;  %v9580_v18 = vmul.u32.u64.low %v4361_v1, %v4360_v12  ;;  %v9581_v16 = vmul.u32.u64.high %v4361_v1, %v4360_v12, %v9580_v18  ;;  %v11283_v12 = vld [vmem:[#allocation38_spill] sm:$0xff] }
 0x2d0   : > { %v4180_v41 = vshll.u32 %v9512_v37, %v4178_v32  ;;  %v4181_v45 = vshrl.u32 %v4163_v15, %v4179_v19  ;;  %v4184_v30 = vadd.s32 127, %v4183_v3  ;;  %v4351_v0 = vsel %vm4347_vm14, %v4335_v38, %v4350_v17 }
 0x2d1   : > { %v4194_v31 = vsel %vm4109_vm10, %v4193_v34, %v9484_v62  ;;  %v4276_v22 = vsub.s32 0, %v9576_v21  ;;  %v9590_v51 = vmul.u32.u64.low %v4361_v1, %v4356_v11  ;;  %v9591_v55 = vmul.u32.u64.high %v4361_v1, %v4356_v11, %v9590_v51  ;;  %4005 = vrot.lane.b32.xlu0 %v3908_v9, %s6413_s9 }
 0x2d2   : > { %v9599_v37 = vsel %vm4554_vm0, %v4550_v2, 1326507024  ;;  %v9602_v43 = vshrl.u32 %v9225_v29, 5  ;;  %v4182_v38 = vor.u32 %v4181_v45, %v4180_v41  ;;  %v4185_v62 = vshll.u32 %v4184_v30, 23 }
 0x2d3   : > { %v9606_v15 = vsub.s32 32, %v9509_v48  ;;  %vm9610_vm7 = vcmp.le.f32.partialorder %v4107_v61, 0.7853982  ;;  %v6098_v35 = vmin.u32 %v4276_v22, %v9576_v21  ;;  %v4352_v60 = vsel %vm4346_vm4, %v4349_v56, %v4351_v0 }
 0x2d4   : > { %v4186_v29 = vor.u32 4788187, %v4185_v62  ;;  %v9619_v2 = vsel %vm9610_vm7, 0, %v4194_v31  ;;  %vm4370_vm12 = vc.u32 %v9581_v16, %v9590_v51  ;;  %v10978_v23 = vand.u32 2147483647, %v11282_v58 }
 0x2d5   : > { %v9626_v61 = vshll.u32 %v11022_v52, %v9509_v48  ;;  %v9630_v53 = vshll.u32 %v11199_v47, %v9509_v48  ;;  %v4278_v26 = vclz %v6098_v35  ;;  %v4371_v27 = vadd.s32 1, %v9591_v55 }
 0x2d6   : > { %v4187_v42 = vand.u32 2147483647, %v4186_v29  ;;  %v4189_v59 = vcvt.s32.f32 %v4182_v38  ;;  %v4266_v46 = vadd.s32 %v9492_v54, %v9480_v4  ;;  %v4368_v13 = vmul.u32 %v4361_v1, %v4352_v60  ;;  %v11284_v54 = vld [vmem:[#allocation32_spill] sm:$0xff] }
 0x2d7   : > { %v9636_v5 = vand.u32 3, %v9619_v2  ;;  %vm4212_vm11 = vcmp.lt.s32.totalorder %v11262_v20, 0  ;;  %v6099_v34 = vadd.s32 4294967294, %v4278_v26  ;;  %v4372_v36 = vsel %vm4370_vm12, %v4371_v27, %v9591_v55 }
 0x2d8   : > { %v4434_v32 = vshrl.u32 %v11108_v14, %v11283_v12  ;;  %v4190_v28 = vmul.f32 %v4189_v59, %v4187_v42  ;;  %v4373_v17 = vadd.s32 %v4372_v36, %v4368_v13  ;;  %v4423_v9 = vand.u32 8388607, %v10978_v23  ;;  %v11287_v59 = vld [vmem:[#allocation44_spill] sm:$0xff] }
 0x2d9   : > { %v4437_v4 = vshrl.u32 %v11109_v57, %v11283_v12  ;;  %vm6100_vm6 = vcmp.lt.s32.totalorder %v6099_v34, 0  ;;  %v4433_v1 = vshll.u32 %v11110_v33, %v11284_v54  ;;  %v4436_v19 = vshll.u32 %v11108_v14, %v11284_v54 }
 0x2da   : > { %v4440_v3 = vshrl.u32 %v11022_v52, %v11283_v12  ;;  %v4191_v11 = vxor.u32 2147483648, %v4190_v28  ;;  %v4281_v56 = vsel %vm6100_vm6, 0, %v6099_v34  ;;  %v4374_v18 = vadd.s32 536870912, %v4373_v17 }
 0x2db   : > { %v4439_v41 = vshll.u32 %v11109_v57, %v11284_v54  ;;  %vm9656_vm2 = vcmp.le.f32.partialorder %v4210_v40, 0.7853982  ;;  %v4282_v30 = vsub.s32 32, %v4281_v56  ;;  %v4286_v0 = vsub.s32 4294967266, %v4281_v56 }
 0x2dc   : > { %v4296_v31 = vsub.s32 4, %v9555_v49  ;;  %v4435_v22 = vor.u32 %v4434_v32, %v4433_v1  ;;  %v4192_v55 = vsel %vm4109_vm10, %v4191_v11, %v4190_v28  ;;  %v9663_v38 = vshrl.u32 %v4374_v18, 30  ;;  %v11290_v1 = vld [vmem:[#allocation52_spill] sm:$0xff] }
 0x2dd   : > { %v4438_v62 = vor.u32 %v4437_v4, %v4436_v19  ;;  %v4441_v35 = vor.u32 %v4440_v3, %v4439_v41  ;;  %v4195_v60 = vsel %vm9610_vm7, %v11256_v6, %v4192_v55  ;;  %v4283_v40 = vshll.u32 %v9576_v21, %v4281_v56  ;;  %v11291_v19 = vld [vmem:[#allocation46_spill] sm:$0xff] }
 0x2de   : > { %v4284_v29 = vshrl.u32 %v4266_v46, %v4282_v30  ;;  %v4287_v26 = vadd.s32 127, %v4286_v0  ;;  %6354 = vcosq.f32 %v4195_v60  ;;  %v4376_v27 = vshll.u32 %v9663_v38, 30  ;;  %v11288_v46 = vld [vmem:[#allocation49_spill] sm:$0xff] }
 0x2df   : > { %v4424_v42 = vor.u32 8388608, %v4423_v9  ;;  %vm4448_vm3 = vcmp.lt.s32.totalorder %v11287_v59, 1  ;;  %6356 = vsinq.f32 %v4195_v60  ;;  %vm4450_vm1 = vcmp.lt.s32.totalorder %v11287_v59, 3 }
 0x2e0   : > { %v4285_v13 = vor.u32 %v4284_v29, %v4283_v40  ;;  %v4288_v34 = vshll.u32 %v4287_v26, 23  ;;  %v4297_v24 = vsel %vm4212_vm11, %v4296_v31, %v9555_v49  ;;  %v9675_v36 = vsub.s32 %v4373_v17, %v4376_v27 }
 0x2e1   : > { %v4456_v21 = vsel %vm4448_vm3, %v4435_v22, %v4438_v62  ;;  %v4458_v32 = vsel %vm4450_vm1, %v4441_v35, %v11288_v46  ;;  %v4432_v9 = vshrl.u32 %v11110_v33, %v11283_v12  ;;  %vm4449_vm9 = vcmp.lt.s32.totalorder %v11287_v59, 2 }
 0x2e2   : > { %v4289_v28 = vor.u32 4788187, %v4288_v34  ;;  %vm11289_vm15 = vcmp.lt.s32.totalorder %v11287_v59, 4  ;;  %v4292_v54 = vcvt.s32.f32 %v4285_v13  ;;  %v4379_v49 = vsub.s32 0, %v9675_v36 }
 0x2e3   : > { %v4453_v4 = vsel %vm11289_vm15, %v4441_v35, 2102212464  ;;  %v4460_v17 = vsel %vm4448_vm3, %v4438_v62, %v4441_v35  ;;  %v4462_v3 = vsel %vm4450_vm1, %v11291_v19, %v11290_v1  ;;  %v4459_v12 = vsel %vm4449_vm9, %v4456_v21, %v4458_v32  ;;  %v11293_v21 = vld [vmem:[#allocation81_spill] sm:$0xff] }
 0x2e4   : > { %v4290_v11 = vand.u32 2147483647, %v4289_v28  ;;  %v4463_v56 = vsel %vm4449_vm9, %v4460_v17, %v4462_v3  ;;  %v4464_v18 = vshll.u32 %v4424_v42, 8  ;;  %v9700_v41 = vshrl.u32 %v11199_v47, %v9606_v15 }
 0x2e5   : > { %v9704_v30 = vsel %vm9656_vm2, 0, %v4297_v24  ;;  %v6102_v0 = vmin.u32 %v4379_v49, %v9675_v36  ;;  %v4452_v31 = vsel %vm4448_vm3, %v4432_v9, %v4435_v22  ;;  %vm4199_vm10 = vweird.f32 %v11256_v6 }
 0x2e6   : > { %11292 = vst [vmem:[#allocation61_spill] sm:$0xff] %v9704_v30  ;;  %v4293_v55 = vmul.f32 %v4292_v54, %v4290_v11  ;;  %v4454_v35 = vsel %vm4450_vm1, %v4438_v62, %v4453_v4  ;;  %v9712_v60 = vmul.u32.u64.low %v4464_v18, %v4463_v56  ;;  %v9713_v40 = vmul.u32.u64.high %v4464_v18, %v4463_v56, %v9712_v60 }
 0x2e7   : > { %vm4201_vm14 = vcmp.lt.s32.totalorder %v9636_v5, 2  ;;  %v4381_v29 = vclz %v6102_v0  ;;  %v9716_v26 = vmul.u32.u64.low %v4464_v18, %v4459_v12  ;;  %v9717_v27 = vmul.u32.u64.high %v4464_v18, %v4459_v12, %v9716_v26 }
 0x2e8   : > { %vm4202_vm8 = vcmp.eq.s32.totalorder %v9636_v5, 0  ;;  %vm4205_vm4 = vcmp.eq.s32.totalorder %v9636_v5, 2  ;;  %v4294_v22 = vxor.u32 2147483648, %v4293_v55  ;;  %v9723_v42 = vand.u32 3, %v9704_v30  ;;  %v9725_v13 = vpop.eup %6354  ;;  %v11312_v30 = vld [vmem:[#allocation77_spill] sm:$0xff] }
 0x2e9   : > { %v4369_v62 = vadd.s32 %v9590_v51, %v9581_v16  ;;  %v6103_v34 = vadd.s32 4294967294, %v4381_v29  ;;  %v4455_v24 = vsel %vm4449_vm9, %v4452_v31, %v4454_v35  ;;  %v10977_v46 = vand.u32 2147483647, %v11293_v21  ;;  %v9732_v32 = vpop.eup %6356  ;;  %v9769_v35 = vpop.permute.xlu1 %3909  ;;  %v11295_v29 = vld [vmem:[#allocation27_spill] sm:$0xff] }
 0x2ea   : > { %v10974_v28 = vxor.u32 2147483648, %v9725_v13  ;;  %v4295_v9 = vsel %vm4212_vm11, %v4294_v22, %v4293_v55  ;;  %v4399_v4 = vsub.s32 4, %v9663_v38  ;;  %vm4473_vm13 = vc.u32 %v9713_v40, %v9716_v26  ;;  %11294 = vst [vmem:[#allocation65_spill] sm:$0xff] %v9769_v35 }
 0x2eb   : > { %v10975_v16 = vxor.u32 2147483648, %v9732_v32  ;;  %v4298_v51 = vsel %vm9656_vm2, %v11262_v20, %v4295_v9  ;;  %vm4315_vm5 = vcmp.lt.s32.totalorder %v11272_v7, 0  ;;  %vm6104_vm7 = vcmp.lt.s32.totalorder %v6103_v34, 0 }
 0x2ec   : > { %v4474_v59 = vadd.s32 1, %v9717_v27  ;;  %v4207_v54 = vsel %vm4205_vm4, %v10974_v28, %v9732_v32  ;;  %6358 = vcosq.f32 %v4298_v51  ;;  %v4384_v49 = vsel %vm6104_vm7, 0, %v6103_v34 }
 0x2ed   : > { %v4471_v17 = vmul.u32 %v4464_v18, %v4455_v24  ;;  %v4204_v45 = vsel %vm4202_vm8, %v9725_v13, %v10975_v16  ;;  %6360 = vsinq.f32 %v4298_v51  ;;  %v4385_v1 = vsub.s32 32, %v4384_v49 }
 0x2ee   : > { %v4526_v19 = vand.u32 8388607, %v10977_v46  ;;  %v4208_v3 = vsel %vm4201_vm14, %v4204_v45, %v4207_v54  ;;  %v4389_v11 = vsub.s32 4294967266, %v4384_v49  ;;  %v4475_v12 = vsel %vm4473_vm13, %v4474_v59, %v9717_v27 }
 0x2ef   : > { %v4537_v56 = vshrl.u32 %v11108_v14, %v9068_v39  ;;  %v4209_v18 = vsel %vm4199_vm10, nan, %v4208_v3  ;;  %v4386_v0 = vshll.u32 %v9675_v36, %v4384_v49  ;;  %v4387_v31 = vshrl.u32 %v4369_v62, %v4385_v1 }
 0x2f0   : > { %v4476_v55 = vadd.s32 %v4475_v12, %v4471_v17  ;;  %v4931_v5 = vmul.f32 %v9178_v8, %v4209_v18  ;;  %v4390_v60 = vadd.s32 127, %v4389_v11  ;;  %v4539_v22 = vshll.u32 %v11108_v14, %v11295_v29  ;;  %v9805_v12 = vpop.permute.xlu1 %3913 }
 0x2f1   : > { %v4540_v27 = vshrl.u32 %v11109_v57, %v9068_v39  ;;  %vm4305_vm12 = vcmp.eq.s32.totalorder %v9723_v42, 0  ;;  %v4536_v24 = vshll.u32 %v11110_v33, %v11295_v29  ;;  %v4542_v36 = vshll.u32 %v11109_v57, %v11295_v29  ;;  %11298 = vst [vmem:[#allocation78_spill] sm:$0xff] %v9805_v12 }
 0x2f2   : > { %v4477_v34 = vadd.s32 536870912, %v4476_v55  ;;  %v4543_v62 = vshrl.u32 %v11022_v52, %v9068_v39  ;;  %5820 = vrot.lane.b32.xlu1 %v4931_v5, %s6414_s10  ;;  %vm4304_vm11 = vcmp.lt.s32.totalorder %v9723_v42, 2  ;;  %vm4308_vm6 = vcmp.eq.s32.totalorder %v9723_v42, 2 }
 0x2f3   : > { %vm9788_vm2 = vcmp.le.f32.partialorder %v4313_v10, 0.7853982  ;;  %v4388_v9 = vor.u32 %v4387_v31, %v4386_v0  ;;  %v4391_v51 = vshll.u32 %v4390_v60, 23  ;;  %v4541_v59 = vor.u32 %v4540_v27, %v4539_v22 }
 0x2f4   : > { %vm4302_vm3 = vweird.f32 %v11262_v20  ;;  %v4478_v54 = vshrl.u32 %v4477_v34, 30  ;;  %v4527_v49 = vor.u32 8388608, %v4526_v19  ;;  %v4538_v17 = vor.u32 %v4537_v56, %v4536_v24 }
 0x2f5   : > { %v4544_v45 = vor.u32 %v4543_v62, %v4542_v36  ;;  %v4392_v1 = vor.u32 4788187, %v4391_v51  ;;  %v4400_v3 = vsel %vm4315_vm5, %v4399_v4, %v9663_v38  ;;  %v4535_v10 = vshrl.u32 %v11110_v33, %v9068_v39  ;;  %v9838_v62 = vpop.permute.xlu1 %3917 }
 0x2f6   : > { %vm4553_vm1 = vcmp.lt.s32.totalorder %v9055_v50, 3  ;;  %v4479_v11 = vshll.u32 %v4478_v54, 30  ;;  %vm4551_vm9 = vcmp.lt.s32.totalorder %v9055_v50, 1  ;;  %vm4552_vm15 = vcmp.lt.s32.totalorder %v9055_v50, 2  ;;  %v9807_v56 = vpop.eup %6358  ;;  %11301 = vst [vmem:[#allocation56_spill] sm:$0xff] %v9838_v62 }
 0x2f7   : > { %v4565_v19 = vsel %vm4553_vm1, %v9222_v63, %v9599_v37  ;;  %11299 = vst [vmem:[#allocation71_spill] sm:$0xff] %v9807_v56  ;;  %v4393_v38 = vand.u32 2147483647, %v4392_v1  ;;  %v4395_v4 = vcvt.s32.f32 %v4388_v9  ;;  %v4556_v39 = vsel %vm4554_vm0, %v4544_v45, 2102212464  ;;  %v9813_v0 = vpop.eup %6360 }
 0x2f8   : > { %v4563_v18 = vsel %vm4551_vm9, %v4541_v59, %v4544_v45  ;;  %11300 = vst [vmem:[#allocation76_spill] sm:$0xff] %v9813_v0  ;;  %v10972_v31 = vxor.u32 2147483648, %v9807_v56  ;;  %v9816_v5 = vsub.s32 %v4476_v55, %v4479_v11  ;;  %v4559_v63 = vsel %vm4551_vm9, %v4538_v17, %v4541_v59 }
 0x2f9   : > { %v9820_v37 = vshll.u32 %v4527_v49, 8  ;;  %v10973_v60 = vxor.u32 2147483648, %v9813_v0  ;;  %v4396_v29 = vmul.f32 %v4395_v4, %v4393_v38  ;;  %v4561_v22 = vsel %vm4553_vm1, %v4544_v45, %v9503_v25  ;;  %v9840_v25 = vpop.permute.xlu0 %3911 }
 0x2fa   : > { %v4566_v27 = vsel %vm4552_vm15, %v4563_v18, %v4565_v19  ;;  %v4310_v55 = vsel %vm4308_vm6, %v10972_v31, %v9813_v0  ;;  %v4482_v34 = vsub.s32 0, %v9816_v5  ;;  %v4555_v24 = vsel %vm4551_vm9, %v4535_v10, %v4538_v17  ;;  %11302 = vst [vmem:[#allocation87_spill] sm:$0xff] %v9840_v25 }
 0x2fb   : > { %v4557_v36 = vsel %vm4553_vm1, %v4541_v59, %v4556_v39  ;;  %v4307_v9 = vsel %vm4305_vm12, %v9807_v56, %v10973_v60  ;;  %v4397_v51 = vxor.u32 2147483648, %v4396_v29  ;;  %v9855_v59 = vsel %vm9788_vm2, 0, %v4400_v3  ;;  %v9869_v3 = vld [vmem:[%s10763_s2] ss:$0 sm:$0xff] }
 0x2fc   : > { %v9848_v49 = vmul.u32.u64.low %v9820_v37, %v4566_v27  ;;  %v9849_v45 = vmul.u32.u64.high %v9820_v37, %v4566_v27, %v9848_v49  ;;  %v4311_v17 = vsel %vm4304_vm11, %v4307_v9, %v4310_v55  ;;  %v6106_v1 = vmin.u32 %v4482_v34, %v9816_v5  ;;  %v9876_v27 = vpop.permute.xlu1 %3921 }
 0x2fd   : > { %v4562_v10 = vsel %vm4552_vm15, %v4559_v63, %v4561_v22  ;;  %v4312_v11 = vsel %vm4302_vm3, nan, %v4311_v17  ;;  %v4398_v19 = vsel %vm4315_vm5, %v4397_v51, %v4396_v29  ;;  %v4502_v38 = vsub.s32 4, %v4478_v54  ;;  %v11303_v63 = vld [vmem:[#allocation26_spill] sm:$0xff]  ;;  %11304 = vst [vmem:[#allocation93_spill] sm:$0xff] %v9876_v27  ;;  %v9878_v29 = vpop.permute.xlu0 %3915  ;;  %v11306_v17 = vld [vmem:[#allocation68_spill] sm:$0xff] }
 0x2fe   : > { %v4558_v42 = vsel %vm4552_vm15, %v4555_v24, %v4557_v36  ;;  %v4932_v4 = vmul.f32 %v9869_v3, %v4312_v11  ;;  %v4401_v39 = vsel %vm9788_vm2, %v11272_v7, %v4398_v19  ;;  %v4484_v18 = vclz %v6106_v1  ;;  %11305 = vst [vmem:[#allocation100_spill] sm:$0xff] %v9878_v29  ;;  %v11329_v27 = vld [vmem:[#allocation106_spill] sm:$0xff] }
 0x2ff   : > { %v10976_v22 = vand.u32 2147483647, %v11303_v63  ;;  %6362 = vcosq.f32 %v4401_v39  ;;  %v9881_v50 = vand.u32 3, %v9855_v59  ;;  %v9890_v8 = vshrl.u32 %v11201_v44, %v9606_v15 }
 0x300   : > { %v9884_v55 = vmul.u32.u64.low %v9820_v37, %v4562_v10  ;;  %v9885_v34 = vmul.u32.u64.high %v9820_v37, %v4562_v10, %v9884_v55  ;;  %5822 = vrot.lane.b32.xlu0 %v4932_v4, %s6414_s10  ;;  %6364 = vsinq.f32 %v4401_v39  ;;  %vm4418_vm0 = vcmp.lt.s32.totalorder %v11282_v58, 0  ;;  %v11307_v10 = vld [vmem:[#allocation75_spill] sm:$0xff] }
 0x301   : > { %v6107_v24 = vadd.s32 4294967294, %v4484_v18  ;;  %v4472_v36 = vadd.s32 %v9716_v26, %v9713_v40  ;;  %v9898_v9 = vsel %vm4418_vm0, %v4502_v38, %v4478_v54  ;;  %v4574_v51 = vmul.u32 %v9820_v37, %v4558_v42  ;;  %v9909_v40 = vpop.permute.xlu1 %5779  ;;  %v9911_v26 = vpop.permute.xlu0 %3919 }
 0x302   : > { %v4629_v49 = vand.u32 8388607, %v10976_v22  ;;  %vm4576_vm8 = vc.u32 %v9849_v45, %v9884_v55  ;;  %v4639_v1 = vshll.u32 %v11110_v33, %v11306_v17  ;;  %v4640_v11 = vshrl.u32 %v11108_v14, %v11307_v10  ;;  %11308 = vst [vmem:[#allocation10_spill] sm:$0xff] %v9909_v40  ;;  %11309 = vst [vmem:[#allocation112_spill] sm:$0xff] %v9911_v26 }
 0x303   : > { %vm6108_vm14 = vcmp.lt.s32.totalorder %v6107_v24, 0  ;;  %vm4411_vm4 = vcmp.eq.s32.totalorder %v9881_v50, 2  ;;  %v4577_v37 = vadd.s32 1, %v9885_v34  ;;  %v4642_v19 = vshll.u32 %v11108_v14, %v11306_v17 }
 0x304   : > { %v4487_v54 = vsel %vm6108_vm14, 0, %v6107_v24  ;;  %v4643_v38 = vshrl.u32 %v11109_v57, %v11307_v10  ;;  %vm4408_vm13 = vcmp.eq.s32.totalorder %v9881_v50, 0  ;;  %v4638_v39 = vshrl.u32 %v11110_v33, %v11307_v10 }
 0x305   : > { %v4488_v42 = vsub.s32 32, %v4487_v54  ;;  %v4492_v4 = vsub.s32 4294967266, %v4487_v54  ;;  %v4645_v18 = vshll.u32 %v11109_v57, %v11306_v17  ;;  %vm4407_vm5 = vcmp.lt.s32.totalorder %v9881_v50, 2  ;;  %v9933_v17 = vpop.permute.xlu1 %5783  ;;  %v9935_v20 = vpop.permute.xlu0 %3923 }
 0x306   : > { %v4578_v24 = vsel %vm4576_vm8, %v4577_v37, %v9885_v34  ;;  %v4641_v31 = vor.u32 %v4640_v11, %v4639_v1  ;;  %v4644_v60 = vor.u32 %v4643_v38, %v4642_v19  ;;  %v4646_v28 = vshrl.u32 %v11022_v52, %v11307_v10  ;;  %11310 = vst [vmem:[#allocation114_spill] sm:$0xff] %v9933_v17  ;;  %v11313_v11 = vld [vmem:[#allocation92_spill] sm:$0xff] }
 0x307   : > { %vm4405_vm7 = vweird.f32 %v11272_v7  ;;  %v4489_v16 = vshll.u32 %v9816_v5, %v4487_v54  ;;  %v4490_v22 = vshrl.u32 %v4472_v36, %v4488_v42  ;;  %v4493_v46 = vadd.s32 127, %v4492_v4  ;;  %11311 = vst [vmem:[#allocation42_spill] sm:$0xff] %v9935_v20  ;;  %v11314_v37 = vld [vmem:[#allocation84_spill] sm:$0xff] }
 0x308   : > { %v4579_v23 = vadd.s32 %v4578_v24, %v4574_v51  ;;  %v4630_v56 = vor.u32 8388608, %v4629_v49  ;;  %v4647_v0 = vor.u32 %v4646_v28, %v4645_v18  ;;  %vm4654_vm12 = vcmp.lt.s32.totalorder %v11312_v30, 1  ;;  %v11315_v28 = vld [vmem:[#allocation91_spill] sm:$0xff] }
 0x309   : > { %vm4656_vm11 = vcmp.lt.s32.totalorder %v11312_v30, 3  ;;  %v4491_v34 = vor.u32 %v4490_v22, %v4489_v16  ;;  %v4494_v1 = vshll.u32 %v4493_v46, 23  ;;  %v9943_v36 = vpop.eup %6362  ;;  %vm4655_vm6 = vcmp.lt.s32.totalorder %v11312_v30, 2  ;;  %v9960_v42 = vpop.permute.xlu1 %5787 }
 0x30a   : > { %v4580_v10 = vadd.s32 536870912, %v4579_v23  ;;  %v4668_v5 = vsel %vm4656_vm11, %v11314_v37, %v11313_v11  ;;  %v4662_v51 = vsel %vm4654_vm12, %v4641_v31, %v4644_v60  ;;  %v4664_v49 = vsel %vm4656_vm11, %v4647_v0, %v11315_v28  ;;  %v9953_v16 = vpop.eup %6364  ;;  %11317 = vst [vmem:[#allocation41_spill] sm:$0xff] %v9960_v42  ;;  %v9962_v4 = vpop.permute.xlu0 %5781 }
 0x30b   : > { %v4666_v46 = vsel %vm4654_vm12, %v4644_v60, %v4647_v0  ;;  %v10985_v22 = vxor.u32 2147483648, %v9943_v36  ;;  %v4495_v54 = vor.u32 4788187, %v4494_v1  ;;  %vm11316_vm2 = vcmp.lt.s32.totalorder %v11312_v30, 4  ;;  %11318 = vst [vmem:[#allocation11_spill] sm:$0xff] %v9962_v4 }
 0x30c   : > { %v9956_v19 = vshrl.u32 %v4580_v10, 30  ;;  %v4659_v38 = vsel %vm11316_vm2, %v4647_v0, 2102212464  ;;  %v10987_v18 = vxor.u32 2147483648, %v9953_v16  ;;  %v4498_v24 = vcvt.s32.f32 %v4491_v34 }
 0x30d   : > { %v4669_v11 = vsel %vm4655_vm6, %v4666_v46, %v4668_v5  ;;  %v4670_v37 = vshll.u32 %v4630_v56, 8  ;;  %v4413_v1 = vsel %vm4411_vm4, %v10985_v22, %v9953_v16  ;;  %v4496_v10 = vand.u32 2147483647, %v4495_v54 }
 0x30e   : > { %v4582_v0 = vshll.u32 %v9956_v19, 30  ;;  %v4665_v28 = vsel %vm4655_vm6, %v4662_v51, %v4664_v49  ;;  %v4410_v34 = vsel %vm4408_vm13, %v9943_v36, %v10987_v18  ;;  %v4658_v56 = vsel %vm4654_vm12, %v4638_v39, %v4641_v31  ;;  %v9991_v49 = vpop.permute.xlu1 %5791  ;;  %v9993_v42 = vpop.permute.xlu0 %5785 }
 0x30f   : > { %v9982_v5 = vmul.u32.u64.low %v4670_v37, %v4669_v11  ;;  %v9983_v46 = vmul.u32.u64.high %v4670_v37, %v4669_v11, %v9982_v5  ;;  %v4414_v54 = vsel %vm4407_vm5, %v4410_v34, %v4413_v1  ;;  %v4499_v22 = vmul.f32 %v4498_v24, %v4496_v10  ;;  %11319 = vst [vmem:[#allocation17_spill] sm:$0xff] %v9991_v49  ;;  %11320 = vst [vmem:[#allocation22_spill] sm:$0xff] %v9993_v42  ;;  %v11324_v1 = vld [vmem:[#allocation109_spill] sm:$0xff] }
 0x310   : > { %v9987_v6 = vsub.s32 %v4579_v23, %v4582_v0  ;;  %v4660_v51 = vsel %vm4656_vm11, %v4644_v60, %v4659_v38  ;;  %v4415_v18 = vsel %vm4405_vm7, nan, %v4414_v54  ;;  %v11321_v31 = vand.u32 2147483647, %v11282_v58  ;;  %v11327_v54 = vld [vmem:[#allocation74_spill] sm:$0xff] }
 0x311   : > { %v10003_v50 = vmul.u32.u64.low %v4670_v37, %v4665_v28  ;;  %v10004_v24 = vmul.u32.u64.high %v4670_v37, %v4665_v28, %v10003_v50  ;;  %v4933_v23 = vmul.f32 %v9869_v3, %v4415_v18  ;;  %v4500_v60 = vxor.u32 2147483648, %v4499_v22 }
 0x312   : > { %vm9999_vm1 = vcmp.le.f32.partialorder %v11321_v31, 0.7853982  ;;  %v4585_v11 = vsub.s32 0, %v9987_v6  ;;  %v4855_v10 = vshrl.u32 %v11199_v47, %v11324_v1  ;;  %v10018_v0 = vshrl.u32 %v11201_v44, %v11324_v1  ;;  %v10034_v44 = vpop.permute.xlu1 %2089 }
 0x313   : > { %v10011_v38 = vsel %vm9999_vm1, 0, %v9898_v9  ;;  %v10022_v28 = vor.u32 %v9700_v41, %v9626_v61  ;;  %v4661_v18 = vsel %vm4655_vm6, %v4658_v56, %v4660_v51  ;;  %v4756_v9 = vor.u32 %v9890_v8, %v9630_v53  ;;  %5824 = vrot.lane.b32.xlu1 %v4933_v23, %s6414_s10  ;;  %v10036_v61 = vpop.permute.xlu0 %5789  ;;  %v11326_v56 = vld [vmem:[#allocation36_spill] sm:$0xff] }
 0x314   : > { %v4501_v34 = vsel %vm4418_vm0, %v4500_v60, %v4499_v22  ;;  %v6110_v47 = vmin.u32 %v4585_v11, %v9987_v6  ;;  %vm4679_vm9 = vc.u32 %v9983_v46, %v10003_v50  ;;  %11325 = vst [vmem:[#allocation18_spill] sm:$0xff] %v10036_v61  ;;  %vm4760_vm15 = vcmp.lt.s32.totalorder %v9602_v43, 4 }
 0x315   : > { %v4504_v53 = vsel %vm9999_vm1, %v11282_v58, %v4501_v34  ;;  %v10043_v41 = vand.u32 3, %v10011_v38  ;;  %v4680_v30 = vadd.s32 1, %v10004_v24  ;;  %v4677_v22 = vmul.u32 %v4670_v37, %v4661_v18 }
 0x316   : > { %6366 = vcosq.f32 %v4504_v53  ;;  %v4587_v8 = vclz %v6110_v47  ;;  %v10988_v5 = vand.u32 2147483647, %v11326_v56  ;;  %v10048_v51 = vor.u32 %v4855_v10, %v11327_v54  ;;  %v10059_v18 = vpop.permute.xlu1 %2093 }
 0x317   : > { %v4766_v31 = vsel %vm4760_vm15, %v10022_v28, 920167782  ;;  %6368 = vsinq.f32 %v4504_v53  ;;  %v4681_v39 = vsel %vm4679_vm9, %v4680_v30, %v10004_v24  ;;  %v4770_v23 = vsel %vm4760_vm15, %v4756_v9, 1326507024  ;;  %v10057_v37 = vpop.permute.xlu0 %5793 }
 0x318   : > { %v6111_v60 = vadd.s32 4294967294, %v4587_v8  ;;  %v4605_v11 = vsub.s32 4, %v9956_v19  ;;  %v4682_v34 = vadd.s32 %v4681_v39, %v4677_v22  ;;  %11328 = vst [vmem:[#allocation20_spill] sm:$0xff] %v10057_v37  ;;  %vm4521_vm0 = vcmp.lt.s32.totalorder %v11293_v21, 0 }
 0x319   : > { %v4575_v10 = vadd.s32 %v9884_v55, %v9849_v45  ;;  %v4743_v47 = vshrl.u32 %v11108_v14, %v9606_v15  ;;  %v4746_v24 = vshrl.u32 %v11109_v57, %v9606_v15  ;;  %vm4514_vm14 = vcmp.eq.s32.totalorder %v10043_v41, 2 }
 0x31a   : > { %vm6112_vm8 = vcmp.lt.s32.totalorder %v6111_v60, 0  ;;  %v4683_v9 = vadd.s32 536870912, %v4682_v34  ;;  %v4732_v53 = vand.u32 8388607, %v10988_v5  ;;  %v4749_v30 = vshrl.u32 %v11022_v52, %v9606_v15  ;;  %v10088_v49 = vpop.permute.xlu1 %2097 }
 0x31b   : > { %vm4511_vm4 = vcmp.eq.s32.totalorder %v10043_v41, 0  ;;  %v4590_v8 = vsel %vm6112_vm8, 0, %v6111_v60  ;;  %v4742_v45 = vshll.u32 %v11110_v33, %v9509_v48  ;;  %v4745_v55 = vshll.u32 %v11108_v14, %v9509_v48  ;;  %v10086_v60 = vpop.permute.xlu0 %2091 }
 0x31c   : > { %v4748_v22 = vshll.u32 %v11109_v57, %v9509_v48  ;;  %vm4510_vm13 = vcmp.lt.s32.totalorder %v10043_v41, 2  ;;  %v4591_v54 = vsub.s32 32, %v4590_v8  ;;  %v4595_v39 = vsub.s32 4294967266, %v4590_v8 }
 0x31d   : > { %v4606_v5 = vsel %vm4521_vm0, %v4605_v11, %v9956_v19  ;;  %v10084_v37 = vshrl.u32 %v4683_v9, 30  ;;  %vm4508_vm5 = vweird.f32 %v11282_v58  ;;  %v4741_v61 = vshrl.u32 %v11110_v33, %v9606_v15 }
 0x31e   : > { %v4744_v48 = vor.u32 %v4743_v47, %v4742_v45  ;;  %v4747_v42 = vor.u32 %v4746_v24, %v4745_v55  ;;  %v4750_v17 = vor.u32 %v4749_v30, %v4748_v22  ;;  %v4592_v4 = vshll.u32 %v9987_v6, %v4590_v8 }
 0x31f   : > { %v4593_v40 = vshrl.u32 %v4575_v10, %v4591_v54  ;;  %v4596_v20 = vadd.s32 127, %v4595_v39  ;;  %v4685_v19 = vshll.u32 %v10084_v37, 30  ;;  %v4733_v11 = vor.u32 8388608, %v4732_v53  ;;  %v10105_v10 = vpop.permute.xlu0 %2095  ;;  %v10107_v53 = vpop.permute.xlu1 %2101 }
 0x320   : > { %vm4757_vm12 = vcmp.lt.s32.totalorder %v9602_v43, 1  ;;  %vm4758_vm11 = vcmp.lt.s32.totalorder %v9602_v43, 2  ;;  %vm4759_vm6 = vcmp.lt.s32.totalorder %v9602_v43, 3  ;;  %v10098_v9 = vpop.eup %6366  ;;  %vm4863_vm2 = vcmp.lt.s32.totalorder %v11329_v27, 4 }
 0x321   : > { %v4594_v15 = vor.u32 %v4593_v40, %v4592_v4  ;;  %v4597_v47 = vshll.u32 %v4596_v20, 23  ;;  %v10101_v24 = vsub.s32 %v4682_v34, %v4685_v19  ;;  %v4762_v6 = vsel %vm4760_vm15, %v4750_v17, 2102212464  ;;  %v10109_v30 = vpop.eup %6368 }
 0x322   : > { %v10989_v8 = vxor.u32 2147483648, %v10098_v9  ;;  %v4765_v45 = vsel %vm4757_vm12, %v4744_v48, %v4747_v42  ;;  %v4769_v40 = vsel %vm4757_vm12, %v4747_v42, %v4750_v17  ;;  %v4771_v20 = vsel %vm4759_vm6, %v10022_v28, %v4770_v23 }
 0x323   : > { %v10990_v4 = vxor.u32 2147483648, %v10109_v30  ;;  %v4598_v34 = vor.u32 4788187, %v4597_v47  ;;  %v4688_v55 = vsub.s32 0, %v10101_v24  ;;  %v4767_v22 = vsel %vm4759_vm6, %v4750_v17, %v4766_v31 }
 0x324   : > { %v4516_v54 = vsel %vm4514_vm14, %v10989_v8, %v10109_v30  ;;  %v4601_v39 = vcvt.s32.f32 %v4594_v15  ;;  %v4761_v19 = vsel %vm4757_vm12, %v4741_v61, %v4744_v48  ;;  %v4763_v28 = vsel %vm4759_vm6, %v4747_v42, %v4762_v6  ;;  %v10140_v8 = vpop.permute.xlu0 %2099  ;;  %v10142_v15 = vpop.permute.xlu1 %2130 }
 0x325   : > { %v4513_v23 = vsel %vm4511_vm4, %v10098_v9, %v10990_v4  ;;  %v4599_v17 = vand.u32 2147483647, %v4598_v34  ;;  %v6114_v31 = vmin.u32 %v4688_v55, %v10101_v24  ;;  %v4772_v47 = vsel %vm4758_vm11, %v4769_v40, %v4771_v20 }
 0x326   : > { %v4517_v61 = vsel %vm4510_vm13, %v4513_v23, %v4516_v54  ;;  %v11330_v42 = vand.u32 2147483647, %v11293_v21  ;;  %v4768_v6 = vsel %vm4758_vm11, %v4765_v45, %v4767_v22  ;;  %v4773_v34 = vshll.u32 %v4733_v11, 8 }
 0x327   : > { %v4518_v40 = vsel %vm4508_vm5, nan, %v4517_v61  ;;  %v4602_v20 = vmul.f32 %v4601_v39, %v4599_v17  ;;  %v4690_v41 = vclz %v6114_v31  ;;  %v4764_v23 = vsel %vm4758_vm11, %v4761_v19, %v4763_v28  ;;  %v11335_v28 = vld [vmem:[#allocation72_spill] sm:$0xff] }
 0x328   : > { %vm10148_vm1 = vcmp.le.f32.partialorder %v11330_v42, 0.7853982  ;;  %v4934_v54 = vmul.f32 %v9869_v3, %v4518_v40  ;;  %v10163_v42 = vmul.u32.u64.low %v4773_v34, %v4772_v47  ;;  %v10164_v4 = vmul.u32.u64.high %v4773_v34, %v4772_v47, %v10163_v42  ;;  %v10170_v39 = vpop.permute.xlu0 %2103  ;;  %v10172_v17 = vpop.permute.xlu1 %2134 }
 0x329   : > { %v10158_v55 = vsel %vm10148_vm1, 0, %v4606_v5  ;;  %v4603_v26 = vxor.u32 2147483648, %v4602_v20  ;;  %v6115_v45 = vadd.s32 4294967294, %v4690_v41  ;;  %11333 = vst [vmem:[#allocation33_spill] sm:$0xff] %v10172_v17  ;;  %v11334_v5 = vld [vmem:[#allocation55_spill] sm:$0xff]  ;;  %v4780_v40 = vmul.u32 %v4773_v34, %v4764_v23 }
 0x32a   : > { %v10166_v11 = vmul.u32.u64.low %v4773_v34, %v4768_v6  ;;  %v10167_v22 = vmul.u32.u64.high %v4773_v34, %v4768_v6, %v10166_v11  ;;  %v4859_v31 = vor.u32 %v10018_v0, %v11334_v5  ;;  %v4869_v43 = vsel %vm4863_vm2, %v10048_v51, 920167782  ;;  %5826 = vrot.lane.b32.xlu0 %v4934_v54, %s6414_s10  ;;  %v11336_v42 = vld [vmem:[#allocation103_spill] sm:$0xff] }
 0x32b   : > { %v10181_v19 = vand.u32 3, %v10158_v55  ;;  %v4604_v61 = vsel %vm4521_vm0, %v4603_v26, %v4602_v20  ;;  %v4678_v6 = vadd.s32 %v10003_v50, %v9983_v46  ;;  %vm6116_vm9 = vcmp.lt.s32.totalorder %v6115_v45, 0 }
 0x32c   : > { %v4607_v0 = vsel %vm10148_vm1, %v11293_v21, %v4604_v61  ;;  %v4693_v41 = vsel %vm6116_vm9, 0, %v6115_v45  ;;  %v4845_v54 = vshll.u32 %v11110_v33, %v11336_v42  ;;  %v4846_v5 = vshrl.u32 %v11108_v14, %v11324_v1  ;;  %v10197_v26 = vpop.permute.xlu0 %2132  ;;  %v10199_v46 = vpop.permute.xlu1 %2138 }
 0x32d   : > { %6370 = vcosq.f32 %v4607_v0  ;;  %v4694_v47 = vsub.s32 32, %v4693_v41  ;;  %v4698_v62 = vsub.s32 4294967266, %v4693_v41  ;;  %vm4782_vm15 = vc.u32 %v10164_v4, %v10166_v11  ;;  %11337 = vst [vmem:[#allocation34_spill] sm:$0xff] %v10199_v46 }
 0x32e   : > { %6372 = vsinq.f32 %v4607_v0  ;;  %v4783_v50 = vadd.s32 1, %v10167_v22  ;;  %v11338_v48 = vand.u32 2147483647, %v11335_v28  ;;  %v4848_v20 = vshll.u32 %v11108_v14, %v11336_v42 }
 0x32f   : > { %v4695_v23 = vshll.u32 %v10101_v24, %v4693_v41  ;;  %v4696_v45 = vshrl.u32 %v4678_v6, %v4694_v47  ;;  %v4699_v61 = vadd.s32 127, %v4698_v62  ;;  %v4849_v29 = vshrl.u32 %v11109_v57, %v11324_v1 }
 0x330   : > { %v4835_v34 = vand.u32 8388607, %v11338_v48  ;;  %v4784_v12 = vsel %vm4782_vm15, %v4783_v50, %v10167_v22  ;;  %v4847_v25 = vor.u32 %v4846_v5, %v4845_v54  ;;  %v4851_v0 = vshll.u32 %v11109_v57, %v11336_v42  ;;  %v10214_v17 = vpop.permute.xlu0 %2136  ;;  %v10216_v24 = vpop.permute.xlu1 %2142 }
 0x331   : > { %v4852_v35 = vshrl.u32 %v11022_v52, %v11324_v1  ;;  %v4697_v48 = vor.u32 %v4696_v45, %v4695_v23  ;;  %v4700_v28 = vshll.u32 %v4699_v61, 23  ;;  %v4785_v46 = vadd.s32 %v4784_v12, %v4780_v40 }
 0x332   : > { %v4850_v14 = vor.u32 %v4849_v29, %v4848_v20  ;;  %v4873_v62 = vsel %vm4863_vm2, %v4859_v31, 1326507024  ;;  %vm4624_vm0 = vcmp.lt.s32.totalorder %v11303_v63, 0  ;;  %v4836_v22 = vor.u32 8388608, %v4835_v34 }
 0x333   : > { %v4853_v47 = vor.u32 %v4852_v35, %v4851_v0  ;;  %vm4613_vm14 = vcmp.lt.s32.totalorder %v10181_v19, 2  ;;  %v11339_v57 = vand.u32 2147483647, %v11303_v63  ;;  %v4701_v12 = vor.u32 4788187, %v4700_v28 }
 0x334   : > { %v4786_v29 = vadd.s32 536870912, %v4785_v46  ;;  %vm4860_vm4 = vcmp.lt.s32.totalorder %v11329_v27, 1  ;;  %vm4862_vm13 = vcmp.lt.s32.totalorder %v11329_v27, 3  ;;  %vm4614_vm12 = vcmp.eq.s32.totalorder %v10181_v19, 0  ;;  %v10241_v54 = vpop.permute.xlu0 %2140  ;;  %v10243_v5 = vpop.permute.xlu1 %3950 }
 0x335   : > { %vm10224_vm8 = vcmp.le.f32.partialorder %v11339_v57, 0.7853982  ;;  %v4868_v31 = vsel %vm4860_vm4, %v4847_v25, %v4850_v14  ;;  %v4870_v35 = vsel %vm4862_vm13, %v4853_v47, %v4869_v43  ;;  %v4872_v6 = vsel %vm4860_vm4, %v4850_v14, %v4853_v47 }
 0x336   : > { %v4702_v40 = vand.u32 2147483647, %v4701_v12  ;;  %v4704_v41 = vcvt.s32.f32 %v4697_v48  ;;  %v10237_v42 = vshrl.u32 %v4786_v29, 30  ;;  %v4844_v28 = vshrl.u32 %v11110_v33, %v11324_v1 }
 0x337   : > { %vm4861_vm11 = vcmp.lt.s32.totalorder %v11329_v27, 2  ;;  %v4865_v50 = vsel %vm4863_vm2, %v4853_v47, 2102212464  ;;  %v4874_v43 = vsel %vm4862_vm13, %v10048_v51, %v4873_v62  ;;  %v4876_v34 = vshll.u32 %v4836_v22, 8  ;;  %v10251_v20 = vpop.eup %6370 }
 0x338   : > { %v4705_v23 = vmul.f32 %v4704_v41, %v4702_v40  ;;  %v4788_v45 = vshll.u32 %v10237_v42, 30  ;;  %v4871_v33 = vsel %vm4861_vm11, %v4868_v31, %v4870_v35  ;;  %v4875_v1 = vsel %vm4861_vm11, %v4872_v6, %v4874_v43  ;;  %v10258_v61 = vpop.eup %6372  ;;  %v10268_v12 = vpop.permute.xlu0 %2144 }
 0x339   : > { %vm4617_vm6 = vcmp.eq.s32.totalorder %v10181_v19, 2  ;;  %v10992_v0 = vxor.u32 2147483648, %v10251_v20  ;;  %v10262_v48 = vmul.u32.u64.low %v4876_v34, %v4875_v1  ;;  %v10263_v51 = vmul.u32.u64.high %v4876_v34, %v4875_v1, %v10262_v48  ;;  %v10279_v40 = vpop.permute.xlu1 %3954 }
 0x33a   : > { %v10993_v62 = vxor.u32 2147483648, %v10258_v61  ;;  %v4706_v22 = vxor.u32 2147483648, %v4705_v23  ;;  %v4789_v47 = vsub.s32 %v4785_v46, %v4788_v45  ;;  %v4864_v57 = vsel %vm4860_vm4, %v4844_v28, %v4847_v25 }
 0x33b   : > { %v4619_v29 = vsel %vm4617_vm6, %v10992_v0, %v10258_v61  ;;  %v4866_v31 = vsel %vm4862_vm13, %v4850_v14, %v4865_v50  ;;  %v10275_v35 = vmul.u32.u64.low %v4876_v34, %v4871_v33  ;;  %v10276_v6 = vmul.u32.u64.high %v4876_v34, %v4871_v33, %v10275_v35 }
 0x33c   : > { %v4616_v25 = vsel %vm4614_vm12, %v10251_v20, %v10993_v62  ;;  %v4707_v46 = vsel %vm4624_vm0, %v4706_v22, %v4705_v23  ;;  %v4708_v41 = vsub.s32 4, %v10084_v37  ;;  %v4791_v28 = vsub.s32 0, %v4789_v47  ;;  %v10299_v33 = vpop.permute.xlu0 %3952 }
 0x33d   : > { %vm4611_vm2 = vweird.f32 %v11293_v21  ;;  %v4620_v14 = vsel %vm4613_vm14, %v4616_v25, %v4619_v29  ;;  %v4710_v50 = vsel %vm10224_vm8, %v11303_v63, %v4707_v46  ;;  %v4867_v23 = vsel %vm4861_vm11, %v4864_v57, %v4866_v31  ;;  %v10309_v27 = vpop.permute.xlu1 %3958 }
 0x33e   : > { %v4621_v43 = vsel %vm4611_vm2, nan, %v4620_v14  ;;  %6374 = vcosq.f32 %v4710_v50  ;;  %v6118_v45 = vmin.u32 %v4791_v28, %v4789_v47  ;;  %vm4885_vm1 = vc.u32 %v10263_v51, %v10275_v35 }
 0x33f   : > { %v4935_v1 = vmul.f32 %v9869_v3, %v4621_v43  ;;  %6376 = vsinq.f32 %v4710_v50  ;;  %v4709_v19 = vsel %vm4624_vm0, %v4708_v41, %v10084_v37  ;;  %v4886_v22 = vadd.s32 1, %v10276_v6 }
 0x340   : > { %v4793_v48 = vclz %v6118_v45  ;;  %v4883_v29 = vmul.u32 %v4876_v34, %v4867_v23  ;;  %v10312_v25 = vpop.permute.xlu0 %3956  ;;  %v10316_v46 = vsel %vm10224_vm8, 0, %v4709_v19  ;;  %v4781_v34 = vadd.s32 %v10166_v11, %v10164_v4 }
 0x341   : > { %5828 = vrot.lane.b32.xlu1 %v4935_v1, %s6414_s10  ;;  %v4887_v31 = vsel %vm4885_vm1, %v4886_v22, %v10276_v6  ;;  %v4715_v14 = vand.u32 3, %v10316_v46  ;;  %v10325_v23 = vpop.permute.xlu1 %3962  ;;  %v5240_v22 = vadd.s32 3, %v9855_v59  ;;  %vm4714_vm15 = vweird.f32 %v11303_v63 }
 0x342   : > { %v6119_v57 = vadd.s32 4294967294, %v4793_v48  ;;  %v4888_v28 = vadd.s32 %v4887_v31, %v4883_v29  ;;  %vm4727_vm4 = vcmp.lt.s32.totalorder %v11326_v56, 0 }
 0x343   : > { %vm4720_vm0 = vcmp.eq.s32.totalorder %v4715_v14, 2  ;;  %vm4717_vm14 = vcmp.eq.s32.totalorder %v4715_v14, 0  ;;  %vm4716_vm8 = vcmp.lt.s32.totalorder %v4715_v14, 2  ;;  %v11357_v14 = vld [vmem:[#allocation9_spill] sm:$0xff] }
 0x344   : > { %vm6120_vm9 = vcmp.lt.s32.totalorder %v6119_v57, 0  ;;  %v4889_v41 = vadd.s32 536870912, %v4888_v28  ;;  %v10321_v45 = vpop.permute.xlu0 %3960 }
 0x345   : > { %v4796_v37 = vsel %vm6120_vm9, 0, %v6119_v57  ;;  %v5344_v57 = vadd.s32 3, %v10011_v38  ;;  %v10350_v62 = vpop.permute.xlu1 %3991 }
 0x346   : > { %v4797_v50 = vsub.s32 32, %v4796_v37  ;;  %v4801_v43 = vsub.s32 4294967266, %v4796_v37  ;;  %v10323_v6 = vshrl.u32 %v4889_v41, 30  ;;  %v4798_v1 = vshll.u32 %v4789_v47, %v4796_v37 }
 0x348   : > { %v10327_v52 = vpop.eup %6374  ;;  %v4799_v19 = vshrl.u32 %v4781_v34, %v4797_v50  ;;  %v4802_v48 = vadd.s32 127, %v4801_v43  ;;  %v4891_v11 = vshll.u32 %v10323_v6, 30  ;;  %v10337_v47 = vpop.permute.xlu0 %3964  ;;  %v5448_v34 = vadd.s32 3, %v10158_v55 }
 0x349   : > { %v10330_v29 = vpop.eup %6376  ;;  %v10994_v4 = vxor.u32 2147483648, %v10327_v52  ;;  %v5241_v43 = vand.u32 3, %v5240_v22  ;;  %v11342_v55 = vand.u32 2147483647, %v11326_v56 }
 0x34a   : > { %v10995_v31 = vxor.u32 2147483648, %v10330_v29  ;;  %v4800_v41 = vor.u32 %v4799_v19, %v4798_v1  ;;  %v4803_v0 = vshll.u32 %v4802_v48, 23  ;;  %v10342_v37 = vsub.s32 %v4888_v28, %v4891_v11 }
 0x34b   : > { %v4722_v59 = vsel %vm4720_vm0, %v10994_v4, %v10330_v29  ;;  %v5345_v48 = vand.u32 3, %v5344_v57  ;;  %vm10356_vm13 = vcmp.le.f32.partialorder %v11342_v55, 0.7853982  ;;  %v5449_v4 = vand.u32 3, %v5448_v34 }
 0x34c   : > { %v4719_v38 = vsel %vm4717_vm14, %v10327_v52, %v10995_v31  ;;  %v4804_v50 = vor.u32 4788187, %v4803_v0  ;;  %v4894_v19 = vsub.s32 0, %v10342_v37  ;;  %v4807_v0 = vcvt.s32.f32 %v4800_v41  ;;  %v10360_v22 = vpop.permute.xlu0 %3993 }
 0x34d   : > { %v4723_v1 = vsel %vm4716_vm8, %v4719_v38, %v4722_v59  ;;  %v4811_v38 = vsub.s32 4, %v10237_v42  ;;  %vm5242_vm12 = vcmp.lt.s32.totalorder %v5241_v43, 2  ;;  %vm5243_vm11 = vcmp.eq.s32.totalorder %v5241_v43, 0 }
 0x34e   : > { %v4724_v28 = vsel %vm4714_vm15, nan, %v4723_v1  ;;  %v4805_v11 = vand.u32 2147483647, %v4804_v50  ;;  %v6122_v57 = vmin.u32 %v4894_v19, %v10342_v37  ;;  %vm5246_vm6 = vcmp.eq.s32.totalorder %v5241_v43, 2 }
 0x34f   : > { %v4936_v59 = vmul.f32 %v9869_v3, %v4724_v28  ;;  %v11345_v50 = vxor.u32 2147483648, %v9953_v16  ;;  %v11346_v3 = vxor.u32 2147483648, %v9943_v36  ;;  %vm5346_vm1 = vcmp.lt.s32.totalorder %v5345_v48, 2 }
 0x350   : > { %v4808_v31 = vmul.f32 %v4807_v0, %v4805_v11  ;;  %v4896_v1 = vclz %v6122_v57  ;;  %vm5347_vm9 = vcmp.eq.s32.totalorder %v5345_v48, 0  ;;  %vm5350_vm0 = vcmp.eq.s32.totalorder %v5345_v48, 2 }
 0x351   : > { %5830 = vrot.lane.b32.xlu0 %v4936_v59, %s6414_s10  ;;  %v5245_v41 = vsel %vm5243_vm11, %v9943_v36, %v11345_v50  ;;  %v5248_v28 = vsel %vm5246_vm6, %v11346_v3, %v9953_v16  ;;  %v11347_v11 = vxor.u32 2147483648, %v10109_v30  ;;  %v11348_v59 = vxor.u32 2147483648, %v10098_v9  ;;  %v10382_v36 = vpop.permute.xlu1 %3995  ;;  %v10384_v16 = vpop.permute.xlu0 %3997 }
 0x352   : > { %v4809_v55 = vxor.u32 2147483648, %v4808_v31  ;;  %v5249_v19 = vsel %vm5242_vm12, %v5245_v41, %v5248_v28  ;;  %v6123_v34 = vadd.s32 4294967294, %v4896_v1  ;;  %v4812_v7 = vsel %vm4727_vm4, %v4811_v38, %v10237_v42 }
 0x353   : > { %v10374_v43 = vsel %vm4405_vm7, nan, %v5249_v19  ;;  %v5349_v0 = vsel %vm5347_vm9, %v10098_v9, %v11347_v11  ;;  %v5352_v57 = vsel %vm5350_vm0, %v11348_v59, %v10109_v30  ;;  %v5552_v50 = vadd.s32 3, %v10316_v46  ;;  %v11351_v59 = vld [vmem:[#allocation3_spill] sm:$0xff] }
 0x354   : > { %v4810_v48 = vsel %vm4727_vm4, %v4809_v55, %v4808_v31  ;;  %v5353_v1 = vsel %vm5346_vm1, %v5349_v0, %v5352_v57  ;;  %v4884_v30 = vadd.s32 %v10275_v35, %v10263_v51  ;;  %vm6124_vm7 = vcmp.lt.s32.totalorder %v6123_v34, 0  ;;  %v11352_v57 = vld [vmem:[#allocation5_spill] sm:$0xff] }
 0x355   : > { %v4813_v9 = vsel %vm10356_vm13, %v11326_v56, %v4810_v48  ;;  %v10400_v41 = vsel %vm4508_vm5, nan, %v5353_v1  ;;  %v4899_v31 = vsel %vm6124_vm7, 0, %v6123_v34  ;;  %v5032_v3 = vadd.s32 3, %v9619_v2  ;;  %v10415_v34 = vpop.permute.xlu1 %3999  ;;  %v10417_v11 = vpop.permute.xlu0 %4001  ;;  %v11355_v48 = vld [vmem:[#allocation7_spill] sm:$0xff]  ;;  %v11356_v1 = vld [vmem:[#allocation6_spill] sm:$0xff] }
 0x356   : > { %6378 = vcosq.f32 %v4813_v9  ;;  %vm5451_vm14 = vcmp.eq.s32.totalorder %v5449_v4, 0  ;;  %v4900_v42 = vsub.s32 32, %v4899_v31  ;;  %v4904_v46 = vsub.s32 4294967266, %v4899_v31 }
 0x357   : > { %6380 = vsinq.f32 %v4813_v9  ;;  %v11349_v51 = vxor.u32 2147483648, %v10258_v61  ;;  %v4901_v35 = vshll.u32 %v10342_v37, %v4899_v31  ;;  %vm5450_vm5 = vcmp.lt.s32.totalorder %v5449_v4, 2 }
 0x358   : > { %vm5454_vm8 = vcmp.eq.s32.totalorder %v5449_v4, 2  ;;  %v5553_v2 = vand.u32 3, %v5552_v50  ;;  %v4902_v38 = vshrl.u32 %v4884_v30, %v4900_v42  ;;  %v4905_v28 = vadd.s32 127, %v4904_v46 }
 0x359   : > { %v5453_v58 = vsel %vm5451_vm14, %v10251_v20, %v11349_v51  ;;  %v11350_v55 = vxor.u32 2147483648, %v10251_v20  ;;  %vm2072_vm4 = vcmask 31744   ;;  %v10421_v37 = vsel %vm10356_vm13, 0, %v4812_v7  ;;  %v11353_v20 = vld [vmem:[#allocation2_spill] sm:$0xff]  ;;  %v11358_v7 = vld [vmem:[#allocation8_spill] sm:$0xff] }
 0x35a   : > { %v10423_v4 = vand.u32 3, %v5032_v3  ;;  %vm5555_vm12 = vcmp.eq.s32.totalorder %v5553_v2, 0  ;;  %2073 = vst.msk [vmem:[%s10406_s17] sm:$0xff] %vm2072_vm4, %v11351_v59  ;;  %2074 = vst.msk [vmem:[%s10406_s17 + $0x10] sm:$0xff] %vm2072_vm4, %v11352_v57  ;;  %v4903_v50 = vor.u32 %v4902_v38, %v4901_v35  ;;  %v4906_v9 = vshll.u32 %v4905_v28, 23  ;;  %v11363_v38 = vld [vmem:[#allocation33_spill] sm:$0xff] }
 0x35b   : > { %v5456_v19 = vsel %vm5454_vm8, %v11350_v55, %v10258_v61  ;;  %2075 = vst.msk [vmem:[%s10406_s17 + $0x20] sm:$0xff] %vm2072_vm4, %v11353_v20  ;;  %v11354_v61 = vld [vmem:[#allocation4_spill] sm:$0xff]  ;;  %2077 = vst.msk [vmem:[%s10406_s17 + $0x40] sm:$0xff] %vm2072_vm4, %v11355_v48  ;;  %v11359_v30 = vxor.u32 2147483648, %v10330_v29  ;;  %vm5558_vm13 = vcmp.eq.s32.totalorder %v5553_v2, 2  ;;  %vm5554_vm11 = vcmp.lt.s32.totalorder %v5553_v2, 2 }
 0x35c   : > { %v10425_v0 = vsel %vm5450_vm5, %v5453_v58, %v5456_v19  ;;  %2076 = vst.msk [vmem:[%s10406_s17 + $0x30] sm:$0xff] %vm2072_vm4, %v11354_v61  ;;  %2078 = vst.msk [vmem:[%s10406_s17 + $0x50] sm:$0xff] %vm2072_vm4, %v11356_v1  ;;  %v11360_v3 = vxor.u32 2147483648, %v10327_v52  ;;  %v4907_v46 = vor.u32 4788187, %v4906_v9  ;;  %vm2113_vm6 = vcmask 293920  }
 0x35d   : > { %2079 = vst.msk [vmem:[%s10406_s17 + $0x60] sm:$0xff] %vm2072_vm4, %v11357_v14  ;;  %2080 = vst.msk [vmem:[%s10406_s17 + $0x70] sm:$0xff] %vm2072_vm4, %v11358_v7  ;;  %v5557_v31 = vsel %vm5555_vm12, %v10327_v52, %v11359_v30  ;;  %vm4817_vm1 = vweird.f32 %v11326_v56  ;;  %v10453_v58 = vand.u32 3, %v10421_v37  ;;  %vm5035_vm9 = vcmp.eq.s32.totalorder %v10423_v4, 0  ;;  %v11371_v28 = vld [vmem:[#allocation112_spill] sm:$0xff]  ;;  %v11372_v55 = vld [vmem:[#allocation93_spill] sm:$0xff] }
 0x35e   : > { %v5560_v42 = vsel %vm5558_vm13, %v11360_v3, %v10330_v29  ;;  %2114 = vst.msk [vmem:[%s10406_s17] sm:$0xff] %vm2113_vm6, %v10034_v44  ;;  %2115 = vst.msk [vmem:[%s10406_s17 + $0x10] sm:$0xff] %vm2113_vm6, %v10086_v60  ;;  %v4908_v52 = vand.u32 2147483647, %v4907_v46  ;;  %v4910_v29 = vcvt.s32.f32 %v4903_v50  ;;  %v11361_v44 = vxor.u32 2147483648, %v9732_v32  ;;  %v10480_v60 = vpop.permute.xlu0 %4005  ;;  %v11373_v19 = vld [vmem:[#allocation42_spill] sm:$0xff] }
 0x35f   : > { %v10449_v51 = vsel %vm5554_vm11, %v5557_v31, %v5560_v42  ;;  %2116 = vst.msk [vmem:[%s10406_s17 + $0x20] sm:$0xff] %vm2113_vm6, %v10059_v18  ;;  %2117 = vst.msk [vmem:[%s10406_s17 + $0x30] sm:$0xff] %vm2113_vm6, %v10105_v10  ;;  %vm5038_vm0 = vcmp.eq.s32.totalorder %v10423_v4, 2  ;;  %vm2154_vm7 = vcmask 556320   ;;  %vm3933_vm14 = vcmask 589344   ;;  %v11386_v9 = vld [vmem:[#allocation61_spill] sm:$0xff] }
 0x360   : > { %2118 = vst.msk [vmem:[%s10406_s17 + $0x40] sm:$0xff] %vm2113_vm6, %v10088_v49  ;;  %2119 = vst.msk [vmem:[%s10406_s17 + $0x50] sm:$0xff] %vm2113_vm6, %v10140_v8  ;;  %v10475_v18 = vsel %vm5035_vm9, %v9725_v13, %v11361_v44  ;;  %v10478_v49 = vpop.permute.xlu1 %4003  ;;  %v10482_v10 = vpop.eup %6378  ;;  %vm3974_vm5 = vcmask 851520   ;;  %v10490_v2 = vmul.f32 %v4910_v29, %v4908_v52  ;;  %vm4015_vm8 = vcmask 1048384  }
 0x361   : > { %2120 = vst.msk [vmem:[%s10406_s17 + $0x60] sm:$0xff] %vm2113_vm6, %v10107_v53  ;;  %2121 = vst.msk [vmem:[%s10406_s17 + $0x70] sm:$0xff] %vm2113_vm6, %v10170_v39  ;;  %v11362_v53 = vxor.u32 2147483648, %v9725_v13  ;;  %v10487_v39 = vpop.eup %6380  ;;  %v4824_v35 = vxor.u32 2147483648, %v10482_v10  ;;  %v11364_v13 = vld [vmem:[#allocation34_spill] sm:$0xff]  ;;  %vm4017_vm4 = vcmask 64512  }
 0x362   : > { %2155 = vst.msk [vmem:[%s10406_s17] sm:$0xff] %vm2154_vm7, %v10142_v15  ;;  %2156 = vst.msk [vmem:[%s10406_s17 + $0x10] sm:$0xff] %vm2154_vm7, %v10197_v26  ;;  %vm4823_vm12 = vcmp.eq.s32.totalorder %v10453_v58, 2  ;;  %v11365_v15 = vld [vmem:[#allocation72_spill] sm:$0xff]  ;;  %v11367_v26 = vld [vmem:[#allocation87_spill] sm:$0xff]  ;;  %vm5803_vm11 = vcmask 97344  }
 0x363   : > { %v5040_v8 = vsel %vm5038_vm0, %v11362_v53, %v9732_v32  ;;  %2157 = vst.msk [vmem:[%s10406_s17 + $0x20] sm:$0xff] %vm2154_vm7, %v11363_v38  ;;  %2158 = vst.msk [vmem:[%s10406_s17 + $0x30] sm:$0xff] %vm2154_vm7, %v10214_v17  ;;  %v4821_v32 = vxor.u32 2147483648, %v10487_v39  ;;  %vm4830_vm13 = vcmp.lt.s32.totalorder %v11365_v15, 0  ;;  %v11366_v17 = vld [vmem:[#allocation65_spill] sm:$0xff]  ;;  %vm4820_vm6 = vcmp.eq.s32.totalorder %v10453_v58, 0 }
 0x364   : > { %2159 = vst.msk [vmem:[%s10406_s17 + $0x40] sm:$0xff] %vm2154_vm7, %v11364_v13  ;;  %2160 = vst.msk [vmem:[%s10406_s17 + $0x50] sm:$0xff] %vm2154_vm7, %v10241_v54  ;;  %v11369_v54 = vld [vmem:[#allocation100_spill] sm:$0xff]  ;;  %v4825_v59 = vsel %vm4823_vm12, %v4824_v35, %v10487_v39  ;;  %v4912_v57 = vxor.u32 2147483648, %v10490_v2  ;;  %vm5034_vm9 = vcmp.lt.s32.totalorder %v10423_v4, 2  ;;  %vm4819_vm0 = vcmp.lt.s32.totalorder %v10453_v58, 2  ;;  %v5821_v3 = vpop.permute.xlu1 %5820 }
 0x365   : > { %2161 = vst.msk [vmem:[%s10406_s17 + $0x60] sm:$0xff] %vm2154_vm7, %v10216_v24  ;;  %2162 = vst.msk [vmem:[%s10406_s17 + $0x70] sm:$0xff] %vm2154_vm7, %v10268_v12  ;;  %v11368_v24 = vld [vmem:[#allocation78_spill] sm:$0xff]  ;;  %v11370_v12 = vld [vmem:[#allocation56_spill] sm:$0xff]  ;;  %v4822_v20 = vsel %vm4820_vm6, %v10482_v10, %v4821_v32  ;;  %v11382_v61 = vand.u32 2147483647, %v11365_v15  ;;  %v5041_v1 = vsel %vm5034_vm9, %v10475_v18, %v5040_v8  ;;  %vm4920_vm9 = vweird.f32 %v11365_v15 }
 0x366   : > { %3934 = vst.msk [vmem:[%s10406_s17] sm:$0xff] %vm3933_vm14, %v11366_v17  ;;  %3935 = vst.msk [vmem:[%s10406_s17 + $0x10] sm:$0xff] %vm3933_vm14, %v11367_v26  ;;  %v10667_v4 = vld [vmem:[%s10763_s2] ss:$0 sm:$0xff]  ;;  %v5136_v30 = vadd.s32 3, %v11386_v9  ;;  %v5458_v18 = vsel %vm4611_vm2, nan, %v10425_v0 }
 0x367   : > { %3936 = vst.msk [vmem:[%s10406_s17 + $0x20] sm:$0xff] %vm3933_vm14, %v11368_v24  ;;  %3937 = vst.msk [vmem:[%s10406_s17 + $0x30] sm:$0xff] %vm3933_vm14, %v11369_v54  ;;  %vm10623_vm7 = vcmp.le.f32.partialorder %v11382_v61, 0.7853982  ;;  %v5773_v44 = vmul.f32 %v10667_v4, %v10374_v43  ;;  %v5775_v0 = vmul.f32 %v10667_v4, %v5458_v18 }
 0x368   : > { %3938 = vst.msk [vmem:[%s10406_s17 + $0x40] sm:$0xff] %vm3933_vm14, %v11370_v12  ;;  %3939 = vst.msk [vmem:[%s10406_s17 + $0x50] sm:$0xff] %vm3933_vm14, %v11371_v28  ;;  %v5137_v58 = vand.u32 3, %v5136_v30 }
 0x369   : > { %3940 = vst.msk [vmem:[%s10406_s17 + $0x60] sm:$0xff] %vm3933_vm14, %v11372_v55  ;;  %3941 = vst.msk [vmem:[%s10406_s17 + $0x70] sm:$0xff] %vm3933_vm14, %v11373_v19  ;;  %vm5844_vm14 = vcmask 359520  }
 0x36a   : > { %4018 = vst.msk [vmem:[%s10406_s17 + $0x8] sm:$0xff] %vm4017_vm4, %v10350_v62  ;;  %4020 = vst.msk [vmem:[%s10406_s17 + $0x18] sm:$0xff] %vm4017_vm4, %v10360_v22  ;;  %vm5142_vm12 = vcmp.eq.s32.totalorder %v5137_v58, 2  ;;  %vm5138_vm6 = vcmp.lt.s32.totalorder %v5137_v58, 2 }
 0x36b   : > { %4022 = vst.msk [vmem:[%s10406_s17 + $0x28] sm:$0xff] %vm4017_vm4, %v10382_v36  ;;  %4024 = vst.msk [vmem:[%s10406_s17 + $0x38] sm:$0xff] %vm4017_vm4, %v10384_v16 }
 0x36c   : > { %4026 = vst.msk [vmem:[%s10406_s17 + $0x48] sm:$0xff] %vm4017_vm4, %v10415_v34  ;;  %4028 = vst.msk [vmem:[%s10406_s17 + $0x58] sm:$0xff] %vm4017_vm4, %v10417_v11 }
 0x36d   : > { %4030 = vst.msk [vmem:[%s10406_s17 + $0x68] sm:$0xff] %vm4017_vm4, %v10478_v49  ;;  %4032 = vst.msk [vmem:[%s10406_s17 + $0x78] sm:$0xff] %vm4017_vm4, %v10480_v60  ;;  %vm5139_vm4 = vcmp.eq.s32.totalorder %v5137_v58, 0 }
 0x36e   : > { %3975 = vst.msk [vmem:[%s10406_s17] sm:$0xff] %vm3974_vm5, %v10243_v5  ;;  %3976 = vst.msk [vmem:[%s10406_s17 + $0x10] sm:$0xff] %vm3974_vm5, %v10299_v33  ;;  %v11374_v5 = vld [vmem:[#allocation10_spill] sm:$0xff] }
 0x36f   : > { %3977 = vst.msk [vmem:[%s10406_s17 + $0x20] sm:$0xff] %vm3974_vm5, %v10279_v40  ;;  %3978 = vst.msk [vmem:[%s10406_s17 + $0x30] sm:$0xff] %vm3974_vm5, %v10312_v25  ;;  %v11375_v40 = vld [vmem:[#allocation11_spill] sm:$0xff]  ;;  %v11376_v33 = vld [vmem:[#allocation114_spill] sm:$0xff] }
 0x370   : > { %3979 = vst.msk [vmem:[%s10406_s17 + $0x40] sm:$0xff] %vm3974_vm5, %v10309_v27  ;;  %3980 = vst.msk [vmem:[%s10406_s17 + $0x50] sm:$0xff] %vm3974_vm5, %v10321_v45  ;;  %v11377_v27 = vld [vmem:[#allocation22_spill] sm:$0xff]  ;;  %v11378_v25 = vld [vmem:[#allocation41_spill] sm:$0xff] }
 0x371   : > { %3981 = vst.msk [vmem:[%s10406_s17 + $0x60] sm:$0xff] %vm3974_vm5, %v10325_v23  ;;  %3982 = vst.msk [vmem:[%s10406_s17 + $0x70] sm:$0xff] %vm3974_vm5, %v10337_v47  ;;  %v11379_v45 = vld [vmem:[#allocation18_spill] sm:$0xff]  ;;  %v11380_v23 = vld [vmem:[#allocation17_spill] sm:$0xff] }
 0x372   : > { %5804 = vst.msk [vmem:[%s10406_s17 + $0x8] sm:$0xff] %vm5803_vm11, %v11374_v5  ;;  %5805 = vst.msk [vmem:[%s10406_s17 + $0x18] sm:$0xff] %vm5803_vm11, %v11375_v40  ;;  %v11381_v47 = vld [vmem:[#allocation20_spill] sm:$0xff]  ;;  %v5823_v12 = vpop.permute.xlu0 %5822 }
 0x373   : > { %5806 = vst.msk [vmem:[%s10406_s17 + $0x28] sm:$0xff] %vm5803_vm11, %v11376_v33  ;;  %5807 = vst.msk [vmem:[%s10406_s17 + $0x38] sm:$0xff] %vm5803_vm11, %v11377_v27  ;;  %v5774_v27 = vmul.f32 %v10667_v4, %v10400_v41 }
 0x374   : > { %5808 = vst.msk [vmem:[%s10406_s17 + $0x48] sm:$0xff] %vm5803_vm11, %v11378_v25  ;;  %5809 = vst.msk [vmem:[%s10406_s17 + $0x58] sm:$0xff] %vm5803_vm11, %v11379_v45  ;;  %v5562_v25 = vsel %vm4714_vm15, nan, %v10449_v51  ;;  %vm5885_vm15 = vcmask 621920  }
 0x375   : > { %5810 = vst.msk [vmem:[%s10406_s17 + $0x68] sm:$0xff] %vm5803_vm11, %v11380_v23  ;;  %5811 = vst.msk [vmem:[%s10406_s17 + $0x78] sm:$0xff] %vm5803_vm11, %v11381_v47  ;;  %v5776_v23 = vmul.f32 %v10667_v4, %v5562_v25 }
 0x376   : > { %4016 = vst.msk [vmem:[%s10406_s17] sm:$0xff] %vm4015_vm8, %v10350_v62  ;;  %4019 = vst.msk [vmem:[%s10406_s17 + $0x10] sm:$0xff] %vm4015_vm8, %v10360_v22  ;;  %v4826_v62 = vsel %vm4819_vm0, %v4822_v20, %v4825_v59  ;;  %v4913_v22 = vsel %vm4830_vm13, %v4912_v57, %v10490_v2  ;;  %v11387_v2 = vld [vmem:[#allocation76_spill] sm:$0xff] }
 0x377   : > { %4021 = vst.msk [vmem:[%s10406_s17 + $0x20] sm:$0xff] %vm4015_vm8, %v10382_v36  ;;  %4023 = vst.msk [vmem:[%s10406_s17 + $0x30] sm:$0xff] %vm4015_vm8, %v10384_v16  ;;  %v4914_v36 = vsub.s32 4, %v10323_v6  ;;  %v5656_v16 = vadd.s32 3, %v10421_v37  ;;  %v5042_v37 = vsel %vm4199_vm10, nan, %v5041_v1  ;;  %v11388_v38 = vxor.u32 2147483648, %v11387_v2 }
 0x378   : > { %4025 = vst.msk [vmem:[%s10406_s17 + $0x40] sm:$0xff] %vm4015_vm8, %v10415_v34  ;;  %4027 = vst.msk [vmem:[%s10406_s17 + $0x50] sm:$0xff] %vm4015_vm8, %v10417_v11  ;;  %v4827_v34 = vsel %vm4817_vm1, nan, %v4826_v62  ;;  %v4916_v11 = vsel %vm10623_vm7, %v11365_v15, %v4913_v22  ;;  %v5771_v42 = vmul.f32 %v10667_v4, %v5042_v37 }
 0x379   : > { %4029 = vst.msk [vmem:[%s10406_s17 + $0x60] sm:$0xff] %vm4015_vm8, %v10478_v49  ;;  %4031 = vst.msk [vmem:[%s10406_s17 + $0x70] sm:$0xff] %vm4015_vm8, %v10480_v60  ;;  %v4937_v14 = vmul.f32 %v10667_v4, %v4827_v34  ;;  %6382 = vcosq.f32 %v4916_v11  ;;  %v4915_v50 = vsel %vm4830_vm13, %v4914_v36, %v10323_v6  ;;  %v5657_v31 = vand.u32 3, %v5656_v16 }
 0x37a   : > { %6384 = vsinq.f32 %v4916_v11  ;;  %5845 = vst.msk [vmem:[%s10406_s17 + $0x8] sm:$0xff] %vm5844_vm14, %v5821_v3  ;;  %v4917_v46 = vsel %vm10623_vm7, 0, %v4915_v50  ;;  %5846 = vst.msk [vmem:[%s10406_s17 + $0x18] sm:$0xff] %vm5844_vm14, %v5823_v12 }
 0x37b   : > { %5832 = vrot.lane.b32.xlu1 %v4937_v14, %s6414_s10  ;;  %vm5659_vm10 = vcmp.eq.s32.totalorder %v5657_v31, 0  ;;  %vm5662_vm5 = vcmp.eq.s32.totalorder %v5657_v31, 2  ;;  %v4921_v29 = vand.u32 3, %v4917_v46  ;;  %vm5658_vm8 = vcmp.lt.s32.totalorder %v5657_v31, 2 }
 0x37c   : > { %v5661_v6 = vsel %vm5659_vm10, %v10482_v10, %v4821_v32  ;;  %v5664_v52 = vsel %vm5662_vm5, %v4824_v35, %v10487_v39  ;;  %v11389_v10 = vld [vmem:[#allocation71_spill] sm:$0xff]  ;;  %v5760_v54 = vadd.s32 3, %v4917_v46 }
 0x37d   : > { %v5665_v60 = vsel %vm5658_vm8, %v5661_v6, %v5664_v52  ;;  %v5141_v39 = vsel %vm5139_vm4, %v11389_v10, %v11388_v38  ;;  %vm4926_vm13 = vcmp.eq.s32.totalorder %v4921_v29, 2  ;;  %v11390_v43 = vxor.u32 2147483648, %v11389_v10 }
 0x37e   : > { %vm4923_vm2 = vcmp.eq.s32.totalorder %v4921_v29, 0  ;;  %v5666_v32 = vsel %vm4817_vm1, nan, %v5665_v60  ;;  %vm4922_vm11 = vcmp.lt.s32.totalorder %v4921_v29, 2  ;;  %v5761_v57 = vand.u32 3, %v5760_v54 }
 0x37f   : > { %5861 = vrot.lane.b32.xlu1 %v5771_v42, %s6415_s20  ;;  %v5144_v21 = vsel %vm5142_vm12, %v11390_v43, %v11387_v2  ;;  %v5777_v55 = vmul.f32 %v10667_v4, %v5666_v32 }
 0x380   : > { %v5145_v24 = vsel %vm5138_vm6, %v5141_v39, %v5144_v21  ;;  %vm5763_vm1 = vcmp.eq.s32.totalorder %v5761_v57, 0  ;;  %vm5766_vm0 = vcmp.eq.s32.totalorder %v5761_v57, 2 }
 0x381   : > { %v5146_v59 = vsel %vm4302_vm3, nan, %v5145_v24  ;;  %vm5762_vm3 = vcmp.lt.s32.totalorder %v5761_v57, 2 }
 0x382   : > { %v5772_v5 = vmul.f32 %v10667_v4, %v5146_v59 }
 0x383   : > { %v6383_v49 = vpop.eup %6382  ;;  %5865 = vrot.lane.b32.xlu1 %v5773_v44, %s6415_s20 }
 0x384   : > { %v6385_v53 = vpop.eup %6384  ;;  %v4927_v8 = vxor.u32 2147483648, %v6383_v49 }
 0x385   : > { %v4924_v35 = vxor.u32 2147483648, %v6385_v53  ;;  %v5825_v20 = vpop.permute.xlu1 %5824 }
 0x386   : > { %v4928_v13 = vsel %vm4926_vm13, %v4927_v8, %v6385_v53  ;;  %v5768_v33 = vsel %vm5766_vm0, %v4927_v8, %v6385_v53  ;;  %5847 = vst.msk [vmem:[%s10406_s17 + $0x28] sm:$0xff] %vm5844_vm14, %v5825_v20 }
 0x387   : > { %v4925_v17 = vsel %vm4923_vm2, %v6383_v49, %v4924_v35  ;;  %5869 = vrot.lane.b32.xlu1 %v5775_v0, %s6415_s20  ;;  %v5765_v40 = vsel %vm5763_vm1, %v6383_v49, %v4924_v35 }
 0x388   : > { %v4929_v26 = vsel %vm4922_vm11, %v4925_v17, %v4928_v13  ;;  %v5769_v45 = vsel %vm5762_vm3, %v5765_v40, %v5768_v33 }
 0x389   : > { %v4930_v28 = vsel %vm4920_vm9, nan, %v4929_v26  ;;  %v5770_v47 = vsel %vm4920_vm9, nan, %v5769_v45 }
 0x38a   : > { %v4938_v56 = vmul.f32 %v10667_v4, %v4930_v28  ;;  %v5778_v41 = vmul.f32 %v10667_v4, %v5770_v47 }
 0x38b   : > { %5873 = vrot.lane.b32.xlu1 %v5777_v55, %s6415_s20 }
 0x38c   : > { %5834 = vrot.lane.b32.xlu0 %v4938_v56, %s6414_s10 }
 0x390   : > { %5863 = vrot.lane.b32.xlu0 %v5772_v5, %s6415_s20 }
 0x394   : > { %5867 = vrot.lane.b32.xlu0 %v5774_v27, %s6415_s20 }
 0x398   : > { %5871 = vrot.lane.b32.xlu0 %v5776_v23, %s6415_s20 }
 0x39c   : > { %5875 = vrot.lane.b32.xlu0 %v5778_v41, %s6415_s20  ;;  %v5827_v63 = vpop.permute.xlu0 %5826 }
 0x39d   : > { %5848 = vst.msk [vmem:[%s10406_s17 + $0x38] sm:$0xff] %vm5844_vm14, %v5827_v63 }
 0x3b3   : > { %v5829_v51 = vpop.permute.xlu1 %5828 }
 0x3b4   : > { %5849 = vst.msk [vmem:[%s10406_s17 + $0x48] sm:$0xff] %vm5844_vm14, %v5829_v51 }
 0x3c3   : > { %v5831_v15 = vpop.permute.xlu0 %5830 }
 0x3c4   : > { %5850 = vst.msk [vmem:[%s10406_s17 + $0x58] sm:$0xff] %vm5844_vm14, %v5831_v15 }
 0x3ed   : > { %v5833_v61 = vpop.permute.xlu1 %5832 }
 0x3ee   : > { %5851 = vst.msk [vmem:[%s10406_s17 + $0x68] sm:$0xff] %vm5844_vm14, %v5833_v61 }
 0x3f1   : > { %v5862_v48 = vpop.permute.xlu1 %5861 }
 0x3f2   : > { %5886 = vst.msk [vmem:[%s10406_s17 + $0x8] sm:$0xff] %vm5885_vm15, %v5862_v48 }
 0x3f5   : > { %v5866_v1 = vpop.permute.xlu1 %5865 }
 0x3f6   : > { %5888 = vst.msk [vmem:[%s10406_s17 + $0x28] sm:$0xff] %vm5885_vm15, %v5866_v1 }
 0x3f9   : > { %v5870_v62 = vpop.permute.xlu1 %5869 }
 0x3fa   : > { %5890 = vst.msk [vmem:[%s10406_s17 + $0x48] sm:$0xff] %vm5885_vm15, %v5870_v62 }
 0x3fd   : > { %v5874_v22 = vpop.permute.xlu1 %5873 }
 0x3fe   : > { %v5835_v36 = vpop.permute.xlu0 %5834  ;;  %5892 = vst.msk [vmem:[%s10406_s17 + $0x68] sm:$0xff] %vm5885_vm15, %v5874_v22 }
 0x3ff   : > { %5852 = vst.msk [vmem:[%s10406_s17 + $0x78] sm:$0xff] %vm5844_vm14, %v5835_v36 }
 0x402   : > { %v5864_v16 = vpop.permute.xlu0 %5863 }
 0x403   : > { %5887 = vst.msk [vmem:[%s10406_s17 + $0x18] sm:$0xff] %vm5885_vm15, %v5864_v16 }
 0x406   : > { %v5868_v34 = vpop.permute.xlu0 %5867 }
 0x407   : > { %5889 = vst.msk [vmem:[%s10406_s17 + $0x38] sm:$0xff] %vm5885_vm15, %v5868_v34 }
 0x40a   : > { %v5872_v11 = vpop.permute.xlu0 %5871 }
 0x40b   : > { %5891 = vst.msk [vmem:[%s10406_s17 + $0x58] sm:$0xff] %vm5885_vm15, %v5872_v11 }
 0x40e   : > { %v5876_v4 = vpop.permute.xlu0 %5875 }
 0x40f   : > { %5893 = vst.msk [vmem:[%s10406_s17 + $0x78] sm:$0xff] %vm5885_vm15, %v5876_v4 }
 0x410 PF: > { %s13_s12 = sadd.s32 1, %s6396_s12  }
 0x411   : > { %p10_p4 = scmp.ge.s32.totalorder %s13_s12, 6  }
 0x413   :  { %12 = sbr.rel (!%p10_p4) target bundleno = 1 (0x1), region = 64 }

</bundles_post_ra>
